<compile_context>
chip_gen: v7x
topology: tpu7x:2x2x1
jax: 0.10.0
libtpu: 0.0.40
codegen_flags: <defaults>
</compile_context>

<pallas_src>
import functools

import jax
import jax.numpy as jnp
from jax import lax
from jax.experimental import pallas as pl
from jax.experimental.pallas import tpu as pltpu


def _round_up(n, m):
    return ((n + m - 1) // m) * m


# ---------------------------------------------------------------------------
# Pallas kernel: full 2-layer LSTM recurrence + final Linear for one batch block
# ---------------------------------------------------------------------------
def _lstm_fc_kernel(x_ref,        # (T*Bb, In)    time-major packed input block
                    wih0_ref,     # (In, 4Hp)     layer-0 input weights (gate-padded)
                    whh0_ref,     # (Hp, 4Hp)     layer-0 recurrent weights
                    b0_ref,       # (1, 4Hp)      layer-0 combined bias (b_ih + b_hh)
                    w1_ref,       # (2Hp, 4Hp)    layer-1 [W_ih ; W_hh] stacked
                    b1_ref,       # (1, 4Hp)      layer-1 combined bias
                    wfc_ref,      # (Hp, Op)      fc weight (transposed, padded)
                    bfc_ref,      # (1, Op)       fc bias (padded)
                    out_ref,      # (Bb, Op)      output block
                    *, seq_len, block_b, hidden_pad):
    T, Bb, Hp = seq_len, block_b, hidden_pad
    f32 = jnp.float32

    whh0 = whh0_ref[...]
    w1 = w1_ref[...]
    wdt = whh0.dtype                      # matmul input dtype (f32 or bf16 weights)

    # --- Hoisted layer-0 input projection: one MXU matmul for all T steps,
    #     bias folded in (single broadcast, outside the serial loop).
    x_all = x_ref[...].astype(wdt)
    x_proj = (jnp.dot(x_all, wih0_ref[...], preferred_element_type=f32)
              + b0_ref[...].astype(f32))                       # (T*Bb, 4Hp)

    # --- Hoisted layer-1 bias broadcast (done once, not per timestep).
    b1 = jnp.broadcast_to(b1_ref[...].astype(f32), (Bb, 4 * Hp))

    def gates_to_hc(gates, c):
        # Hp is a multiple of 128 -> each gate slice is whole lane-aligned vregs.
        i = jax.nn.sigmoid(gates[:, 0 * Hp:1 * Hp])
        f = jax.nn.sigmoid(gates[:, 1 * Hp:2 * Hp])
        g = jnp.tanh(gates[:, 2 * Hp:3 * Hp])
        o = jax.nn.sigmoid(gates[:, 3 * Hp:4 * Hp])
        c_new = f * c + i * g
        h_new = o * jnp.tanh(c_new)
        return h_new, c_new

    zeros = jnp.zeros((Bb, Hp), f32)
    h0, c0, h1, c1 = zeros, zeros, zeros, zeros

    # --- Fully (statically) unrolled time loop: T is static and small, so all
    #     slices are static and the scheduler sees across timesteps.
    for t in range(T):
        xp_t = x_proj[t * Bb:(t + 1) * Bb, :]                  # static sublane slice
        g0 = xp_t + jnp.dot(h0.astype(wdt), whh0, preferred_element_type=f32)
        h0, c0 = gates_to_hc(g0, c0)
        # Layer 1: one fused (Bb, 2Hp) @ (2Hp, 4Hp) matmul instead of two.
        hcat = jnp.concatenate([h0, h1], axis=1).astype(wdt)
        g1 = jnp.dot(hcat, w1, preferred_element_type=f32) + b1
        h1, c1 = gates_to_hc(g1, c1)

    # fc on the last-timestep hidden state of the top layer (lane-dense output).
    out_ref[...] = (jnp.dot(h1.astype(wdt), wfc_ref[...], preferred_element_type=f32)
                    + bfc_ref[...].astype(f32)).astype(out_ref.dtype)


# ---------------------------------------------------------------------------
# Wrapper
# ---------------------------------------------------------------------------
def motion_predictor_multistep(x, kparams, *, hidden_size, future_steps, output_size):
    """x: (B, T, input_size) batch-first, like the PyTorch module."""
    B, T, In = x.shape
    O = future_steps * output_size
    Hp = int(kparams["Hp"])
    Op = int(kparams["Op"])

    # Batch blocking: fill sublanes (>=8 rows); shard large batches over a
    # "parallel" grid axis (uses both TensorCores on v7x, no-op on v5e/v6e).
    if B <= 128:
        block_b = _round_up(max(B, 8), 8)
        B_pad = block_b
    else:
        block_b = 128
        B_pad = _round_up(B, 128)
    G = B_pad // block_b

    xf = jnp.zeros((B_pad, T, In), jnp.float32).at[:B].set(x.astype(jnp.float32))
    # (G, Bb, T, In) -> (G, T, Bb, In) -> (G, T*Bb, In): time-major within each block.
    x_packed = (xf.reshape(G, block_b, T, In)
                  .transpose(0, 2, 1, 3)
                  .reshape(G, T * block_b, In))

    w_args = (kparams["wih0"], kparams["whh0"], kparams["b0"],
              kparams["w1"], kparams["b1"], kparams["wfc"], kparams["bfc"])

    kernel = functools.partial(_lstm_fc_kernel,
                               seq_len=T, block_b=block_b, hidden_pad=Hp)

    # Advisory cost estimate: the serial recurrence is otherwise invisible to XLA.
    flops = G * (2 * T * block_b * In * 4 * Hp
                 + T * (2 * block_b * Hp * 4 * Hp + 2 * block_b * 2 * Hp * 4 * Hp)
                 + 2 * block_b * Hp * Op)
    transc = G * T * 2 * 5 * block_b * Hp
    bytes_acc = (x_packed.size * x_packed.dtype.itemsize
                 + sum(int(w.size) * w.dtype.itemsize for w in w_args)
                 + B_pad * Op * 4)

    def weight_spec(arr):
        return pl.BlockSpec(arr.shape, lambda g: (0, 0))       # resident across grid

    # NOTE(v7x): everything here is VMEM-resident with no T-tiling; for large
    # T/B/H re-derive the VMEM budget (64 MiB cap) and stream x over T chunks.
    out = pl.pallas_call(
        kernel,
        out_shape=jax.ShapeDtypeStruct((B_pad, Op), jnp.float32),
        grid=(G,),
        in_specs=[pl.BlockSpec((None, T * block_b, In), lambda g: (g, 0, 0))]
                 + [weight_spec(w) for w in w_args],
        out_specs=pl.BlockSpec((block_b, Op), lambda g: (g, 0)),
        compiler_params=pltpu.CompilerParams(
            dimension_semantics=("parallel",)),
        cost_estimate=pl.CostEstimate(flops=int(flops),
                                      transcendentals=int(transc),
                                      bytes_accessed=int(bytes_acc)),
    )(x_packed, *w_args)

    return out[:B, :O].reshape(B, future_steps, output_size)


# ---------------------------------------------------------------------------
# Parameter init (PyTorch layout/init) + kernel-layout preparation (pad + transpose)
# ---------------------------------------------------------------------------
def init_params(key, input_size, hidden_size, output_size, future_steps):
    H = hidden_size
    O = output_size * future_steps
    stdv = 1.0 / (H ** 0.5)
    keys = jax.random.split(key, 10)

    def u(k, shape):
        return jax.random.uniform(k, shape, jnp.float32, minval=-stdv, maxval=stdv)

    return {
        "w_ih0": u(keys[0], (4 * H, input_size)),
        "w_hh0": u(keys[1], (4 * H, H)),
        "b_ih0": u(keys[2], (4 * H,)),
        "b_hh0": u(keys[3], (4 * H,)),
        "w_ih1": u(keys[4], (4 * H, H)),
        "w_hh1": u(keys[5], (4 * H, H)),
        "b_ih1": u(keys[6], (4 * H,)),
        "b_hh1": u(keys[7], (4 * H,)),
        "fc_w": u(keys[8], (O, H)),
        "fc_b": u(keys[9], (O,)),
    }


def prepare_kernel_params(params, *, input_size, hidden_size, output_size, future_steps,
                          weight_dtype=jnp.float32):
    """Transpose to (in, out) layout and pad each gate block to 128 lanes.

    Padded weight rows/cols and bias lanes are zero, so padded h/c lanes stay
    exactly zero through the recurrence (g = tanh(0) = 0 kills the i*g term).
    Set weight_dtype=jnp.bfloat16 on v6e/v7x for MXU throughput (f32 accumulation
    and f32 gate math are kept in-kernel; keep f32 on v5e).
    """
    H, In = hidden_size, input_size
    O = output_size * future_steps
    Hp = _round_up(max(H, 128), 128)
    Op = _round_up(max(O, 128), 128)

    def pad_gates(w_t, rows_pad):
        # w_t: (rows, 4H), gate order (i,f,g,o) -> (rows_pad, 4Hp), zero padding.
        rows = w_t.shape[0]
        out = jnp.zeros((rows_pad, 4 * Hp), jnp.float32)
        for k in range(4):
            out = out.at[:rows, k * Hp:k * Hp + H].set(w_t[:, k * H:(k + 1) * H])
        return out

    wih0 = pad_gates(params["w_ih0"].T, In)                              # (In, 4Hp)
    whh0 = pad_gates(params["w_hh0"].T, Hp)                              # (Hp, 4Hp)
    w1 = jnp.concatenate([pad_gates(params["w_ih1"].T, Hp),
                          pad_gates(params["w_hh1"].T, Hp)], axis=0)     # (2Hp, 4Hp)
    b0 = pad_gates((params["b_ih0"] + params["b_hh0"]).reshape(1, 4 * H), 1)
    b1 = pad_gates((params["b_ih1"] + params["b_hh1"]).reshape(1, 4 * H), 1)

    wfc = jnp.zeros((Hp, Op), jnp.float32).at[:H, :O].set(params["fc_w"].T)
    bfc = jnp.zeros((1, Op), jnp.float32).at[0, :O].set(params["fc_b"])

    cast = lambda w: w.astype(weight_dtype)
    return {
        "wih0": cast(wih0), "whh0": cast(whh0), "b0": b0,
        "w1": cast(w1), "b1": b1,
        "wfc": cast(wfc), "bfc": bfc,
        "Hp": Hp, "Op": Op,
    }


# ---------------------------------------------------------------------------
# Pure-JAX reference (unpadded, PyTorch semantics) for the correctness check
# ---------------------------------------------------------------------------
def reference_forward(x, params, *, hidden_size, future_steps, output_size):
    H = hidden_size
    B, T, _ = x.shape

    def cell(x_t, h, c, w_ih, w_hh, b_ih, b_hh):
        gates = x_t @ w_ih.T + h @ w_hh.T + b_ih + b_hh
        i = jax.nn.sigmoid(gates[:, 0 * H:1 * H])
        f = jax.nn.sigmoid(gates[:, 1 * H:2 * H])
        g = jnp.tanh(gates[:, 2 * H:3 * H])
        o = jax.nn.sigmoid(gates[:, 3 * H:4 * H])
        c = f * c + i * g
        h = o * jnp.tanh(c)
        return h, c

    def scan_fn(carry, x_t):
        h0, c0, h1, c1 = carry
        h0, c0 = cell(x_t, h0, c0, params["w_ih0"], params["w_hh0"],
                      params["b_ih0"], params["b_hh0"])
        h1, c1 = cell(h0, h1, c1, params["w_ih1"], params["w_hh1"],
                      params["b_ih1"], params["b_hh1"])
        return (h0, c0, h1, c1), None

    zeros = jnp.zeros((B, H), jnp.float32)
    (_, _, h1, _), _ = lax.scan(scan_fn, (zeros, zeros, zeros, zeros),
                                jnp.transpose(x, (1, 0, 2)).astype(jnp.float32))
    out = h1 @ params["fc_w"].T + params["fc_b"]
    return out.reshape(B, future_steps, output_size)


if __name__ == "__main__":
    # Small shapes consistent with the module's forward (module defaults).
    batch, seq_len = 2, 8
    input_size, hidden_size, output_size, future_steps = 1, 64, 1, 5

    key = jax.random.PRNGKey(0)
    k_params, k_x = jax.random.split(key)
    params = init_params(k_params, input_size, hidden_size, output_size, future_steps)
    kparams = prepare_kernel_params(
        params, input_size=input_size, hidden_size=hidden_size,
        output_size=output_size, future_steps=future_steps,
        weight_dtype=jnp.float32)   # use jnp.bfloat16 on v6e/v7x for MXU throughput
    x = jax.random.normal(k_x, (batch, seq_len, input_size), dtype=jnp.float32)

    out = motion_predictor_multistep(
        x, kparams,
        hidden_size=hidden_size, future_steps=future_steps, output_size=output_size)
    out = jax.block_until_ready(out)

    ref = reference_forward(
        x, params,
        hidden_size=hidden_size, future_steps=future_steps, output_size=output_size)
    ref = jax.block_until_ready(ref)

    assert out.shape == (batch, future_steps, output_size), out.shape
    assert jnp.allclose(out, ref, atol=1e-4, rtol=1e-4), (out, ref)

    print("KERNEL_OK")
</pallas_src>

<mosaic_0001>
module attributes {stable_mosaic.version = 11 : i64} {
  func.func @_lstm_fc_kernel(%arg0: i32, %arg1: memref<1x64x1xf32, #tpu.memory_space<vmem>>, %arg2: memref<1x512xf32, #tpu.memory_space<vmem>>, %arg3: memref<128x512xf32, #tpu.memory_space<vmem>>, %arg4: memref<1x512xf32, #tpu.memory_space<vmem>>, %arg5: memref<256x512xf32, #tpu.memory_space<vmem>>, %arg6: memref<1x512xf32, #tpu.memory_space<vmem>>, %arg7: memref<128x128xf32, #tpu.memory_space<vmem>>, %arg8: memref<1x128xf32, #tpu.memory_space<vmem>>, %arg9: memref<8x128xf32, #tpu.memory_space<vmem>>) attributes {dimension_semantics = [#tpu.dimension_semantics<parallel>], iteration_bounds = array<i64: 1>, scalar_prefetch = 0 : i64, scratch_operands = 0 : i64, tpu.core_type = #tpu.core_type<tc>, window_params = [{transform_indices = @transform_0, window_bounds = array<i64: 1, 64, 1>}, {pipeline_mode = #tpu.pipeline_mode<synchronous>, transform_indices = @transform_1, window_bounds = array<i64: 1, 512>}, {pipeline_mode = #tpu.pipeline_mode<synchronous>, transform_indices = @transform_2, window_bounds = array<i64: 128, 512>}, {pipeline_mode = #tpu.pipeline_mode<synchronous>, transform_indices = @transform_3, window_bounds = array<i64: 1, 512>}, {pipeline_mode = #tpu.pipeline_mode<synchronous>, transform_indices = @transform_4, window_bounds = array<i64: 256, 512>}, {pipeline_mode = #tpu.pipeline_mode<synchronous>, transform_indices = @transform_5, window_bounds = array<i64: 1, 512>}, {pipeline_mode = #tpu.pipeline_mode<synchronous>, transform_indices = @transform_6, window_bounds = array<i64: 128, 128>}, {pipeline_mode = #tpu.pipeline_mode<synchronous>, transform_indices = @transform_7, window_bounds = array<i64: 1, 128>}, {transform_indices = @transform_8, window_bounds = array<i64: 8, 128>}]} {
    %c0 = arith.constant 0 : index
    %c0_0 = arith.constant 0 : index
    %0 = vector.load %arg3[%c0, %c0_0] : memref<128x512xf32, #tpu.memory_space<vmem>>, vector<128x512xf32>
    %c0_1 = arith.constant 0 : index
    %c0_2 = arith.constant 0 : index
    %1 = vector.load %arg5[%c0_1, %c0_2] : memref<256x512xf32, #tpu.memory_space<vmem>>, vector<256x512xf32>
    %c0_3 = arith.constant 0 : index
    %c0_4 = arith.constant 0 : index
    %c0_5 = arith.constant 0 : index
    %2 = vector.load %arg1[%c0_3, %c0_4, %c0_5] : memref<1x64x1xf32, #tpu.memory_space<vmem>>, vector<1x64x1xf32>
    %3 = vector.shape_cast %2 : vector<1x64x1xf32> to vector<64x1xf32>
    %c0_6 = arith.constant 0 : index
    %c0_7 = arith.constant 0 : index
    %4 = vector.load %arg2[%c0_6, %c0_7] : memref<1x512xf32, #tpu.memory_space<vmem>>, vector<1x512xf32>
    %cst = arith.constant dense<0.000000e+00> : vector<64x512xf32>
    %5 = tpu.matmul %3, %4, %cst {dimension_numbers = #tpu.dot_dimension_numbers<[1], [0], [0], [1], [0, 0, 1, 1], [], []>} : vector<64x1xf32>, vector<1x512xf32>, vector<64x512xf32> -> vector<64x512xf32>
    %c0_8 = arith.constant 0 : index
    %c0_9 = arith.constant 0 : index
    %6 = vector.load %arg4[%c0_8, %c0_9] : memref<1x512xf32, #tpu.memory_space<vmem>>, vector<1x512xf32>
    %7 = vector.broadcast %6 : vector<1x512xf32> to vector<64x512xf32>
    %8 = arith.addf %5, %7 : vector<64x512xf32>
    %c0_10 = arith.constant 0 : index
    %c0_11 = arith.constant 0 : index
    %9 = vector.load %arg6[%c0_10, %c0_11] : memref<1x512xf32, #tpu.memory_space<vmem>>, vector<1x512xf32>
    %10 = vector.shape_cast %9 : vector<1x512xf32> to vector<1x512xf32>
    %11 = vector.broadcast %10 : vector<1x512xf32> to vector<8x512xf32>
    %cst_12 = arith.constant 0.000000e+00 : f32
    %12 = vector.broadcast %cst_12 : f32 to vector<8x128xf32>
    %13 = vector.extract_strided_slice %8 {offsets = [0, 0], sizes = [8, 512], strides = [1, 1]} : vector<64x512xf32> to vector<8x512xf32>
    %cst_13 = arith.constant dense<0.000000e+00> : vector<8x512xf32>
    %14 = tpu.matmul %12, %0, %cst_13 {dimension_numbers = #tpu.dot_dimension_numbers<[1], [0], [0], [1], [0, 0, 1, 1], [], []>} : vector<8x128xf32>, vector<128x512xf32>, vector<8x512xf32> -> vector<8x512xf32>
    %15 = arith.addf %13, %14 : vector<8x512xf32>
    %16 = vector.extract_strided_slice %15 {offsets = [0, 0], sizes = [8, 128], strides = [1, 1]} : vector<8x512xf32> to vector<8x128xf32>
    %17 = arith.negf %16 : vector<8x128xf32>
    %18 = math.exp %17 : vector<8x128xf32>
    %cst_14 = arith.constant 1.000000e+00 : f32
    %19 = vector.broadcast %cst_14 : f32 to vector<8x128xf32>
    %20 = arith.addf %19, %18 : vector<8x128xf32>
    %21 = arith.divf %19, %20 : vector<8x128xf32>
    %22 = vector.extract_strided_slice %15 {offsets = [0, 128], sizes = [8, 128], strides = [1, 1]} : vector<8x512xf32> to vector<8x128xf32>
    %23 = arith.negf %22 : vector<8x128xf32>
    %24 = math.exp %23 : vector<8x128xf32>
    %cst_15 = arith.constant 1.000000e+00 : f32
    %25 = vector.broadcast %cst_15 : f32 to vector<8x128xf32>
    %26 = arith.addf %25, %24 : vector<8x128xf32>
    %27 = arith.divf %25, %26 : vector<8x128xf32>
    %28 = vector.extract_strided_slice %15 {offsets = [0, 256], sizes = [8, 128], strides = [1, 1]} : vector<8x512xf32> to vector<8x128xf32>
    %29 = math.tanh %28 : vector<8x128xf32>
    %30 = vector.extract_strided_slice %15 {offsets = [0, 384], sizes = [8, 128], strides = [1, 1]} : vector<8x512xf32> to vector<8x128xf32>
    %31 = arith.negf %30 : vector<8x128xf32>
    %32 = math.exp %31 : vector<8x128xf32>
    %cst_16 = arith.constant 1.000000e+00 : f32
    %33 = vector.broadcast %cst_16 : f32 to vector<8x128xf32>
    %34 = arith.addf %33, %32 : vector<8x128xf32>
    %35 = arith.divf %33, %34 : vector<8x128xf32>
    %36 = arith.mulf %27, %12 : vector<8x128xf32>
    %37 = arith.mulf %21, %29 : vector<8x128xf32>
    %38 = arith.addf %36, %37 : vector<8x128xf32>
    %39 = math.tanh %38 : vector<8x128xf32>
    %40 = arith.mulf %35, %39 : vector<8x128xf32>
    %41 = tpu.concatenate %40, %12 in 1 : vector<8x128xf32>, vector<8x128xf32> -> vector<8x256xf32>
    %cst_17 = arith.constant dense<0.000000e+00> : vector<8x512xf32>
    %42 = tpu.matmul %41, %1, %cst_17 {dimension_numbers = #tpu.dot_dimension_numbers<[1], [0], [0], [1], [0, 0, 1, 1], [], []>} : vector<8x256xf32>, vector<256x512xf32>, vector<8x512xf32> -> vector<8x512xf32>
    %43 = arith.addf %42, %11 : vector<8x512xf32>
    %44 = vector.extract_strided_slice %43 {offsets = [0, 0], sizes = [8, 128], strides = [1, 1]} : vector<8x512xf32> to vector<8x128xf32>
    %45 = arith.negf %44 : vector<8x128xf32>
    %46 = math.exp %45 : vector<8x128xf32>
    %cst_18 = arith.constant 1.000000e+00 : f32
    %47 = vector.broadcast %cst_18 : f32 to vector<8x128xf32>
    %48 = arith.addf %47, %46 : vector<8x128xf32>
    %49 = arith.divf %47, %48 : vector<8x128xf32>
    %50 = vector.extract_strided_slice %43 {offsets = [0, 128], sizes = [8, 128], strides = [1, 1]} : vector<8x512xf32> to vector<8x128xf32>
    %51 = arith.negf %50 : vector<8x128xf32>
    %52 = math.exp %51 : vector<8x128xf32>
    %cst_19 = arith.constant 1.000000e+00 : f32
    %53 = vector.broadcast %cst_19 : f32 to vector<8x128xf32>
    %54 = arith.addf %53, %52 : vector<8x128xf32>
    %55 = arith.divf %53, %54 : vector<8x128xf32>
    %56 = vector.extract_strided_slice %43 {offsets = [0, 256], sizes = [8, 128], strides = [1, 1]} : vector<8x512xf32> to vector<8x128xf32>
    %57 = math.tanh %56 : vector<8x128xf32>
    %58 = vector.extract_strided_slice %43 {offsets = [0, 384], sizes = [8, 128], strides = [1, 1]} : vector<8x512xf32> to vector<8x128xf32>
    %59 = arith.negf %58 : vector<8x128xf32>
    %60 = math.exp %59 : vector<8x128xf32>
    %cst_20 = arith.constant 1.000000e+00 : f32
    %61 = vector.broadcast %cst_20 : f32 to vector<8x128xf32>
    %62 = arith.addf %61, %60 : vector<8x128xf32>
    %63 = arith.divf %61, %62 : vector<8x128xf32>
    %64 = arith.mulf %55, %12 : vector<8x128xf32>
    %65 = arith.mulf %49, %57 : vector<8x128xf32>
    %66 = arith.addf %64, %65 : vector<8x128xf32>
    %67 = math.tanh %66 : vector<8x128xf32>
    %68 = arith.mulf %63, %67 : vector<8x128xf32>
    %69 = vector.extract_strided_slice %8 {offsets = [8, 0], sizes = [8, 512], strides = [1, 1]} : vector<64x512xf32> to vector<8x512xf32>
    %cst_21 = arith.constant dense<0.000000e+00> : vector<8x512xf32>
    %70 = tpu.matmul %40, %0, %cst_21 {dimension_numbers = #tpu.dot_dimension_numbers<[1], [0], [0], [1], [0, 0, 1, 1], [], []>} : vector<8x128xf32>, vector<128x512xf32>, vector<8x512xf32> -> vector<8x512xf32>
    %71 = arith.addf %69, %70 : vector<8x512xf32>
    %72 = vector.extract_strided_slice %71 {offsets = [0, 0], sizes = [8, 128], strides = [1, 1]} : vector<8x512xf32> to vector<8x128xf32>
    %73 = arith.negf %72 : vector<8x128xf32>
    %74 = math.exp %73 : vector<8x128xf32>
    %cst_22 = arith.constant 1.000000e+00 : f32
    %75 = vector.broadcast %cst_22 : f32 to vector<8x128xf32>
    %76 = arith.addf %75, %74 : vector<8x128xf32>
    %77 = arith.divf %75, %76 : vector<8x128xf32>
    %78 = vector.extract_strided_slice %71 {offsets = [0, 128], sizes = [8, 128], strides = [1, 1]} : vector<8x512xf32> to vector<8x128xf32>
    %79 = arith.negf %78 : vector<8x128xf32>
    %80 = math.exp %79 : vector<8x128xf32>
    %cst_23 = arith.constant 1.000000e+00 : f32
    %81 = vector.broadcast %cst_23 : f32 to vector<8x128xf32>
    %82 = arith.addf %81, %80 : vector<8x128xf32>
    %83 = arith.divf %81, %82 : vector<8x128xf32>
    %84 = vector.extract_strided_slice %71 {offsets = [0, 256], sizes = [8, 128], strides = [1, 1]} : vector<8x512xf32> to vector<8x128xf32>
    %85 = math.tanh %84 : vector<8x128xf32>
    %86 = vector.extract_strided_slice %71 {offsets = [0, 384], sizes = [8, 128], strides = [1, 1]} : vector<8x512xf32> to vector<8x128xf32>
    %87 = arith.negf %86 : vector<8x128xf32>
    %88 = math.exp %87 : vector<8x128xf32>
    %cst_24 = arith.constant 1.000000e+00 : f32
    %89 = vector.broadcast %cst_24 : f32 to vector<8x128xf32>
    %90 = arith.addf %89, %88 : vector<8x128xf32>
    %91 = arith.divf %89, %90 : vector<8x128xf32>
    %92 = arith.mulf %83, %38 : vector<8x128xf32>
    %93 = arith.mulf %77, %85 : vector<8x128xf32>
    %94 = arith.addf %92, %93 : vector<8x128xf32>
    %95 = math.tanh %94 : vector<8x128xf32>
    %96 = arith.mulf %91, %95 : vector<8x128xf32>
    %97 = tpu.concatenate %96, %68 in 1 : vector<8x128xf32>, vector<8x128xf32> -> vector<8x256xf32>
    %cst_25 = arith.constant dense<0.000000e+00> : vector<8x512xf32>
    %98 = tpu.matmul %97, %1, %cst_25 {dimension_numbers = #tpu.dot_dimension_numbers<[1], [0], [0], [1], [0, 0, 1, 1], [], []>} : vector<8x256xf32>, vector<256x512xf32>, vector<8x512xf32> -> vector<8x512xf32>
    %99 = arith.addf %98, %11 : vector<8x512xf32>
    %100 = vector.extract_strided_slice %99 {offsets = [0, 0], sizes = [8, 128], strides = [1, 1]} : vector<8x512xf32> to vector<8x128xf32>
    %101 = arith.negf %100 : vector<8x128xf32>
    %102 = math.exp %101 : vector<8x128xf32>
    %cst_26 = arith.constant 1.000000e+00 : f32
    %103 = vector.broadcast %cst_26 : f32 to vector<8x128xf32>
    %104 = arith.addf %103, %102 : vector<8x128xf32>
    %105 = arith.divf %103, %104 : vector<8x128xf32>
    %106 = vector.extract_strided_slice %99 {offsets = [0, 128], sizes = [8, 128], strides = [1, 1]} : vector<8x512xf32> to vector<8x128xf32>
    %107 = arith.negf %106 : vector<8x128xf32>
    %108 = math.exp %107 : vector<8x128xf32>
    %cst_27 = arith.constant 1.000000e+00 : f32
    %109 = vector.broadcast %cst_27 : f32 to vector<8x128xf32>
    %110 = arith.addf %109, %108 : vector<8x128xf32>
    %111 = arith.divf %109, %110 : vector<8x128xf32>
    %112 = vector.extract_strided_slice %99 {offsets = [0, 256], sizes = [8, 128], strides = [1, 1]} : vector<8x512xf32> to vector<8x128xf32>
    %113 = math.tanh %112 : vector<8x128xf32>
    %114 = vector.extract_strided_slice %99 {offsets = [0, 384], sizes = [8, 128], strides = [1, 1]} : vector<8x512xf32> to vector<8x128xf32>
    %115 = arith.negf %114 : vector<8x128xf32>
    %116 = math.exp %115 : vector<8x128xf32>
    %cst_28 = arith.constant 1.000000e+00 : f32
    %117 = vector.broadcast %cst_28 : f32 to vector<8x128xf32>
    %118 = arith.addf %117, %116 : vector<8x128xf32>
    %119 = arith.divf %117, %118 : vector<8x128xf32>
    %120 = arith.mulf %111, %66 : vector<8x128xf32>
    %121 = arith.mulf %105, %113 : vector<8x128xf32>
    %122 = arith.addf %120, %121 : vector<8x128xf32>
    %123 = math.tanh %122 : vector<8x128xf32>
    %124 = arith.mulf %119, %123 : vector<8x128xf32>
    %125 = vector.extract_strided_slice %8 {offsets = [16, 0], sizes = [8, 512], strides = [1, 1]} : vector<64x512xf32> to vector<8x512xf32>
    %cst_29 = arith.constant dense<0.000000e+00> : vector<8x512xf32>
    %126 = tpu.matmul %96, %0, %cst_29 {dimension_numbers = #tpu.dot_dimension_numbers<[1], [0], [0], [1], [0, 0, 1, 1], [], []>} : vector<8x128xf32>, vector<128x512xf32>, vector<8x512xf32> -> vector<8x512xf32>
    %127 = arith.addf %125, %126 : vector<8x512xf32>
    %128 = vector.extract_strided_slice %127 {offsets = [0, 0], sizes = [8, 128], strides = [1, 1]} : vector<8x512xf32> to vector<8x128xf32>
    %129 = arith.negf %128 : vector<8x128xf32>
    %130 = math.exp %129 : vector<8x128xf32>
    %cst_30 = arith.constant 1.000000e+00 : f32
    %131 = vector.broadcast %cst_30 : f32 to vector<8x128xf32>
    %132 = arith.addf %131, %130 : vector<8x128xf32>
    %133 = arith.divf %131, %132 : vector<8x128xf32>
    %134 = vector.extract_strided_slice %127 {offsets = [0, 128], sizes = [8, 128], strides = [1, 1]} : vector<8x512xf32> to vector<8x128xf32>
    %135 = arith.negf %134 : vector<8x128xf32>
    %136 = math.exp %135 : vector<8x128xf32>
    %cst_31 = arith.constant 1.000000e+00 : f32
    %137 = vector.broadcast %cst_31 : f32 to vector<8x128xf32>
    %138 = arith.addf %137, %136 : vector<8x128xf32>
    %139 = arith.divf %137, %138 : vector<8x128xf32>
    %140 = vector.extract_strided_slice %127 {offsets = [0, 256], sizes = [8, 128], strides = [1, 1]} : vector<8x512xf32> to vector<8x128xf32>
    %141 = math.tanh %140 : vector<8x128xf32>
    %142 = vector.extract_strided_slice %127 {offsets = [0, 384], sizes = [8, 128], strides = [1, 1]} : vector<8x512xf32> to vector<8x128xf32>
    %143 = arith.negf %142 : vector<8x128xf32>
    %144 = math.exp %143 : vector<8x128xf32>
    %cst_32 = arith.constant 1.000000e+00 : f32
    %145 = vector.broadcast %cst_32 : f32 to vector<8x128xf32>
    %146 = arith.addf %145, %144 : vector<8x128xf32>
    %147 = arith.divf %145, %146 : vector<8x128xf32>
    %148 = arith.mulf %139, %94 : vector<8x128xf32>
    %149 = arith.mulf %133, %141 : vector<8x128xf32>
    %150 = arith.addf %148, %149 : vector<8x128xf32>
    %151 = math.tanh %150 : vector<8x128xf32>
    %152 = arith.mulf %147, %151 : vector<8x128xf32>
    %153 = tpu.concatenate %152, %124 in 1 : vector<8x128xf32>, vector<8x128xf32> -> vector<8x256xf32>
    %cst_33 = arith.constant dense<0.000000e+00> : vector<8x512xf32>
    %154 = tpu.matmul %153, %1, %cst_33 {dimension_numbers = #tpu.dot_dimension_numbers<[1], [0], [0], [1], [0, 0, 1, 1], [], []>} : vector<8x256xf32>, vector<256x512xf32>, vector<8x512xf32> -> vector<8x512xf32>
    %155 = arith.addf %154, %11 : vector<8x512xf32>
    %156 = vector.extract_strided_slice %155 {offsets = [0, 0], sizes = [8, 128], strides = [1, 1]} : vector<8x512xf32> to vector<8x128xf32>
    %157 = arith.negf %156 : vector<8x128xf32>
    %158 = math.exp %157 : vector<8x128xf32>
    %cst_34 = arith.constant 1.000000e+00 : f32
    %159 = vector.broadcast %cst_34 : f32 to vector<8x128xf32>
    %160 = arith.addf %159, %158 : vector<8x128xf32>
    %161 = arith.divf %159, %160 : vector<8x128xf32>
    %162 = vector.extract_strided_slice %155 {offsets = [0, 128], sizes = [8, 128], strides = [1, 1]} : vector<8x512xf32> to vector<8x128xf32>
    %163 = arith.negf %162 : vector<8x128xf32>
    %164 = math.exp %163 : vector<8x128xf32>
    %cst_35 = arith.constant 1.000000e+00 : f32
    %165 = vector.broadcast %cst_35 : f32 to vector<8x128xf32>
    %166 = arith.addf %165, %164 : vector<8x128xf32>
    %167 = arith.divf %165, %166 : vector<8x128xf32>
    %168 = vector.extract_strided_slice %155 {offsets = [0, 256], sizes = [8, 128], strides = [1, 1]} : vector<8x512xf32> to vector<8x128xf32>
    %169 = math.tanh %168 : vector<8x128xf32>
    %170 = vector.extract_strided_slice %155 {offsets = [0, 384], sizes = [8, 128], strides = [1, 1]} : vector<8x512xf32> to vector<8x128xf32>
    %171 = arith.negf %170 : vector<8x128xf32>
    %172 = math.exp %171 : vector<8x128xf32>
    %cst_36 = arith.constant 1.000000e+00 : f32
    %173 = vector.broadcast %cst_36 : f32 to vector<8x128xf32>
    %174 = arith.addf %173, %172 : vector<8x128xf32>
    %175 = arith.divf %173, %174 : vector<8x128xf32>
    %176 = arith.mulf %167, %122 : vector<8x128xf32>
    %177 = arith.mulf %161, %169 : vector<8x128xf32>
    %178 = arith.addf %176, %177 : vector<8x128xf32>
    %179 = math.tanh %178 : vector<8x128xf32>
    %180 = arith.mulf %175, %179 : vector<8x128xf32>
    %181 = vector.extract_strided_slice %8 {offsets = [24, 0], sizes = [8, 512], strides = [1, 1]} : vector<64x512xf32> to vector<8x512xf32>
    %cst_37 = arith.constant dense<0.000000e+00> : vector<8x512xf32>
    %182 = tpu.matmul %152, %0, %cst_37 {dimension_numbers = #tpu.dot_dimension_numbers<[1], [0], [0], [1], [0, 0, 1, 1], [], []>} : vector<8x128xf32>, vector<128x512xf32>, vector<8x512xf32> -> vector<8x512xf32>
    %183 = arith.addf %181, %182 : vector<8x512xf32>
    %184 = vector.extract_strided_slice %183 {offsets = [0, 0], sizes = [8, 128], strides = [1, 1]} : vector<8x512xf32> to vector<8x128xf32>
    %185 = arith.negf %184 : vector<8x128xf32>
    %186 = math.exp %185 : vector<8x128xf32>
    %cst_38 = arith.constant 1.000000e+00 : f32
    %187 = vector.broadcast %cst_38 : f32 to vector<8x128xf32>
    %188 = arith.addf %187, %186 : vector<8x128xf32>
    %189 = arith.divf %187, %188 : vector<8x128xf32>
    %190 = vector.extract_strided_slice %183 {offsets = [0, 128], sizes = [8, 128], strides = [1, 1]} : vector<8x512xf32> to vector<8x128xf32>
    %191 = arith.negf %190 : vector<8x128xf32>
    %192 = math.exp %191 : vector<8x128xf32>
    %cst_39 = arith.constant 1.000000e+00 : f32
    %193 = vector.broadcast %cst_39 : f32 to vector<8x128xf32>
    %194 = arith.addf %193, %192 : vector<8x128xf32>
    %195 = arith.divf %193, %194 : vector<8x128xf32>
    %196 = vector.extract_strided_slice %183 {offsets = [0, 256], sizes = [8, 128], strides = [1, 1]} : vector<8x512xf32> to vector<8x128xf32>
    %197 = math.tanh %196 : vector<8x128xf32>
    %198 = vector.extract_strided_slice %183 {offsets = [0, 384], sizes = [8, 128], strides = [1, 1]} : vector<8x512xf32> to vector<8x128xf32>
    %199 = arith.negf %198 : vector<8x128xf32>
    %200 = math.exp %199 : vector<8x128xf32>
    %cst_40 = arith.constant 1.000000e+00 : f32
    %201 = vector.broadcast %cst_40 : f32 to vector<8x128xf32>
    %202 = arith.addf %201, %200 : vector<8x128xf32>
    %203 = arith.divf %201, %202 : vector<8x128xf32>
    %204 = arith.mulf %195, %150 : vector<8x128xf32>
    %205 = arith.mulf %189, %197 : vector<8x128xf32>
    %206 = arith.addf %204, %205 : vector<8x128xf32>
    %207 = math.tanh %206 : vector<8x128xf32>
    %208 = arith.mulf %203, %207 : vector<8x128xf32>
    %209 = tpu.concatenate %208, %180 in 1 : vector<8x128xf32>, vector<8x128xf32> -> vector<8x256xf32>
    %cst_41 = arith.constant dense<0.000000e+00> : vector<8x512xf32>
    %210 = tpu.matmul %209, %1, %cst_41 {dimension_numbers = #tpu.dot_dimension_numbers<[1], [0], [0], [1], [0, 0, 1, 1], [], []>} : vector<8x256xf32>, vector<256x512xf32>, vector<8x512xf32> -> vector<8x512xf32>
    %211 = arith.addf %210, %11 : vector<8x512xf32>
    %212 = vector.extract_strided_slice %211 {offsets = [0, 0], sizes = [8, 128], strides = [1, 1]} : vector<8x512xf32> to vector<8x128xf32>
    %213 = arith.negf %212 : vector<8x128xf32>
    %214 = math.exp %213 : vector<8x128xf32>
    %cst_42 = arith.constant 1.000000e+00 : f32
    %215 = vector.broadcast %cst_42 : f32 to vector<8x128xf32>
    %216 = arith.addf %215, %214 : vector<8x128xf32>
    %217 = arith.divf %215, %216 : vector<8x128xf32>
    %218 = vector.extract_strided_slice %211 {offsets = [0, 128], sizes = [8, 128], strides = [1, 1]} : vector<8x512xf32> to vector<8x128xf32>
    %219 = arith.negf %218 : vector<8x128xf32>
    %220 = math.exp %219 : vector<8x128xf32>
    %cst_43 = arith.constant 1.000000e+00 : f32
    %221 = vector.broadcast %cst_43 : f32 to vector<8x128xf32>
    %222 = arith.addf %221, %220 : vector<8x128xf32>
    %223 = arith.divf %221, %222 : vector<8x128xf32>
    %224 = vector.extract_strided_slice %211 {offsets = [0, 256], sizes = [8, 128], strides = [1, 1]} : vector<8x512xf32> to vector<8x128xf32>
    %225 = math.tanh %224 : vector<8x128xf32>
    %226 = vector.extract_strided_slice %211 {offsets = [0, 384], sizes = [8, 128], strides = [1, 1]} : vector<8x512xf32> to vector<8x128xf32>
    %227 = arith.negf %226 : vector<8x128xf32>
    %228 = math.exp %227 : vector<8x128xf32>
    %cst_44 = arith.constant 1.000000e+00 : f32
    %229 = vector.broadcast %cst_44 : f32 to vector<8x128xf32>
    %230 = arith.addf %229, %228 : vector<8x128xf32>
    %231 = arith.divf %229, %230 : vector<8x128xf32>
    %232 = arith.mulf %223, %178 : vector<8x128xf32>
    %233 = arith.mulf %217, %225 : vector<8x128xf32>
    %234 = arith.addf %232, %233 : vector<8x128xf32>
    %235 = math.tanh %234 : vector<8x128xf32>
    %236 = arith.mulf %231, %235 : vector<8x128xf32>
    %237 = vector.extract_strided_slice %8 {offsets = [32, 0], sizes = [8, 512], strides = [1, 1]} : vector<64x512xf32> to vector<8x512xf32>
    %cst_45 = arith.constant dense<0.000000e+00> : vector<8x512xf32>
    %238 = tpu.matmul %208, %0, %cst_45 {dimension_numbers = #tpu.dot_dimension_numbers<[1], [0], [0], [1], [0, 0, 1, 1], [], []>} : vector<8x128xf32>, vector<128x512xf32>, vector<8x512xf32> -> vector<8x512xf32>
    %239 = arith.addf %237, %238 : vector<8x512xf32>
    %240 = vector.extract_strided_slice %239 {offsets = [0, 0], sizes = [8, 128], strides = [1, 1]} : vector<8x512xf32> to vector<8x128xf32>
    %241 = arith.negf %240 : vector<8x128xf32>
    %242 = math.exp %241 : vector<8x128xf32>
    %cst_46 = arith.constant 1.000000e+00 : f32
    %243 = vector.broadcast %cst_46 : f32 to vector<8x128xf32>
    %244 = arith.addf %243, %242 : vector<8x128xf32>
    %245 = arith.divf %243, %244 : vector<8x128xf32>
    %246 = vector.extract_strided_slice %239 {offsets = [0, 128], sizes = [8, 128], strides = [1, 1]} : vector<8x512xf32> to vector<8x128xf32>
    %247 = arith.negf %246 : vector<8x128xf32>
    %248 = math.exp %247 : vector<8x128xf32>
    %cst_47 = arith.constant 1.000000e+00 : f32
    %249 = vector.broadcast %cst_47 : f32 to vector<8x128xf32>
    %250 = arith.addf %249, %248 : vector<8x128xf32>
    %251 = arith.divf %249, %250 : vector<8x128xf32>
    %252 = vector.extract_strided_slice %239 {offsets = [0, 256], sizes = [8, 128], strides = [1, 1]} : vector<8x512xf32> to vector<8x128xf32>
    %253 = math.tanh %252 : vector<8x128xf32>
    %254 = vector.extract_strided_slice %239 {offsets = [0, 384], sizes = [8, 128], strides = [1, 1]} : vector<8x512xf32> to vector<8x128xf32>
    %255 = arith.negf %254 : vector<8x128xf32>
    %256 = math.exp %255 : vector<8x128xf32>
    %cst_48 = arith.constant 1.000000e+00 : f32
    %257 = vector.broadcast %cst_48 : f32 to vector<8x128xf32>
    %258 = arith.addf %257, %256 : vector<8x128xf32>
    %259 = arith.divf %257, %258 : vector<8x128xf32>
    %260 = arith.mulf %251, %206 : vector<8x128xf32>
    %261 = arith.mulf %245, %253 : vector<8x128xf32>
    %262 = arith.addf %260, %261 : vector<8x128xf32>
    %263 = math.tanh %262 : vector<8x128xf32>
    %264 = arith.mulf %259, %263 : vector<8x128xf32>
    %265 = tpu.concatenate %264, %236 in 1 : vector<8x128xf32>, vector<8x128xf32> -> vector<8x256xf32>
    %cst_49 = arith.constant dense<0.000000e+00> : vector<8x512xf32>
    %266 = tpu.matmul %265, %1, %cst_49 {dimension_numbers = #tpu.dot_dimension_numbers<[1], [0], [0], [1], [0, 0, 1, 1], [], []>} : vector<8x256xf32>, vector<256x512xf32>, vector<8x512xf32> -> vector<8x512xf32>
    %267 = arith.addf %266, %11 : vector<8x512xf32>
    %268 = vector.extract_strided_slice %267 {offsets = [0, 0], sizes = [8, 128], strides = [1, 1]} : vector<8x512xf32> to vector<8x128xf32>
    %269 = arith.negf %268 : vector<8x128xf32>
    %270 = math.exp %269 : vector<8x128xf32>
    %cst_50 = arith.constant 1.000000e+00 : f32
    %271 = vector.broadcast %cst_50 : f32 to vector<8x128xf32>
    %272 = arith.addf %271, %270 : vector<8x128xf32>
    %273 = arith.divf %271, %272 : vector<8x128xf32>
    %274 = vector.extract_strided_slice %267 {offsets = [0, 128], sizes = [8, 128], strides = [1, 1]} : vector<8x512xf32> to vector<8x128xf32>
    %275 = arith.negf %274 : vector<8x128xf32>
    %276 = math.exp %275 : vector<8x128xf32>
    %cst_51 = arith.constant 1.000000e+00 : f32
    %277 = vector.broadcast %cst_51 : f32 to vector<8x128xf32>
    %278 = arith.addf %277, %276 : vector<8x128xf32>
    %279 = arith.divf %277, %278 : vector<8x128xf32>
    %280 = vector.extract_strided_slice %267 {offsets = [0, 256], sizes = [8, 128], strides = [1, 1]} : vector<8x512xf32> to vector<8x128xf32>
    %281 = math.tanh %280 : vector<8x128xf32>
    %282 = vector.extract_strided_slice %267 {offsets = [0, 384], sizes = [8, 128], strides = [1, 1]} : vector<8x512xf32> to vector<8x128xf32>
    %283 = arith.negf %282 : vector<8x128xf32>
    %284 = math.exp %283 : vector<8x128xf32>
    %cst_52 = arith.constant 1.000000e+00 : f32
    %285 = vector.broadcast %cst_52 : f32 to vector<8x128xf32>
    %286 = arith.addf %285, %284 : vector<8x128xf32>
    %287 = arith.divf %285, %286 : vector<8x128xf32>
    %288 = arith.mulf %279, %234 : vector<8x128xf32>
    %289 = arith.mulf %273, %281 : vector<8x128xf32>
    %290 = arith.addf %288, %289 : vector<8x128xf32>
    %291 = math.tanh %290 : vector<8x128xf32>
    %292 = arith.mulf %287, %291 : vector<8x128xf32>
    %293 = vector.extract_strided_slice %8 {offsets = [40, 0], sizes = [8, 512], strides = [1, 1]} : vector<64x512xf32> to vector<8x512xf32>
    %cst_53 = arith.constant dense<0.000000e+00> : vector<8x512xf32>
    %294 = tpu.matmul %264, %0, %cst_53 {dimension_numbers = #tpu.dot_dimension_numbers<[1], [0], [0], [1], [0, 0, 1, 1], [], []>} : vector<8x128xf32>, vector<128x512xf32>, vector<8x512xf32> -> vector<8x512xf32>
    %295 = arith.addf %293, %294 : vector<8x512xf32>
    %296 = vector.extract_strided_slice %295 {offsets = [0, 0], sizes = [8, 128], strides = [1, 1]} : vector<8x512xf32> to vector<8x128xf32>
    %297 = arith.negf %296 : vector<8x128xf32>
    %298 = math.exp %297 : vector<8x128xf32>
    %cst_54 = arith.constant 1.000000e+00 : f32
    %299 = vector.broadcast %cst_54 : f32 to vector<8x128xf32>
    %300 = arith.addf %299, %298 : vector<8x128xf32>
    %301 = arith.divf %299, %300 : vector<8x128xf32>
    %302 = vector.extract_strided_slice %295 {offsets = [0, 128], sizes = [8, 128], strides = [1, 1]} : vector<8x512xf32> to vector<8x128xf32>
    %303 = arith.negf %302 : vector<8x128xf32>
    %304 = math.exp %303 : vector<8x128xf32>
    %cst_55 = arith.constant 1.000000e+00 : f32
    %305 = vector.broadcast %cst_55 : f32 to vector<8x128xf32>
    %306 = arith.addf %305, %304 : vector<8x128xf32>
    %307 = arith.divf %305, %306 : vector<8x128xf32>
    %308 = vector.extract_strided_slice %295 {offsets = [0, 256], sizes = [8, 128], strides = [1, 1]} : vector<8x512xf32> to vector<8x128xf32>
    %309 = math.tanh %308 : vector<8x128xf32>
    %310 = vector.extract_strided_slice %295 {offsets = [0, 384], sizes = [8, 128], strides = [1, 1]} : vector<8x512xf32> to vector<8x128xf32>
    %311 = arith.negf %310 : vector<8x128xf32>
    %312 = math.exp %311 : vector<8x128xf32>
    %cst_56 = arith.constant 1.000000e+00 : f32
    %313 = vector.broadcast %cst_56 : f32 to vector<8x128xf32>
    %314 = arith.addf %313, %312 : vector<8x128xf32>
    %315 = arith.divf %313, %314 : vector<8x128xf32>
    %316 = arith.mulf %307, %262 : vector<8x128xf32>
    %317 = arith.mulf %301, %309 : vector<8x128xf32>
    %318 = arith.addf %316, %317 : vector<8x128xf32>
    %319 = math.tanh %318 : vector<8x128xf32>
    %320 = arith.mulf %315, %319 : vector<8x128xf32>
    %321 = tpu.concatenate %320, %292 in 1 : vector<8x128xf32>, vector<8x128xf32> -> vector<8x256xf32>
    %cst_57 = arith.constant dense<0.000000e+00> : vector<8x512xf32>
    %322 = tpu.matmul %321, %1, %cst_57 {dimension_numbers = #tpu.dot_dimension_numbers<[1], [0], [0], [1], [0, 0, 1, 1], [], []>} : vector<8x256xf32>, vector<256x512xf32>, vector<8x512xf32> -> vector<8x512xf32>
    %323 = arith.addf %322, %11 : vector<8x512xf32>
    %324 = vector.extract_strided_slice %323 {offsets = [0, 0], sizes = [8, 128], strides = [1, 1]} : vector<8x512xf32> to vector<8x128xf32>
    %325 = arith.negf %324 : vector<8x128xf32>
    %326 = math.exp %325 : vector<8x128xf32>
    %cst_58 = arith.constant 1.000000e+00 : f32
    %327 = vector.broadcast %cst_58 : f32 to vector<8x128xf32>
    %328 = arith.addf %327, %326 : vector<8x128xf32>
    %329 = arith.divf %327, %328 : vector<8x128xf32>
    %330 = vector.extract_strided_slice %323 {offsets = [0, 128], sizes = [8, 128], strides = [1, 1]} : vector<8x512xf32> to vector<8x128xf32>
    %331 = arith.negf %330 : vector<8x128xf32>
    %332 = math.exp %331 : vector<8x128xf32>
    %cst_59 = arith.constant 1.000000e+00 : f32
    %333 = vector.broadcast %cst_59 : f32 to vector<8x128xf32>
    %334 = arith.addf %333, %332 : vector<8x128xf32>
    %335 = arith.divf %333, %334 : vector<8x128xf32>
    %336 = vector.extract_strided_slice %323 {offsets = [0, 256], sizes = [8, 128], strides = [1, 1]} : vector<8x512xf32> to vector<8x128xf32>
    %337 = math.tanh %336 : vector<8x128xf32>
    %338 = vector.extract_strided_slice %323 {offsets = [0, 384], sizes = [8, 128], strides = [1, 1]} : vector<8x512xf32> to vector<8x128xf32>
    %339 = arith.negf %338 : vector<8x128xf32>
    %340 = math.exp %339 : vector<8x128xf32>
    %cst_60 = arith.constant 1.000000e+00 : f32
    %341 = vector.broadcast %cst_60 : f32 to vector<8x128xf32>
    %342 = arith.addf %341, %340 : vector<8x128xf32>
    %343 = arith.divf %341, %342 : vector<8x128xf32>
    %344 = arith.mulf %335, %290 : vector<8x128xf32>
    %345 = arith.mulf %329, %337 : vector<8x128xf32>
    %346 = arith.addf %344, %345 : vector<8x128xf32>
    %347 = math.tanh %346 : vector<8x128xf32>
    %348 = arith.mulf %343, %347 : vector<8x128xf32>
    %349 = vector.extract_strided_slice %8 {offsets = [48, 0], sizes = [8, 512], strides = [1, 1]} : vector<64x512xf32> to vector<8x512xf32>
    %cst_61 = arith.constant dense<0.000000e+00> : vector<8x512xf32>
    %350 = tpu.matmul %320, %0, %cst_61 {dimension_numbers = #tpu.dot_dimension_numbers<[1], [0], [0], [1], [0, 0, 1, 1], [], []>} : vector<8x128xf32>, vector<128x512xf32>, vector<8x512xf32> -> vector<8x512xf32>
    %351 = arith.addf %349, %350 : vector<8x512xf32>
    %352 = vector.extract_strided_slice %351 {offsets = [0, 0], sizes = [8, 128], strides = [1, 1]} : vector<8x512xf32> to vector<8x128xf32>
    %353 = arith.negf %352 : vector<8x128xf32>
    %354 = math.exp %353 : vector<8x128xf32>
    %cst_62 = arith.constant 1.000000e+00 : f32
    %355 = vector.broadcast %cst_62 : f32 to vector<8x128xf32>
    %356 = arith.addf %355, %354 : vector<8x128xf32>
    %357 = arith.divf %355, %356 : vector<8x128xf32>
    %358 = vector.extract_strided_slice %351 {offsets = [0, 128], sizes = [8, 128], strides = [1, 1]} : vector<8x512xf32> to vector<8x128xf32>
    %359 = arith.negf %358 : vector<8x128xf32>
    %360 = math.exp %359 : vector<8x128xf32>
    %cst_63 = arith.constant 1.000000e+00 : f32
    %361 = vector.broadcast %cst_63 : f32 to vector<8x128xf32>
    %362 = arith.addf %361, %360 : vector<8x128xf32>
    %363 = arith.divf %361, %362 : vector<8x128xf32>
    %364 = vector.extract_strided_slice %351 {offsets = [0, 256], sizes = [8, 128], strides = [1, 1]} : vector<8x512xf32> to vector<8x128xf32>
    %365 = math.tanh %364 : vector<8x128xf32>
    %366 = vector.extract_strided_slice %351 {offsets = [0, 384], sizes = [8, 128], strides = [1, 1]} : vector<8x512xf32> to vector<8x128xf32>
    %367 = arith.negf %366 : vector<8x128xf32>
    %368 = math.exp %367 : vector<8x128xf32>
    %cst_64 = arith.constant 1.000000e+00 : f32
    %369 = vector.broadcast %cst_64 : f32 to vector<8x128xf32>
    %370 = arith.addf %369, %368 : vector<8x128xf32>
    %371 = arith.divf %369, %370 : vector<8x128xf32>
    %372 = arith.mulf %363, %318 : vector<8x128xf32>
    %373 = arith.mulf %357, %365 : vector<8x128xf32>
    %374 = arith.addf %372, %373 : vector<8x128xf32>
    %375 = math.tanh %374 : vector<8x128xf32>
    %376 = arith.mulf %371, %375 : vector<8x128xf32>
    %377 = tpu.concatenate %376, %348 in 1 : vector<8x128xf32>, vector<8x128xf32> -> vector<8x256xf32>
    %cst_65 = arith.constant dense<0.000000e+00> : vector<8x512xf32>
    %378 = tpu.matmul %377, %1, %cst_65 {dimension_numbers = #tpu.dot_dimension_numbers<[1], [0], [0], [1], [0, 0, 1, 1], [], []>} : vector<8x256xf32>, vector<256x512xf32>, vector<8x512xf32> -> vector<8x512xf32>
    %379 = arith.addf %378, %11 : vector<8x512xf32>
    %380 = vector.extract_strided_slice %379 {offsets = [0, 0], sizes = [8, 128], strides = [1, 1]} : vector<8x512xf32> to vector<8x128xf32>
    %381 = arith.negf %380 : vector<8x128xf32>
    %382 = math.exp %381 : vector<8x128xf32>
    %cst_66 = arith.constant 1.000000e+00 : f32
    %383 = vector.broadcast %cst_66 : f32 to vector<8x128xf32>
    %384 = arith.addf %383, %382 : vector<8x128xf32>
    %385 = arith.divf %383, %384 : vector<8x128xf32>
    %386 = vector.extract_strided_slice %379 {offsets = [0, 128], sizes = [8, 128], strides = [1, 1]} : vector<8x512xf32> to vector<8x128xf32>
    %387 = arith.negf %386 : vector<8x128xf32>
    %388 = math.exp %387 : vector<8x128xf32>
    %cst_67 = arith.constant 1.000000e+00 : f32
    %389 = vector.broadcast %cst_67 : f32 to vector<8x128xf32>
    %390 = arith.addf %389, %388 : vector<8x128xf32>
    %391 = arith.divf %389, %390 : vector<8x128xf32>
    %392 = vector.extract_strided_slice %379 {offsets = [0, 256], sizes = [8, 128], strides = [1, 1]} : vector<8x512xf32> to vector<8x128xf32>
    %393 = math.tanh %392 : vector<8x128xf32>
    %394 = vector.extract_strided_slice %379 {offsets = [0, 384], sizes = [8, 128], strides = [1, 1]} : vector<8x512xf32> to vector<8x128xf32>
    %395 = arith.negf %394 : vector<8x128xf32>
    %396 = math.exp %395 : vector<8x128xf32>
    %cst_68 = arith.constant 1.000000e+00 : f32
    %397 = vector.broadcast %cst_68 : f32 to vector<8x128xf32>
    %398 = arith.addf %397, %396 : vector<8x128xf32>
    %399 = arith.divf %397, %398 : vector<8x128xf32>
    %400 = arith.mulf %391, %346 : vector<8x128xf32>
    %401 = arith.mulf %385, %393 : vector<8x128xf32>
    %402 = arith.addf %400, %401 : vector<8x128xf32>
    %403 = math.tanh %402 : vector<8x128xf32>
    %404 = arith.mulf %399, %403 : vector<8x128xf32>
    %405 = vector.extract_strided_slice %8 {offsets = [56, 0], sizes = [8, 512], strides = [1, 1]} : vector<64x512xf32> to vector<8x512xf32>
    %cst_69 = arith.constant dense<0.000000e+00> : vector<8x512xf32>
    %406 = tpu.matmul %376, %0, %cst_69 {dimension_numbers = #tpu.dot_dimension_numbers<[1], [0], [0], [1], [0, 0, 1, 1], [], []>} : vector<8x128xf32>, vector<128x512xf32>, vector<8x512xf32> -> vector<8x512xf32>
    %407 = arith.addf %405, %406 : vector<8x512xf32>
    %408 = vector.extract_strided_slice %407 {offsets = [0, 0], sizes = [8, 128], strides = [1, 1]} : vector<8x512xf32> to vector<8x128xf32>
    %409 = arith.negf %408 : vector<8x128xf32>
    %410 = math.exp %409 : vector<8x128xf32>
    %cst_70 = arith.constant 1.000000e+00 : f32
    %411 = vector.broadcast %cst_70 : f32 to vector<8x128xf32>
    %412 = arith.addf %411, %410 : vector<8x128xf32>
    %413 = arith.divf %411, %412 : vector<8x128xf32>
    %414 = vector.extract_strided_slice %407 {offsets = [0, 128], sizes = [8, 128], strides = [1, 1]} : vector<8x512xf32> to vector<8x128xf32>
    %415 = arith.negf %414 : vector<8x128xf32>
    %416 = math.exp %415 : vector<8x128xf32>
    %cst_71 = arith.constant 1.000000e+00 : f32
    %417 = vector.broadcast %cst_71 : f32 to vector<8x128xf32>
    %418 = arith.addf %417, %416 : vector<8x128xf32>
    %419 = arith.divf %417, %418 : vector<8x128xf32>
    %420 = vector.extract_strided_slice %407 {offsets = [0, 256], sizes = [8, 128], strides = [1, 1]} : vector<8x512xf32> to vector<8x128xf32>
    %421 = math.tanh %420 : vector<8x128xf32>
    %422 = vector.extract_strided_slice %407 {offsets = [0, 384], sizes = [8, 128], strides = [1, 1]} : vector<8x512xf32> to vector<8x128xf32>
    %423 = arith.negf %422 : vector<8x128xf32>
    %424 = math.exp %423 : vector<8x128xf32>
    %cst_72 = arith.constant 1.000000e+00 : f32
    %425 = vector.broadcast %cst_72 : f32 to vector<8x128xf32>
    %426 = arith.addf %425, %424 : vector<8x128xf32>
    %427 = arith.divf %425, %426 : vector<8x128xf32>
    %428 = arith.mulf %419, %374 : vector<8x128xf32>
    %429 = arith.mulf %413, %421 : vector<8x128xf32>
    %430 = arith.addf %428, %429 : vector<8x128xf32>
    %431 = math.tanh %430 : vector<8x128xf32>
    %432 = arith.mulf %427, %431 : vector<8x128xf32>
    %433 = tpu.concatenate %432, %404 in 1 : vector<8x128xf32>, vector<8x128xf32> -> vector<8x256xf32>
    %cst_73 = arith.constant dense<0.000000e+00> : vector<8x512xf32>
    %434 = tpu.matmul %433, %1, %cst_73 {dimension_numbers = #tpu.dot_dimension_numbers<[1], [0], [0], [1], [0, 0, 1, 1], [], []>} : vector<8x256xf32>, vector<256x512xf32>, vector<8x512xf32> -> vector<8x512xf32>
    %435 = arith.addf %434, %11 : vector<8x512xf32>
    %436 = vector.extract_strided_slice %435 {offsets = [0, 0], sizes = [8, 128], strides = [1, 1]} : vector<8x512xf32> to vector<8x128xf32>
    %437 = arith.negf %436 : vector<8x128xf32>
    %438 = math.exp %437 : vector<8x128xf32>
    %cst_74 = arith.constant 1.000000e+00 : f32
    %439 = vector.broadcast %cst_74 : f32 to vector<8x128xf32>
    %440 = arith.addf %439, %438 : vector<8x128xf32>
    %441 = arith.divf %439, %440 : vector<8x128xf32>
    %442 = vector.extract_strided_slice %435 {offsets = [0, 128], sizes = [8, 128], strides = [1, 1]} : vector<8x512xf32> to vector<8x128xf32>
    %443 = arith.negf %442 : vector<8x128xf32>
    %444 = math.exp %443 : vector<8x128xf32>
    %cst_75 = arith.constant 1.000000e+00 : f32
    %445 = vector.broadcast %cst_75 : f32 to vector<8x128xf32>
    %446 = arith.addf %445, %444 : vector<8x128xf32>
    %447 = arith.divf %445, %446 : vector<8x128xf32>
    %448 = vector.extract_strided_slice %435 {offsets = [0, 256], sizes = [8, 128], strides = [1, 1]} : vector<8x512xf32> to vector<8x128xf32>
    %449 = math.tanh %448 : vector<8x128xf32>
    %450 = vector.extract_strided_slice %435 {offsets = [0, 384], sizes = [8, 128], strides = [1, 1]} : vector<8x512xf32> to vector<8x128xf32>
    %451 = arith.negf %450 : vector<8x128xf32>
    %452 = math.exp %451 : vector<8x128xf32>
    %cst_76 = arith.constant 1.000000e+00 : f32
    %453 = vector.broadcast %cst_76 : f32 to vector<8x128xf32>
    %454 = arith.addf %453, %452 : vector<8x128xf32>
    %455 = arith.divf %453, %454 : vector<8x128xf32>
    %456 = arith.mulf %447, %402 : vector<8x128xf32>
    %457 = arith.mulf %441, %449 : vector<8x128xf32>
    %458 = arith.addf %456, %457 : vector<8x128xf32>
    %459 = math.tanh %458 : vector<8x128xf32>
    %460 = arith.mulf %455, %459 : vector<8x128xf32>
    %c0_77 = arith.constant 0 : index
    %c0_78 = arith.constant 0 : index
    %461 = vector.load %arg7[%c0_77, %c0_78] : memref<128x128xf32, #tpu.memory_space<vmem>>, vector<128x128xf32>
    %cst_79 = arith.constant dense<0.000000e+00> : vector<8x128xf32>
    %462 = tpu.matmul %460, %461, %cst_79 {dimension_numbers = #tpu.dot_dimension_numbers<[1], [0], [0], [1], [0, 0, 1, 1], [], []>} : vector<8x128xf32>, vector<128x128xf32>, vector<8x128xf32> -> vector<8x128xf32>
    %c0_80 = arith.constant 0 : index
    %c0_81 = arith.constant 0 : index
    %463 = vector.load %arg8[%c0_80, %c0_81] : memref<1x128xf32, #tpu.memory_space<vmem>>, vector<1x128xf32>
    %464 = vector.broadcast %463 : vector<1x128xf32> to vector<8x128xf32>
    %465 = arith.addf %462, %464 : vector<8x128xf32>
    %c0_82 = arith.constant 0 : index
    %c0_83 = arith.constant 0 : index
    %466 = vector.load %arg9[%c0_82, %c0_83] : memref<8x128xf32, #tpu.memory_space<vmem>>, vector<8x128xf32>
    tpu.vector_store %arg9[%c0_82, %c0_83], %465 {strides = array<i32>} : memref<8x128xf32, #tpu.memory_space<vmem>>, vector<8x128xf32>,
    return
  }
  func.func @transform_0(%arg0: i32) -> (i32, i32, i32) {
    %c0_i32 = arith.constant 0 : i32
    %c0_i32_0 = arith.constant 0 : i32
    %c0_i32_1 = arith.constant 0 : i32
    return %arg0, %c0_i32, %c0_i32_0 : i32, i32, i32
  }
  func.func @transform_1(%arg0: i32) -> (i32, i32) {
    %c0_i32 = arith.constant 0 : i32
    %c0_i32_0 = arith.constant 0 : i32
    %c0_i32_1 = arith.constant 0 : i32
    return %c0_i32, %c0_i32_0 : i32, i32
  }
  func.func @transform_2(%arg0: i32) -> (i32, i32) {
    %c0_i32 = arith.constant 0 : i32
    %c0_i32_0 = arith.constant 0 : i32
    %c0_i32_1 = arith.constant 0 : i32
    return %c0_i32, %c0_i32_0 : i32, i32
  }
  func.func @transform_3(%arg0: i32) -> (i32, i32) {
    %c0_i32 = arith.constant 0 : i32
    %c0_i32_0 = arith.constant 0 : i32
    %c0_i32_1 = arith.constant 0 : i32
    return %c0_i32, %c0_i32_0 : i32, i32
  }
  func.func @transform_4(%arg0: i32) -> (i32, i32) {
    %c0_i32 = arith.constant 0 : i32
    %c0_i32_0 = arith.constant 0 : i32
    %c0_i32_1 = arith.constant 0 : i32
    return %c0_i32, %c0_i32_0 : i32, i32
  }
  func.func @transform_5(%arg0: i32) -> (i32, i32) {
    %c0_i32 = arith.constant 0 : i32
    %c0_i32_0 = arith.constant 0 : i32
    %c0_i32_1 = arith.constant 0 : i32
    return %c0_i32, %c0_i32_0 : i32, i32
  }
  func.func @transform_6(%arg0: i32) -> (i32, i32) {
    %c0_i32 = arith.constant 0 : i32
    %c0_i32_0 = arith.constant 0 : i32
    %c0_i32_1 = arith.constant 0 : i32
    return %c0_i32, %c0_i32_0 : i32, i32
  }
  func.func @transform_7(%arg0: i32) -> (i32, i32) {
    %c0_i32 = arith.constant 0 : i32
    %c0_i32_0 = arith.constant 0 : i32
    %c0_i32_1 = arith.constant 0 : i32
    return %c0_i32, %c0_i32_0 : i32, i32
  }
  func.func @transform_8(%arg0: i32) -> (i32, i32) {
    %c0_i32 = arith.constant 0 : i32
    %c0_i32_0 = arith.constant 0 : i32
    return %arg0, %c0_i32 : i32, i32
  }
}

</mosaic_0001>

<bundles_post_ra>
// kernel: tpu_custom_call.1
= control target key start
LH: loop header
LB: loop body
LE: loop exit
PB: predicated region body
PF: predicated region fallthrough
CT: control target
= control target key end

     0   :  { %13 = vsyncpa [#allocation3], 0  ;;  %s6817_s0 = inlined_call_operand.vmem [shape: f32[1,64,1], index: 0, kind: input, shape index: {}]   ;;  %s6818_s1 = inlined_call_operand.vmem [shape: f32[1,512], index: 1, kind: input, shape index: {}]   ;;  %s6819_s2 = inlined_call_operand.hbm [shape: f32[128,512], index: 2, kind: input, shape index: {}]   ;;  %s6820_s3 = inlined_call_operand.vmem [shape: f32[1,512], index: 3, kind: input, shape index: {}]   ;;  %s6821_s4 = inlined_call_operand.hbm [shape: f32[256,512], index: 4, kind: input, shape index: {}]   ;;  %s6822_s5 = inlined_call_operand.vmem [shape: f32[1,512], index: 5, kind: input, shape index: {}]   ;;  %s6823_s6 = inlined_call_operand.hbm [shape: f32[128,128], index: 6, kind: input, shape index: {}]   ;;  %s6824_s7 = inlined_call_operand.vmem [shape: f32[1,128], index: 7, kind: input, shape index: {}]   ;;  %s6825_s8 = inlined_call_operand.hbm [shape: f32[8,128], index: 8, kind: output, shape index: {}]  }
   0x1   :  { %14 = vsyncpa [#allocation6], 0 }
   0x2   :  { %15 = vsyncpa [#allocation4], 0  ;;  %s5497_s27 = smov [#allocation5]   ;;  %s5498_s29 = smov [#allocation2]  }
   0x3   :  { %s39_s28 = sshll.u32 %s5497_s27, 4  ;;  %s25_s30 = sshll.u32 %s5498_s29, 4  ;;  %s40_s28 = int_to_ptr.vmem [resolvable:$true] %s39_s28  ;;  %s5553_s30 = int_to_ptr.vmem [resolvable:$true] %s25_s30 }
   0x4   :  { %s5403_s11 = scalar_lea.hbm %s6821_s4, 16384 }
   0x5   :  { %p5404_p0 = scmp.ne.s32.totalorder %s6821_s4, %s5403_s11  ;;  %p5407_p1 = scmp.lt.u32.totalorder %s5403_s11, %s6821_s4 }
   0x7   :  { %p5409_p2 = pnand %p5407_p1, %p5404_p0 }
   0x9   :  { %5412 = shalt.err (!%p5409_p2)
}
   0xa   :  { %s5413_s16 = scalar_lea.vmem %s40_s28, 16384  ;;  %p5418_p4 = scmp.lt.s32.totalorder %s40_s28, %s40_s28 }
   0xb   :  { %p5414_p3 = scmp.ne.s32.totalorder %s40_s28, %s5413_s16  ;;  %p5419_p5 = scmp.lt.s32.totalorder %s5413_s16, %s5413_s16 }
   0xd   :  { %p5420_p6 = por %p5419_p5, %p5418_p4 }
   0xf   :  { %p5421_p7 = pnand %p5420_p6, %p5414_p3 }
  0x11   :  { %5424 = shalt.err (!%p5421_p7)
}
  0x12   :  { %s5499_s17 = smov 512   ;;  %s5500_s18 = smov 32  }
  0x13   :  { %45 = dma.hbm_to_vmem [thread:$0]  %s6821_s4, 16384, %s40_s28, [#allocation6], %s5499_s17, %s5499_s17, %s5500_s18  }
  0x14   :  { %s5425_s23 = scalar_lea.hbm %s6819_s2, 8192 }
  0x15   :  { %p5426_p8 = scmp.ne.s32.totalorder %s6819_s2, %s5425_s23  ;;  %p5429_p9 = scmp.lt.u32.totalorder %s5425_s23, %s6819_s2 }
  0x17   :  { %p5431_p10 = pnand %p5429_p9, %p5426_p8 }
  0x19   :  { %5434 = shalt.err (!%p5431_p10)
}
  0x1a   :  { %s5435_s29 = scalar_lea.vmem %s5553_s30, 8192  ;;  %p5440_p12 = scmp.lt.s32.totalorder %s5553_s30, %s5553_s30 }
  0x1b   :  { %p5436_p11 = scmp.ne.s32.totalorder %s5553_s30, %s5435_s29  ;;  %p5441_p13 = scmp.lt.s32.totalorder %s5435_s29, %s5435_s29 }
  0x1d   :  { %p5442_p0 = por %p5441_p13, %p5440_p12 }
  0x1f   :  { %p5443_p1 = pnand %p5442_p0, %p5436_p11 }
  0x21   :  { %5446 = shalt.err (!%p5443_p1)
}
  0x22   :  { %31 = dma.hbm_to_vmem [thread:$0]  %s6819_s2, 8192, %s5553_s30, [#allocation3], %s5499_s17, %s5499_s17, %s5500_s18  }
  0x23   :  { %s5501_s9 = smov [#allocation7]   ;;  %s5447_s13 = scalar_lea.hbm %s6823_s6, 2048 }
  0x24   :  { %s53_s10 = sshll.u32 %s5501_s9, 4  ;;  %p5448_p2 = scmp.ne.s32.totalorder %s6823_s6, %s5447_s13  ;;  %s54_s10 = int_to_ptr.vmem [resolvable:$true] %s53_s10 }
  0x25   :  { %p5451_p3 = scmp.lt.u32.totalorder %s5447_s13, %s6823_s6 }
  0x27   :  { %p5453_p4 = pnand %p5451_p3, %p5448_p2 }
  0x29   :  { %5456 = shalt.err (!%p5453_p4)
}
  0x2a   :  { %s5457_s20 = scalar_lea.vmem %s54_s10, 2048  ;;  %p5462_p6 = scmp.lt.s32.totalorder %s54_s10, %s54_s10 }
  0x2b   :  { %p5458_p5 = scmp.ne.s32.totalorder %s54_s10, %s5457_s20  ;;  %p5463_p7 = scmp.lt.s32.totalorder %s5457_s20, %s5457_s20 }
  0x2d   :  { %p5464_p8 = por %p5463_p7, %p5462_p6 }
  0x2f   :  { %p5465_p9 = pnand %p5464_p8, %p5458_p5 }
  0x31   :  { %5468 = shalt.err (!%p5465_p9)
}
  0x32   :  { %s5502_s2 = smov 128   ;;  %s5503_s30 = smov 8  }
  0x33   :  { %59 = dma.hbm_to_vmem [thread:$0]  %s6823_s6, 2048, %s54_s10, [#allocation6], %s5502_s2, %s5502_s2, %s5503_s30  }
  0x34   :  { %5491 = dma.done.wait [#allocation3], 8192  }
  0x35   :  { %5492 = vsyncadd [#allocation3], 4294959104 }
  0x36   :  { %5493 = dma.done.wait [#allocation6], 18432  }
  0x37   :  { %5494 = vsyncadd [#allocation6], 4294948864  ;;  %v274_v0 = vlaneseq  ;;  %v6826_v1 = vmov 0.0   ;;  %v271_v7 = vld [vmem:[%s6818_s1] sm:$0xf]  ;;  %vm336_vm0 = vcmask 1040384  }
  0x38   :  { %409 = vmatprep.mubr.f32.mxu0 %v6826_v1  ;;  %522 = vmatprep.mubr.f32.mxu1 %v6826_v1  ;;  %v263_v9 = vld [vmem:[%s6817_s0] sm:$0xff]  ;;  %v72_v10 = vld [vmem:[#allocation2 + $0x8] sm:$0xff]  ;;  %vm311_vm1 = vcmask 7168   ;;  %v74_v14 = vld [vmem:[#allocation2 + $0x18] sm:$0xff]  ;;  %vm5506_vm2 = vmmov 0   ;;  %s5507_s20 = smov [#allocation8]  }
  0x39   :  { %v275_v2 = vshrl.u32 %v274_v0, 7  ;;  %v76_v11 = vld [vmem:[#allocation2 + $0x28] sm:$0xff]  ;;  %v78_v15 = vld [vmem:[#allocation2 + $0x38] sm:$0xff]  ;;  %v71_v16 = vld [vmem:[#allocation2] sm:$0xff]  ;;  %s3381_s2 = sshll.u32 %s5507_s20, 4  ;;  %s3382_s2 = int_to_ptr.vmem [resolvable:$true] %s3381_s2 }
  0x3a   :  { %v75_v18 = vld [vmem:[#allocation2 + $0x20] sm:$0xff]  ;;  %v73_v19 = vld [vmem:[#allocation2 + $0x10] sm:$0xff]  ;;  %v5619_v21 = vpack.c.bf16 %v76_v11, %v72_v10  ;;  %v5621_v22 = vpack.c.bf16 %v78_v15, %v74_v14  ;;  %v264_v24 = vld [vmem:[%s6817_s0 + $0x8] sm:$0xff]  ;;  %s5469_s30 = scalar_lea.vmem %s3382_s2, 128  ;;  %p5474_p11 = scmp.lt.s32.totalorder %s3382_s2, %s3382_s2 }
  0x3b   :  { %v5598_v3 = vsub.s32 1, %v275_v2  ;;  %v5600_v4 = vsub.s32 3, %v275_v2  ;;  %v5602_v5 = vsub.s32 0, %v275_v2  ;;  %v5604_v6 = vsub.s32 2, %v275_v2  ;;  %v77_v20 = vld [vmem:[#allocation2 + $0x30] sm:$0xff]  ;;  %v80_v25 = vld [vmem:[#allocation2 + $0x48] sm:$0xff]  ;;  %p5470_p10 = scmp.ne.s32.totalorder %s3382_s2, %s5469_s30  ;;  %p5475_p12 = scmp.lt.s32.totalorder %s5469_s30, %s5469_s30 }
  0x3c   :  { %6962 = vst [vmem:[#allocation14_spill] sm:$0xff] %v5619_v21  ;;  %6963 = vst [vmem:[#allocation15_spill] sm:$0xff] %v5621_v22  ;;  %v5623_v23 = vpack.c.bf16 %v75_v18, %v71_v16  ;;  %v84_v26 = vld [vmem:[#allocation2 + $0x68] sm:$0xff]  ;;  %v5630_v27 = vpack.c.bf16 %v77_v20, %v73_v19  ;;  %v82_v28 = vld [vmem:[#allocation2 + $0x58] sm:$0xff] }
  0x3d   :  { %6960 = vst [vmem:[#allocation12_spill] sm:$0xff] %v5598_v3  ;;  %6961 = vst [vmem:[#allocation13_spill] sm:$0xff] %v5602_v5  ;;  %v302_v8 = vrot.slane %v271_v7, %v5598_v3  ;;  %v310_v12 = vrot.slane %v271_v7, %v5600_v4  ;;  %v298_v13 = vrot.slane %v271_v7, %v5602_v5  ;;  %v86_v29 = vld [vmem:[#allocation2 + $0x78] sm:$0xff]  ;;  %v79_v30 = vld [vmem:[#allocation2 + $0x40] sm:$0xff]  ;;  %p5476_p13 = por %p5475_p12, %p5474_p11 }
  0x3e   :  { %v306_v17 = vrot.slane %v271_v7, %v5604_v6  ;;  %v5634_v31 = vpack.c.bf16 %v84_v26, %v80_v25  ;;  %v83_v32 = vld [vmem:[#allocation2 + $0x60] sm:$0xff]  ;;  %v81_v33 = vld [vmem:[#allocation2 + $0x50] sm:$0xff]  ;;  %v5638_v35 = vpack.c.bf16 %v86_v29, %v82_v28  ;;  %v88_v37 = vld [vmem:[#allocation2 + $0x88] sm:$0xff] }
  0x3f   :  { %3391 = vmatprep.subr.msk.mxu0 %vm336_vm0, %v302_v8  ;;  %3401 = vmatprep.subr.msk.mxu1 %vm336_vm0, %v310_v12  ;;  %v85_v34 = vld [vmem:[#allocation2 + $0x70] sm:$0xff]  ;;  %v5640_v36 = vpack.c.bf16 %v83_v32, %v79_v30  ;;  %v92_v38 = vld [vmem:[#allocation2 + $0xa8] sm:$0xff]  ;;  %v90_v40 = vld [vmem:[#allocation2 + $0x98] sm:$0xff]  ;;  %p5477_p0 = pnand %p5476_p13, %p5470_p10 }
  0x40   :  { %3392 = vmatpush1.msk.msra.mxu0 %vm336_vm0, %v298_v13  ;;  %3402 = vmatpush1.msk.msra.mxu1 %vm336_vm0, %v306_v17  ;;  %v5644_v39 = vpack.c.bf16 %v85_v34, %v81_v33  ;;  %v94_v41 = vld [vmem:[#allocation2 + $0xb8] sm:$0xff]  ;;  %v87_v42 = vld [vmem:[#allocation2 + $0x80] sm:$0xff]  ;;  %v89_v44 = vld [vmem:[#allocation2 + $0x90] sm:$0xff]  ;;  %v5653_v47 = vpack.c.bf16 %v92_v38, %v88_v37 }
  0x41   :  { %3393 = vmatmul.mubr.msk.f32.vlgmr.msra.gmra.mrb[0].mxu0 %vm311_vm1, %v263_v9  ;;  %3403 = vmatmul.mubr.msk.f32.vlgmr.msra.gmra.mrb[0].mxu1 %vm311_vm1, %v263_v9  ;;  %v91_v43 = vld [vmem:[#allocation2 + $0xa0] sm:$0xff]  ;;  %v93_v45 = vld [vmem:[#allocation2 + $0xb0] sm:$0xff]  ;;  %v5657_v48 = vpack.c.bf16 %v94_v41, %v90_v40  ;;  %v96_v50 = vld [vmem:[#allocation2 + $0xc8] sm:$0xff] }
  0x42   :  { %3513 = vmatprep.subr.bf16.mxu0 %v5619_v21  ;;  %3545 = vmatprep.subr.bf16.mxu1 %v5621_v22  ;;  %v265_v46 = vld [vmem:[%s6817_s0 + $0x10] sm:$0xff]  ;;  %v5659_v49 = vpack.c.bf16 %v91_v43, %v87_v42  ;;  %v100_v51 = vld [vmem:[#allocation2 + $0xe8] sm:$0xff]  ;;  %v98_v52 = vld [vmem:[#allocation2 + $0xd8] sm:$0xff]  ;;  %v5663_v53 = vpack.c.bf16 %v93_v45, %v89_v44 }
  0x43   :  { %3515 = vmatpush1.bf16.msra.mxu0 %v5623_v23  ;;  %3547 = vmatpush1.bf16.msra.mxu1 %v5630_v27  ;;  %v102_v54 = vld [vmem:[#allocation2 + $0xf8] sm:$0xff]  ;;  %v95_v55 = vld [vmem:[#allocation2 + $0xc0] sm:$0xff]  ;;  %v97_v57 = vld [vmem:[#allocation2 + $0xd0] sm:$0xff]  ;;  %v5672_v60 = vpack.c.bf16 %v100_v51, %v96_v50 }
  0x44   :  { %415 = vmatprep.mubr.f32.mxu0 %v6826_v1  ;;  %528 = vmatprep.mubr.f32.mxu1 %v6826_v1  ;;  %v99_v56 = vld [vmem:[#allocation2 + $0xe0] sm:$0xff]  ;;  %v101_v58 = vld [vmem:[#allocation2 + $0xf0] sm:$0xff]  ;;  %v266_v59 = vld [vmem:[%s6817_s0 + $0x18] sm:$0xff]  ;;  %v5676_v61 = vpack.c.bf16 %v102_v54, %v98_v52 }
  0x45   :  { %3394 = vmatmul.mubr.msk.f32.gmra.mrb[2].mxu0 %vm311_vm1, %v264_v24  ;;  %3404 = vmatmul.mubr.msk.f32.gmra.mrb[2].mxu1 %vm311_vm1, %v264_v24  ;;  %v5678_v62 = vpack.c.bf16 %v99_v56, %v95_v55  ;;  %v104_v63 = vld [vmem:[#allocation2 + $0x108] sm:$0xff]  ;;  %v106_v2 = vld [vmem:[#allocation2 + $0x118] sm:$0xff]  ;;  %v5682_v7 = vpack.c.bf16 %v101_v58, %v97_v57  ;;  %v103_v9 = vld [vmem:[#allocation2 + $0x100] sm:$0xff] }
  0x46   :  { %3517 = vmatprep.subr.bf16.mxu0 %v5634_v31  ;;  %3549 = vmatprep.subr.bf16.mxu1 %v5638_v35  ;;  %v108_v0 = vld [vmem:[#allocation2 + $0x128] sm:$0xff]  ;;  %v110_v8 = vld [vmem:[#allocation2 + $0x138] sm:$0xff]  ;;  %v107_v10 = vld [vmem:[#allocation2 + $0x120] sm:$0xff] }
  0x47   :  { %3519 = vmatpush1.bf16.msra.mxu0 %v5640_v36  ;;  %3551 = vmatpush1.bf16.msra.mxu1 %v5644_v39  ;;  %v105_v11 = vld [vmem:[#allocation2 + $0x110] sm:$0xff]  ;;  %v267_v13 = vld [vmem:[%s6817_s0 + $0x20] sm:$0xff]  ;;  %v5691_v14 = vpack.c.bf16 %v108_v0, %v104_v63  ;;  %v5695_v15 = vpack.c.bf16 %v110_v8, %v106_v2  ;;  %v5697_v16 = vpack.c.bf16 %v107_v10, %v103_v9  ;;  %v112_v17 = vld [vmem:[#allocation2 + $0x148] sm:$0xff] }
  0x48   :  { %421 = vmatprep.mubr.f32.mxu0 %v6826_v1  ;;  %534 = vmatprep.mubr.f32.mxu1 %v6826_v1  ;;  %v109_v12 = vld [vmem:[#allocation2 + $0x130] sm:$0xff]  ;;  %v116_v18 = vld [vmem:[#allocation2 + $0x168] sm:$0xff]  ;;  %v114_v19 = vld [vmem:[#allocation2 + $0x158] sm:$0xff] }
  0x49   :  { %3395 = vmatmul.mubr.msk.f32.gmra.mrb[4].mxu0 %vm311_vm1, %v265_v46  ;;  %3405 = vmatmul.mubr.msk.f32.gmra.mrb[4].mxu1 %vm311_vm1, %v265_v46  ;;  %v5701_v20 = vpack.c.bf16 %v109_v12, %v105_v11  ;;  %v118_v24 = vld [vmem:[#allocation2 + $0x178] sm:$0xff]  ;;  %v111_v25 = vld [vmem:[#allocation2 + $0x140] sm:$0xff]  ;;  %v113_v28 = vld [vmem:[#allocation2 + $0x150] sm:$0xff]  ;;  %v5710_v32 = vpack.c.bf16 %v116_v18, %v112_v17 }
  0x4a   :  { %3521 = vmatprep.subr.bf16.mxu0 %v5653_v47  ;;  %3553 = vmatprep.subr.bf16.mxu1 %v5657_v48  ;;  %v115_v26 = vld [vmem:[#allocation2 + $0x160] sm:$0xff]  ;;  %v117_v29 = vld [vmem:[#allocation2 + $0x170] sm:$0xff]  ;;  %v268_v30 = vld [vmem:[%s6817_s0 + $0x28] sm:$0xff]  ;;  %v5714_v33 = vpack.c.bf16 %v118_v24, %v114_v19 }
  0x4b   :  { %3523 = vmatpush1.bf16.msra.mxu0 %v5659_v49  ;;  %3555 = vmatpush1.bf16.msra.mxu1 %v5663_v53  ;;  %v5716_v34 = vpack.c.bf16 %v115_v26, %v111_v25  ;;  %v120_v37 = vld [vmem:[#allocation2 + $0x188] sm:$0xff]  ;;  %v122_v40 = vld [vmem:[#allocation2 + $0x198] sm:$0xff]  ;;  %v5720_v41 = vpack.c.bf16 %v117_v29, %v113_v28  ;;  %v119_v43 = vld [vmem:[#allocation2 + $0x180] sm:$0xff] }
  0x4c   :  { %427 = vmatprep.mubr.f32.mxu0 %v6826_v1  ;;  %540 = vmatprep.mubr.f32.mxu1 %v6826_v1  ;;  %v124_v38 = vld [vmem:[#allocation2 + $0x1a8] sm:$0xff]  ;;  %v126_v42 = vld [vmem:[#allocation2 + $0x1b8] sm:$0xff]  ;;  %v123_v44 = vld [vmem:[#allocation2 + $0x1a0] sm:$0xff] }
  0x4d   :  { %3396 = vmatmul.mubr.msk.f32.gmra.mrb[6].mxu0 %vm311_vm1, %v266_v59  ;;  %3406 = vmatmul.mubr.msk.f32.gmra.mrb[6].mxu1 %vm311_vm1, %v266_v59  ;;  %v121_v45 = vld [vmem:[#allocation2 + $0x190] sm:$0xff]  ;;  %v5729_v51 = vpack.c.bf16 %v124_v38, %v120_v37  ;;  %v5733_v52 = vpack.c.bf16 %v126_v42, %v122_v40  ;;  %v5735_v54 = vpack.c.bf16 %v123_v44, %v119_v43  ;;  %v128_v55 = vld [vmem:[#allocation2 + $0x1c8] sm:$0xff]  ;;  %v130_v57 = vld [vmem:[#allocation2 + $0x1d8] sm:$0xff] }
  0x4e   :  { %3525 = vmatprep.subr.bf16.mxu0 %v5672_v60  ;;  %3557 = vmatprep.subr.bf16.mxu1 %v5676_v61  ;;  %v125_v46 = vld [vmem:[#allocation2 + $0x1b0] sm:$0xff]  ;;  %v132_v56 = vld [vmem:[#allocation2 + $0x1e8] sm:$0xff]  ;;  %v134_v59 = vld [vmem:[#allocation2 + $0x1f8] sm:$0xff] }
  0x4f   :  { %3527 = vmatpush1.bf16.msra.mxu0 %v5678_v62  ;;  %3559 = vmatpush1.bf16.msra.mxu1 %v5682_v7  ;;  %v269_v50 = vld [vmem:[%s6817_s0 + $0x30] sm:$0xff]  ;;  %v5739_v58 = vpack.c.bf16 %v125_v46, %v121_v45  ;;  %v127_v63 = vld [vmem:[#allocation2 + $0x1c0] sm:$0xff]  ;;  %v270_v9 = vld [vmem:[%s6817_s0 + $0x38] sm:$0xff]  ;;  %v5748_v10 = vpack.c.bf16 %v132_v56, %v128_v55 }
  0x50   :  { %433 = vmatprep.mubr.f32.mxu0 %v6826_v1  ;;  %546 = vmatprep.mubr.f32.mxu1 %v6826_v1  ;;  %v131_v0 = vld [vmem:[#allocation2 + $0x1e0] sm:$0xff]  ;;  %v129_v2 = vld [vmem:[#allocation2 + $0x1d0] sm:$0xff]  ;;  %v136_v11 = vld [vmem:[#allocation5 + $0x8] sm:$0xff] }
  0x51   :  { %3397 = vmatmul.mubr.msk.f32.gmra.mrb[8].mxu0 %vm311_vm1, %v267_v13  ;;  %3407 = vmatmul.mubr.msk.f32.gmra.mrb[8].mxu1 %vm311_vm1, %v267_v13  ;;  %v133_v8 = vld [vmem:[#allocation2 + $0x1f0] sm:$0xff]  ;;  %v140_v12 = vld [vmem:[#allocation5 + $0x28] sm:$0xff]  ;;  %v5752_v13 = vpack.c.bf16 %v134_v59, %v130_v57  ;;  %v5754_v17 = vpack.c.bf16 %v131_v0, %v127_v63  ;;  %v138_v18 = vld [vmem:[#allocation5 + $0x18] sm:$0xff] }
  0x52   :  { %3529 = vmatprep.subr.bf16.mxu0 %v5691_v14  ;;  %3561 = vmatprep.subr.bf16.mxu1 %v5695_v15  ;;  %v142_v19 = vld [vmem:[#allocation5 + $0x38] sm:$0xff]  ;;  %v5758_v24 = vpack.c.bf16 %v133_v8, %v129_v2  ;;  %v135_v25 = vld [vmem:[#allocation5] sm:$0xff]  ;;  %v137_v28 = vld [vmem:[#allocation5 + $0x10] sm:$0xff]  ;;  %v5762_v29 = vpack.c.bf16 %v140_v12, %v136_v11 }
  0x53   :  { %3531 = vmatpush1.bf16.msra.mxu0 %v5697_v16  ;;  %3563 = vmatpush1.bf16.msra.mxu1 %v5701_v20  ;;  %v139_v26 = vld [vmem:[#allocation5 + $0x20] sm:$0xff]  ;;  %v144_v37 = vld [vmem:[#allocation5 + $0x48] sm:$0xff]  ;;  %v5766_v40 = vpack.c.bf16 %v142_v19, %v138_v18  ;;  %v146_v42 = vld [vmem:[#allocation5 + $0x58] sm:$0xff] }
  0x54   :  { %439 = vmatprep.mubr.f32.mxu0 %v6826_v1  ;;  %552 = vmatprep.mubr.f32.mxu1 %v6826_v1  ;;  %v148_v38 = vld [vmem:[#allocation5 + $0x68] sm:$0xff]  ;;  %v150_v43 = vld [vmem:[#allocation5 + $0x78] sm:$0xff]  ;;  %v5770_v44 = vpack.c.bf16 %v139_v26, %v135_v25  ;;  %v147_v55 = vld [vmem:[#allocation5 + $0x60] sm:$0xff] }
  0x55   :  { %3398 = vmatmul.mubr.msk.f32.gmra.mrb[10].mxu0 %vm311_vm1, %v268_v30  ;;  %3408 = vmatmul.mubr.msk.f32.gmra.mrb[10].mxu1 %vm311_vm1, %v268_v30  ;;  %v141_v30 = vld [vmem:[#allocation5 + $0x30] sm:$0xff]  ;;  %v5776_v46 = vpack.c.bf16 %v148_v38, %v144_v37  ;;  %v5780_v57 = vpack.c.bf16 %v150_v43, %v146_v42  ;;  %v152_v63 = vld [vmem:[#allocation5 + $0x88] sm:$0xff]  ;;  %v154_v2 = vld [vmem:[#allocation5 + $0x98] sm:$0xff] }
  0x56   :  { %3533 = vmatprep.subr.bf16.mxu0 %v5710_v32  ;;  %3565 = vmatprep.subr.bf16.mxu1 %v5714_v33  ;;  %v5774_v45 = vpack.c.bf16 %v141_v30, %v137_v28  ;;  %v145_v56 = vld [vmem:[#allocation5 + $0x50] sm:$0xff]  ;;  %v156_v0 = vld [vmem:[#allocation5 + $0xa8] sm:$0xff]  ;;  %v158_v8 = vld [vmem:[#allocation5 + $0xb8] sm:$0xff] }
  0x57   :  { %3535 = vmatpush1.bf16.msra.mxu0 %v5716_v34  ;;  %3567 = vmatpush1.bf16.msra.mxu1 %v5720_v41  ;;  %v149_v59 = vld [vmem:[#allocation5 + $0x70] sm:$0xff]  ;;  %v5792_v12 = vpack.c.bf16 %v156_v0, %v152_v63  ;;  %v151_v18 = vld [vmem:[#allocation5 + $0x80] sm:$0xff]  ;;  %v5795_v26 = vpack.c.bf16 %v158_v8, %v154_v2  ;;  %v160_v30 = vld [vmem:[#allocation5 + $0xc8] sm:$0xff] }
  0x58   :  { %445 = vmatprep.mubr.f32.mxu0 %v6826_v1  ;;  %558 = vmatprep.mubr.f32.mxu1 %v6826_v1  ;;  %v5790_v11 = vpack.c.bf16 %v149_v59, %v145_v56  ;;  %v155_v19 = vld [vmem:[#allocation5 + $0xa0] sm:$0xff]  ;;  %v153_v25 = vld [vmem:[#allocation5 + $0x90] sm:$0xff]  ;;  %v164_v37 = vld [vmem:[#allocation5 + $0xe8] sm:$0xff] }
  0x59   :  { %3399 = vmatmul.mubr.msk.f32.gmra.mrb[12].mxu0 %vm311_vm1, %v269_v50  ;;  %3409 = vmatmul.mubr.msk.f32.gmra.mrb[12].mxu1 %vm311_vm1, %v269_v50  ;;  %v143_v50 = vld [vmem:[#allocation5 + $0x40] sm:$0xff]  ;;  %6965 = vst [vmem:[#allocation17_spill] sm:$0xff] %v5795_v26  ;;  %v157_v28 = vld [vmem:[#allocation5 + $0xb0] sm:$0xff]  ;;  %v162_v38 = vld [vmem:[#allocation5 + $0xd8] sm:$0xff]  ;;  %v5800_v43 = vpack.c.bf16 %v155_v19, %v151_v18 }
  0x5a   :  { %3537 = vmatprep.subr.bf16.mxu0 %v5729_v51  ;;  %3569 = vmatprep.subr.bf16.mxu1 %v5733_v52  ;;  %6964 = vst [vmem:[#allocation16_spill] sm:$0xff] %v5790_v11  ;;  %v166_v42 = vld [vmem:[#allocation5 + $0xf8] sm:$0xff]  ;;  %v159_v56 = vld [vmem:[#allocation5 + $0xc0] sm:$0xff]  ;;  %v161_v63 = vld [vmem:[#allocation5 + $0xd0] sm:$0xff] }
  0x5b   :  { %3539 = vmatpush1.bf16.msra.mxu0 %v5735_v54  ;;  %3571 = vmatpush1.bf16.msra.mxu1 %v5739_v58  ;;  %6966 = vst [vmem:[#allocation18_spill] sm:$0xff] %v5800_v43  ;;  %v163_v59 = vld [vmem:[#allocation5 + $0xe0] sm:$0xff]  ;;  %v5809_v0 = vpack.c.bf16 %v166_v42, %v162_v38  ;;  %v165_v2 = vld [vmem:[#allocation5 + $0xf0] sm:$0xff]  ;;  %v168_v8 = vld [vmem:[#allocation5 + $0x108] sm:$0xff] }
  0x5c   :  { %451 = vmatprep.mubr.f32.mxu0 %v6826_v1  ;;  %564 = vmatprep.mubr.f32.mxu1 %v6826_v1  ;;  %v170_v18 = vld [vmem:[#allocation5 + $0x118] sm:$0xff]  ;;  %v169_v42 = vld [vmem:[#allocation5 + $0x110] sm:$0xff] }
  0x5d   :  { %3400 = vmatmul.mubr.msk.f32.gmra.mrb[14].mxu0 %vm311_vm1, %v270_v9  ;;  %3410 = vmatmul.mubr.msk.f32.gmra.mrb[14].mxu1 %vm311_vm1, %v270_v9  ;;  %v5786_v9 = vpack.c.bf16 %v147_v55, %v143_v50  ;;  %v5804_v50 = vpack.c.bf16 %v157_v28, %v153_v25  ;;  %v5806_v55 = vpack.c.bf16 %v164_v37, %v160_v30  ;;  %v174_v19 = vld [vmem:[#allocation5 + $0x138] sm:$0xff]  ;;  %v167_v30 = vld [vmem:[#allocation5 + $0x100] sm:$0xff] }
  0x5e   :  { %3541 = vmatprep.subr.bf16.mxu0 %v5748_v10  ;;  %3573 = vmatprep.subr.bf16.mxu1 %v5752_v13  ;;  %6969 = vst [vmem:[#allocation21_spill] sm:$0xff] %v5809_v0  ;;  %v5816_v25 = vpack.c.bf16 %v165_v2, %v161_v63  ;;  %v171_v37 = vld [vmem:[#allocation5 + $0x120] sm:$0xff]  ;;  %v5821_v38 = vpack.c.bf16 %v174_v19, %v170_v18  ;;  %v180_v63 = vld [vmem:[#allocation5 + $0x168] sm:$0xff]  ;;  %v178_v2 = vld [vmem:[#allocation5 + $0x158] sm:$0xff] }
  0x5f   :  { %3543 = vmatpush1.bf16.msra.mxu0 %v5754_v17  ;;  %3575 = vmatpush1.bf16.msra.mxu1 %v5758_v24  ;;  %6967 = vst [vmem:[#allocation19_spill] sm:$0xff] %v5804_v50  ;;  %6968 = vst [vmem:[#allocation20_spill] sm:$0xff] %v5806_v55  ;;  %v182_v18 = vld [vmem:[#allocation5 + $0x178] sm:$0xff]  ;;  %v175_v19 = vld [vmem:[#allocation5 + $0x140] sm:$0xff] }
  0x60   :  { %657 = vmatprep.mubr.f32.mxu0 %v6826_v1  ;;  %728 = vmatprep.mubr.f32.mxu1 %v6826_v1  ;;  %6971 = vst [vmem:[#allocation23_spill] sm:$0xff] %v5816_v25  ;;  %6973 = vst [vmem:[#allocation25_spill] sm:$0xff] %v5821_v38 }
  0x61   :  { %3577 = vmatprep.subr.bf16.mxu0 %v5762_v29  ;;  %3641 = vmatprep.subr.bf16.mxu1 %v5766_v40 }
  0x62   :  { %658 = vmatmul.mubr.f32.vlgmr.msra.gmra.mrb[0].mxu0 %v6826_v1  ;;  %729 = vmatmul.mubr.f32.vlgmr.msra.gmra.mrb[0].mxu1 %v6826_v1 }
  0x63   :  { %3579 = vmatpush1.bf16.msra.mxu0 %v5770_v44  ;;  %3643 = vmatpush1.bf16.msra.mxu1 %v5774_v45 }
  0x64   :  { %3581 = vmatprep.subr.bf16.mxu0 %v5776_v46  ;;  %3645 = vmatprep.subr.bf16.mxu1 %v5780_v57 }
  0x65   :  { %827 = vmatprep.mubr.f32.mxu0 %v6826_v1  ;;  %898 = vmatprep.mubr.f32.mxu1 %v6826_v1  ;;  %v172_v1 = vld [vmem:[#allocation5 + $0x128] sm:$0xff] }
  0x66   :  { %v5818_v28 = vpack.c.bf16 %v172_v1, %v168_v8  ;;  %v176_v1 = vld [vmem:[#allocation5 + $0x148] sm:$0xff] }
  0x67   :  { %3583 = vmatpush1.bf16.msra.mxu0 %v5786_v9  ;;  %3647 = vmatpush1.bf16.msra.mxu1 %v5790_v11  ;;  %v5812_v11 = vpack.c.bf16 %v163_v59, %v159_v56  ;;  %v5824_v56 = vpack.c.bf16 %v171_v37, %v167_v30  ;;  %v5833_v8 = vpack.c.bf16 %v180_v63, %v176_v1  ;;  %v179_v30 = vld [vmem:[#allocation5 + $0x160] sm:$0xff]  ;;  %v188_v1 = vld [vmem:[#allocation5 + $0x1a8] sm:$0xff]  ;;  %v186_v63 = vld [vmem:[#allocation5 + $0x198] sm:$0xff] }
  0x68   :  { %3585 = vmatprep.subr.bf16.mxu0 %v5792_v12  ;;  %3649 = vmatprep.subr.bf16.mxu1 %v5795_v26  ;;  %6972 = vst [vmem:[#allocation24_spill] sm:$0xff] %v5818_v28  ;;  %v173_v26 = vld [vmem:[#allocation5 + $0x130] sm:$0xff]  ;;  %v5835_v37 = vpack.c.bf16 %v182_v18, %v178_v2  ;;  %v190_v2 = vld [vmem:[#allocation5 + $0x1b8] sm:$0xff]  ;;  %v183_v18 = vld [vmem:[#allocation5 + $0x180] sm:$0xff] }
  0x69   :  { %6970 = vst [vmem:[#allocation22_spill] sm:$0xff] %v5812_v11  ;;  %6974 = vst [vmem:[#allocation26_spill] sm:$0xff] %v5824_v56  ;;  %v5828_v59 = vpack.c.bf16 %v173_v26, %v169_v42  ;;  %v177_v26 = vld [vmem:[#allocation5 + $0x150] sm:$0xff] }
  0x6a   :  { %6976 = vst [vmem:[#allocation28_spill] sm:$0xff] %v5833_v8  ;;  %6977 = vst [vmem:[#allocation29_spill] sm:$0xff] %v5835_v37  ;;  %v181_v42 = vld [vmem:[#allocation5 + $0x170] sm:$0xff] }
  0x6b   :  { %3587 = vmatpush1.bf16.msra.mxu0 %v5800_v43  ;;  %3651 = vmatpush1.bf16.msra.mxu1 %v5804_v50  ;;  %6975 = vst [vmem:[#allocation27_spill] sm:$0xff] %v5828_v59 }
  0x6c   :  { %3589 = vmatprep.subr.bf16.mxu0 %v5806_v55  ;;  %3653 = vmatprep.subr.bf16.mxu1 %v5809_v0  ;;  %v254_v0 = vld [vmem:[#allocation5 + $0x3b8] sm:$0xff] }
  0x6f   :  { %3591 = vmatpush1.bf16.msra.mxu0 %v5812_v11  ;;  %3655 = vmatpush1.bf16.msra.mxu1 %v5816_v25  ;;  %v5837_v25 = vpack.c.bf16 %v179_v30, %v175_v19  ;;  %v187_v19 = vld [vmem:[#allocation5 + $0x1a0] sm:$0xff]  ;;  %v5847_v30 = vpack.c.bf16 %v190_v2, %v186_v63  ;;  %v198_v63 = vld [vmem:[#allocation5 + $0x1f8] sm:$0xff] }
  0x70   :  { %3593 = vmatprep.subr.bf16.mxu0 %v5818_v28  ;;  %3657 = vmatprep.subr.bf16.mxu1 %v5821_v38  ;;  %v5840_v38 = vpack.c.bf16 %v181_v42, %v177_v26  ;;  %v5849_v28 = vpack.c.bf16 %v187_v19, %v183_v18  ;;  %v185_v26 = vld [vmem:[#allocation5 + $0x190] sm:$0xff]  ;;  %v191_v2 = vld [vmem:[#allocation5 + $0x1c0] sm:$0xff]  ;;  %v250_v11 = vld [vmem:[#allocation5 + $0x398] sm:$0xff] }
  0x71   :  { %6978 = vst [vmem:[#allocation30_spill] sm:$0xff] %v5837_v25  ;;  %6981 = vst [vmem:[#allocation33_spill] sm:$0xff] %v5847_v30  ;;  %v189_v42 = vld [vmem:[#allocation5 + $0x1b0] sm:$0xff]  ;;  %v195_v18 = vld [vmem:[#allocation5 + $0x1e0] sm:$0xff] }
  0x72   :  { %6979 = vst [vmem:[#allocation31_spill] sm:$0xff] %v5840_v38  ;;  %6982 = vst [vmem:[#allocation34_spill] sm:$0xff] %v5849_v28 }
  0x73   :  { %3595 = vmatpush1.bf16.msra.mxu0 %v5824_v56  ;;  %3659 = vmatpush1.bf16.msra.mxu1 %v5828_v59  ;;  %v184_v59 = vld [vmem:[#allocation5 + $0x188] sm:$0xff] }
  0x74   :  { %3597 = vmatprep.subr.bf16.mxu0 %v5833_v8  ;;  %3661 = vmatprep.subr.bf16.mxu1 %v5835_v37  ;;  %v5845_v56 = vpack.c.bf16 %v188_v1, %v184_v59  ;;  %v5852_v37 = vpack.c.bf16 %v189_v42, %v185_v26  ;;  %v196_v59 = vld [vmem:[#allocation5 + $0x1e8] sm:$0xff]  ;;  %v194_v1 = vld [vmem:[#allocation5 + $0x1d8] sm:$0xff]  ;;  %v5861_v8 = vpack.c.bf16 %v195_v18, %v191_v2  ;;  %v193_v26 = vld [vmem:[#allocation5 + $0x1d0] sm:$0xff] }
  0x75   :  { %v5859_v19 = vpack.c.bf16 %v198_v63, %v194_v1  ;;  %v197_v42 = vld [vmem:[#allocation5 + $0x1f0] sm:$0xff]  ;;  %v206_v1 = vld [vmem:[#allocation5 + $0x238] sm:$0xff]  ;;  %v199_v63 = vld [vmem:[#allocation5 + $0x200] sm:$0xff] }
  0x76   :  { %6980 = vst [vmem:[#allocation32_spill] sm:$0xff] %v5845_v56  ;;  %6983 = vst [vmem:[#allocation35_spill] sm:$0xff] %v5852_v37  ;;  %v203_v2 = vld [vmem:[#allocation5 + $0x220] sm:$0xff] }
  0x77   :  { %3599 = vmatpush1.bf16.msra.mxu0 %v5837_v25  ;;  %3663 = vmatpush1.bf16.msra.mxu1 %v5840_v38  ;;  %v192_v38 = vld [vmem:[#allocation5 + $0x1c8] sm:$0xff]  ;;  %6985 = vst [vmem:[#allocation37_spill] sm:$0xff] %v5859_v19  ;;  %6986 = vst [vmem:[#allocation38_spill] sm:$0xff] %v5861_v8 }
  0x78   :  { %3601 = vmatprep.subr.bf16.mxu0 %v5845_v56  ;;  %3665 = vmatprep.subr.bf16.mxu1 %v5847_v30  ;;  %v5857_v25 = vpack.c.bf16 %v196_v59, %v192_v38  ;;  %v5864_v30 = vpack.c.bf16 %v197_v42, %v193_v26  ;;  %v204_v38 = vld [vmem:[#allocation5 + $0x228] sm:$0xff]  ;;  %v202_v59 = vld [vmem:[#allocation5 + $0x218] sm:$0xff]  ;;  %v5873_v56 = vpack.c.bf16 %v203_v2, %v199_v63  ;;  %v201_v26 = vld [vmem:[#allocation5 + $0x210] sm:$0xff] }
  0x79   :  { %v5871_v18 = vpack.c.bf16 %v206_v1, %v202_v59  ;;  %v205_v42 = vld [vmem:[#allocation5 + $0x230] sm:$0xff]  ;;  %v214_v59 = vld [vmem:[#allocation5 + $0x278] sm:$0xff]  ;;  %v207_v1 = vld [vmem:[#allocation5 + $0x240] sm:$0xff] }
  0x7a   :  { %6984 = vst [vmem:[#allocation36_spill] sm:$0xff] %v5857_v25  ;;  %6987 = vst [vmem:[#allocation39_spill] sm:$0xff] %v5864_v30  ;;  %v211_v63 = vld [vmem:[#allocation5 + $0x260] sm:$0xff] }
  0x7b   :  { %3603 = vmatpush1.bf16.msra.mxu0 %v5849_v28  ;;  %3667 = vmatpush1.bf16.msra.mxu1 %v5852_v37  ;;  %v200_v37 = vld [vmem:[#allocation5 + $0x208] sm:$0xff]  ;;  %6989 = vst [vmem:[#allocation41_spill] sm:$0xff] %v5871_v18  ;;  %6990 = vst [vmem:[#allocation42_spill] sm:$0xff] %v5873_v56 }
  0x7c   :  { %3605 = vmatprep.subr.bf16.mxu0 %v5857_v25  ;;  %3669 = vmatprep.subr.bf16.mxu1 %v5859_v19  ;;  %v5869_v28 = vpack.c.bf16 %v204_v38, %v200_v37  ;;  %v5876_v19 = vpack.c.bf16 %v205_v42, %v201_v26  ;;  %v212_v37 = vld [vmem:[#allocation5 + $0x268] sm:$0xff]  ;;  %v210_v38 = vld [vmem:[#allocation5 + $0x258] sm:$0xff]  ;;  %v5885_v25 = vpack.c.bf16 %v211_v63, %v207_v1  ;;  %v209_v26 = vld [vmem:[#allocation5 + $0x250] sm:$0xff] }
  0x7d   :  { %v5883_v2 = vpack.c.bf16 %v214_v59, %v210_v38  ;;  %v213_v42 = vld [vmem:[#allocation5 + $0x270] sm:$0xff]  ;;  %v222_v38 = vld [vmem:[#allocation5 + $0x2b8] sm:$0xff]  ;;  %v215_v59 = vld [vmem:[#allocation5 + $0x280] sm:$0xff] }
  0x7e   :  { %6988 = vst [vmem:[#allocation40_spill] sm:$0xff] %v5869_v28  ;;  %6991 = vst [vmem:[#allocation43_spill] sm:$0xff] %v5876_v19  ;;  %v219_v1 = vld [vmem:[#allocation5 + $0x2a0] sm:$0xff] }
  0x7f   :  { %3607 = vmatpush1.bf16.msra.mxu0 %v5861_v8  ;;  %3671 = vmatpush1.bf16.msra.mxu1 %v5864_v30  ;;  %v208_v30 = vld [vmem:[#allocation5 + $0x248] sm:$0xff]  ;;  %6993 = vst [vmem:[#allocation45_spill] sm:$0xff] %v5883_v2  ;;  %6994 = vst [vmem:[#allocation46_spill] sm:$0xff] %v5885_v25 }
  0x80   :  { %3609 = vmatprep.subr.bf16.mxu0 %v5869_v28  ;;  %3673 = vmatprep.subr.bf16.mxu1 %v5871_v18  ;;  %v5881_v8 = vpack.c.bf16 %v212_v37, %v208_v30  ;;  %v5888_v18 = vpack.c.bf16 %v213_v42, %v209_v26  ;;  %v220_v30 = vld [vmem:[#allocation5 + $0x2a8] sm:$0xff]  ;;  %v218_v37 = vld [vmem:[#allocation5 + $0x298] sm:$0xff]  ;;  %v5897_v28 = vpack.c.bf16 %v219_v1, %v215_v59  ;;  %v217_v26 = vld [vmem:[#allocation5 + $0x290] sm:$0xff] }
  0x81   :  { %v5895_v63 = vpack.c.bf16 %v222_v38, %v218_v37  ;;  %v221_v42 = vld [vmem:[#allocation5 + $0x2b0] sm:$0xff]  ;;  %v230_v37 = vld [vmem:[#allocation5 + $0x2f8] sm:$0xff]  ;;  %v223_v38 = vld [vmem:[#allocation5 + $0x2c0] sm:$0xff] }
  0x82   :  { %6992 = vst [vmem:[#allocation44_spill] sm:$0xff] %v5881_v8  ;;  %6995 = vst [vmem:[#allocation47_spill] sm:$0xff] %v5888_v18  ;;  %v227_v59 = vld [vmem:[#allocation5 + $0x2e0] sm:$0xff] }
  0x83   :  { %3611 = vmatpush1.bf16.msra.mxu0 %v5873_v56  ;;  %3675 = vmatpush1.bf16.msra.mxu1 %v5876_v19  ;;  %v216_v19 = vld [vmem:[#allocation5 + $0x288] sm:$0xff]  ;;  %6997 = vst [vmem:[#allocation49_spill] sm:$0xff] %v5895_v63  ;;  %6998 = vst [vmem:[#allocation50_spill] sm:$0xff] %v5897_v28 }
  0x84   :  { %3613 = vmatprep.subr.bf16.mxu0 %v5881_v8  ;;  %3677 = vmatprep.subr.bf16.mxu1 %v5883_v2  ;;  %v5893_v56 = vpack.c.bf16 %v220_v30, %v216_v19  ;;  %v5900_v2 = vpack.c.bf16 %v221_v42, %v217_v26  ;;  %v228_v19 = vld [vmem:[#allocation5 + $0x2e8] sm:$0xff]  ;;  %v226_v30 = vld [vmem:[#allocation5 + $0x2d8] sm:$0xff]  ;;  %v5909_v8 = vpack.c.bf16 %v227_v59, %v223_v38  ;;  %v225_v26 = vld [vmem:[#allocation5 + $0x2d0] sm:$0xff] }
  0x85   :  { %v5907_v1 = vpack.c.bf16 %v230_v37, %v226_v30  ;;  %v229_v42 = vld [vmem:[#allocation5 + $0x2f0] sm:$0xff]  ;;  %v238_v30 = vld [vmem:[#allocation5 + $0x338] sm:$0xff]  ;;  %v231_v37 = vld [vmem:[#allocation5 + $0x300] sm:$0xff] }
  0x86   :  { %6996 = vst [vmem:[#allocation48_spill] sm:$0xff] %v5893_v56  ;;  %6999 = vst [vmem:[#allocation51_spill] sm:$0xff] %v5900_v2  ;;  %v235_v38 = vld [vmem:[#allocation5 + $0x320] sm:$0xff] }
  0x87   :  { %3615 = vmatpush1.bf16.msra.mxu0 %v5885_v25  ;;  %3679 = vmatpush1.bf16.msra.mxu1 %v5888_v18  ;;  %v224_v18 = vld [vmem:[#allocation5 + $0x2c8] sm:$0xff]  ;;  %7001 = vst [vmem:[#allocation53_spill] sm:$0xff] %v5907_v1  ;;  %7002 = vst [vmem:[#allocation54_spill] sm:$0xff] %v5909_v8 }
  0x88   :  { %3617 = vmatprep.subr.bf16.mxu0 %v5893_v56  ;;  %3681 = vmatprep.subr.bf16.mxu1 %v5895_v63  ;;  %v5905_v25 = vpack.c.bf16 %v228_v19, %v224_v18  ;;  %v5912_v63 = vpack.c.bf16 %v229_v42, %v225_v26  ;;  %v236_v18 = vld [vmem:[#allocation5 + $0x328] sm:$0xff]  ;;  %v234_v19 = vld [vmem:[#allocation5 + $0x318] sm:$0xff]  ;;  %v5921_v56 = vpack.c.bf16 %v235_v38, %v231_v37  ;;  %v233_v26 = vld [vmem:[#allocation5 + $0x310] sm:$0xff] }
  0x89   :  { %v5919_v59 = vpack.c.bf16 %v238_v30, %v234_v19  ;;  %v237_v42 = vld [vmem:[#allocation5 + $0x330] sm:$0xff]  ;;  %v246_v19 = vld [vmem:[#allocation5 + $0x378] sm:$0xff]  ;;  %v239_v30 = vld [vmem:[#allocation5 + $0x340] sm:$0xff] }
  0x8a   :  { %7000 = vst [vmem:[#allocation52_spill] sm:$0xff] %v5905_v25  ;;  %7003 = vst [vmem:[#allocation55_spill] sm:$0xff] %v5912_v63  ;;  %v243_v37 = vld [vmem:[#allocation5 + $0x360] sm:$0xff] }
  0x8b   :  { %3619 = vmatpush1.bf16.msra.mxu0 %v5897_v28  ;;  %3683 = vmatpush1.bf16.msra.mxu1 %v5900_v2  ;;  %v232_v2 = vld [vmem:[#allocation5 + $0x308] sm:$0xff]  ;;  %7005 = vst [vmem:[#allocation57_spill] sm:$0xff] %v5919_v59  ;;  %7006 = vst [vmem:[#allocation58_spill] sm:$0xff] %v5921_v56 }
  0x8c   :  { %3621 = vmatprep.subr.bf16.mxu0 %v5905_v25  ;;  %3685 = vmatprep.subr.bf16.mxu1 %v5907_v1  ;;  %v5917_v28 = vpack.c.bf16 %v236_v18, %v232_v2  ;;  %v5924_v1 = vpack.c.bf16 %v237_v42, %v233_v26  ;;  %v244_v2 = vld [vmem:[#allocation5 + $0x368] sm:$0xff]  ;;  %v242_v18 = vld [vmem:[#allocation5 + $0x358] sm:$0xff]  ;;  %v5933_v25 = vpack.c.bf16 %v243_v37, %v239_v30  ;;  %v241_v26 = vld [vmem:[#allocation5 + $0x350] sm:$0xff] }
  0x8d   :  { %v5931_v38 = vpack.c.bf16 %v246_v19, %v242_v18  ;;  %v245_v42 = vld [vmem:[#allocation5 + $0x370] sm:$0xff]  ;;  %v247_v18 = vld [vmem:[#allocation5 + $0x380] sm:$0xff] }
  0x8e   :  { %7004 = vst [vmem:[#allocation56_spill] sm:$0xff] %v5917_v28  ;;  %7007 = vst [vmem:[#allocation59_spill] sm:$0xff] %v5924_v1  ;;  %v251_v19 = vld [vmem:[#allocation5 + $0x3a0] sm:$0xff]  ;;  %v249_v30 = vld [vmem:[#allocation5 + $0x390] sm:$0xff] }
  0x8f   :  { %3623 = vmatpush1.bf16.msra.mxu0 %v5909_v8  ;;  %3687 = vmatpush1.bf16.msra.mxu1 %v5912_v63  ;;  %v240_v63 = vld [vmem:[#allocation5 + $0x348] sm:$0xff]  ;;  %7009 = vst [vmem:[#allocation61_spill] sm:$0xff] %v5931_v38  ;;  %7010 = vst [vmem:[#allocation62_spill] sm:$0xff] %v5933_v25  ;;  %v5945_v37 = vpack.c.bf16 %v251_v19, %v247_v18  ;;  %v261_v18 = vld [vmem:[#allocation5 + $0x3f0] sm:$0xff] }
  0x90   :  { %3625 = vmatprep.subr.bf16.mxu0 %v5917_v28  ;;  %3689 = vmatprep.subr.bf16.mxu1 %v5919_v59  ;;  %v5929_v8 = vpack.c.bf16 %v244_v2, %v240_v63  ;;  %v248_v28 = vld [vmem:[#allocation5 + $0x388] sm:$0xff]  ;;  %v5942_v2 = vpack.c.bf16 %v254_v0, %v250_v11  ;;  %v258_v11 = vld [vmem:[#allocation5 + $0x3d8] sm:$0xff] }
  0x91   :  { %v252_v59 = vld [vmem:[#allocation5 + $0x3a8] sm:$0xff]  ;;  %7014 = vst [vmem:[#allocation66_spill] sm:$0xff] %v5945_v37  ;;  %v262_v0 = vld [vmem:[#allocation5 + $0x3f8] sm:$0xff] }
  0x92   :  { %7008 = vst [vmem:[#allocation60_spill] sm:$0xff] %v5929_v8  ;;  %v5940_v63 = vpack.c.bf16 %v252_v59, %v248_v28  ;;  %7013 = vst [vmem:[#allocation65_spill] sm:$0xff] %v5942_v2  ;;  %v255_v59 = vld [vmem:[#allocation5 + $0x3c0] sm:$0xff] }
  0x93   :  { %3627 = vmatpush1.bf16.msra.mxu0 %v5921_v56  ;;  %3691 = vmatpush1.bf16.msra.mxu1 %v5924_v1  ;;  %v5936_v56 = vpack.c.bf16 %v245_v42, %v241_v26  ;;  %v253_v26 = vld [vmem:[#allocation5 + $0x3b0] sm:$0xff]  ;;  %v256_v42 = vld [vmem:[#allocation5 + $0x3c8] sm:$0xff]  ;;  %v259_v1 = vld [vmem:[#allocation5 + $0x3e0] sm:$0xff] }
  0x94   :  { %3629 = vmatprep.subr.bf16.mxu0 %v5929_v8  ;;  %3693 = vmatprep.subr.bf16.mxu1 %v5931_v38  ;;  %7012 = vst [vmem:[#allocation64_spill] sm:$0xff] %v5940_v63  ;;  %v260_v8 = vld [vmem:[#allocation5 + $0x3e8] sm:$0xff]  ;;  %v5949_v38 = vpack.c.bf16 %v253_v26, %v249_v30  ;;  %v5956_v19 = vpack.c.bf16 %v259_v1, %v255_v59 }
  0x95   :  { %7011 = vst [vmem:[#allocation63_spill] sm:$0xff] %v5936_v56  ;;  %v5951_v28 = vpack.c.bf16 %v260_v8, %v256_v42  ;;  %v272_v8 = vld [vmem:[%s6820_s3] sm:$0xf] }
  0x96   :  { %7015 = vst [vmem:[#allocation67_spill] sm:$0xff] %v5949_v38  ;;  %7018 = vst [vmem:[#allocation70_spill] sm:$0xff] %v5956_v19  ;;  %v5971_v1 = vrot.slane %v272_v8, %v5602_v5 }
  0x97   :  { %3631 = vmatpush1.bf16.msra.mxu0 %v5933_v25  ;;  %3695 = vmatpush1.bf16.msra.mxu1 %v5936_v56  ;;  %7016 = vst [vmem:[#allocation68_spill] sm:$0xff] %v5951_v28  ;;  %v5953_v25 = vpack.c.bf16 %v262_v0, %v258_v11  ;;  %v257_v56 = vld [vmem:[#allocation5 + $0x3d0] sm:$0xff] }
  0x98   :  { %3633 = vmatprep.subr.bf16.mxu0 %v5940_v63  ;;  %3697 = vmatprep.subr.bf16.mxu1 %v5942_v2  ;;  %v5960_v30 = vpack.c.bf16 %v261_v18, %v257_v56  ;;  %7020 = vst [vmem:[#allocation72_spill] sm:$0xff] %v5971_v1  ;;  %v5974_v56 = vrot.slane %v272_v8, %v5598_v3 }
  0x99   :  { %7017 = vst [vmem:[#allocation69_spill] sm:$0xff] %v5953_v25  ;;  %v5983_v3 = vrot.slane %v272_v8, %v5604_v6 }
  0x9a   :  { %7019 = vst [vmem:[#allocation71_spill] sm:$0xff] %v5960_v30  ;;  %7021 = vst [vmem:[#allocation73_spill] sm:$0xff] %v5974_v56 }
  0x9b   :  { %3635 = vmatpush1.bf16.msra.mxu0 %v5945_v37  ;;  %3699 = vmatpush1.bf16.msra.mxu1 %v5949_v38 }
  0x9c   :  { %3637 = vmatprep.subr.bf16.mxu0 %v5951_v28  ;;  %3701 = vmatprep.subr.bf16.mxu1 %v5953_v25 }
  0x9f   :  { %3639 = vmatpush1.bf16.msra.mxu0 %v5956_v19  ;;  %3703 = vmatpush1.bf16.msra.mxu1 %v5960_v30 }
  0xa0   :  { %3705 = vmatprep.subr.bf16.mxu0 %v5619_v21  ;;  %3737 = vmatprep.subr.bf16.mxu1 %v5621_v22  ;;  %v5979_v22 = vrot.slane %v272_v8, %v5600_v4 }
  0xa2   :  { %7022 = vst [vmem:[#allocation74_spill] sm:$0xff] %v5979_v22 }
 0x135   :  { %v659_v26 = vpop.f32.mrb[0].mxu0  ;;  %v730_v11 = vpop.f32.mrb[0].mxu1 }
 0x136   :  { %v5072_v42 = vadd.f32 %v659_v26, %v5971_v1  ;;  %v661_v0 = vpop.f32.mrb[1].mxu0  ;;  %v732_v18 = vpop.f32.mrb[1].mxu1  ;;  %v5088_v26 = vadd.f32 %v730_v11, %v5983_v3 }
 0x137   :  { %v5073_v59 = vadd.f32 %v661_v0, %v5974_v56  ;;  %v5089_v5 = vadd.f32 %v732_v18, %v5979_v22 }
 0x138   :  { %v3411_v21 = vmul.f32 -1.442695, %v5072_v42 }
 0x139   :  { %v3412_v30 = vmul.f32 -1.442695, %v5073_v59  ;;  %v3413_v19 = vmul.f32 -1.442695, %v5089_v5 }
 0x13a   :  { %5147 = vpow2.f32 %v3411_v21 }
 0x13b   :  { %5149 = vpow2.f32 %v3412_v30 }
 0x13c   :  { %5151 = vpow2.f32 %v3413_v19  ;;  %v7026_v19 = vld [vmem:[#allocation21_spill] sm:$0xff] }
 0x13d   :  { %5153 = vtanh.f32 %v5088_v26  ;;  %v7028_v26 = vld [vmem:[#allocation23_spill] sm:$0xff] }
 0x144   :  { %v5148_v1 = vpop.eup %5147 }
 0x145   :  { %v5150_v25 = vpop.eup %5149  ;;  %v742_v28 = vadd.f32 1.0, %v5148_v1 }
 0x146   :  { %v748_v42 = vadd.f32 1.0, %v5150_v25  ;;  %v5152_v0 = vpop.eup %5151  ;;  %v7023_v25 = vmov 0.0  }
 0x147   :  { %5155 = vrcp.f32 %v742_v28  ;;  %v5154_v59 = vpop.eup %5153  ;;  %v755_v18 = vadd.f32 1.0, %v5152_v0  ;;  %v7025_v28 = vld [vmem:[#allocation17_spill] sm:$0xff] }
 0x148   :  { %5157 = vrcp.f32 %v748_v42  ;;  %v7029_v42 = vld [vmem:[#allocation24_spill] sm:$0xff]  ;;  %v7030_v0 = vld [vmem:[#allocation25_spill] sm:$0xff] }
 0x149   :  { %5159 = vrcp.f32 %v755_v18  ;;  %v7034_v18 = vld [vmem:[#allocation29_spill] sm:$0xff] }
 0x151   :  { %v5156_v21 = vpop.eup %5155 }
 0x152   :  { %v5158_v30 = vpop.eup %5157  ;;  %v759_v56 = vmul.f32 %v5156_v21, %v5154_v59  ;;  %v7031_v59 = vld [vmem:[#allocation26_spill] sm:$0xff]  ;;  %v7032_v21 = vld [vmem:[#allocation27_spill] sm:$0xff] }
 0x153   :  { %v758_v22 = vmul.f32 0.0, %v5158_v30  ;;  %v5160_v5 = vpop.eup %5159  ;;  %v7033_v30 = vld [vmem:[#allocation28_spill] sm:$0xff] }
 0x155   :  { %v5986_v8 = vadd.f32 %v759_v56, %v758_v22  ;;  %v7024_v22 = vld [vmem:[#allocation16_spill] sm:$0xff]  ;;  %v7027_v56 = vld [vmem:[#allocation22_spill] sm:$0xff] }
 0x157   :  { %5161 = vtanh.f32 %v5986_v8 }
 0x161   :  { %v5162_v11 = vpop.eup %5161 }
 0x162   :  { %v762_v1 = vmul.f32 %v5162_v11, %v5160_v5  ;;  %v7035_v5 = vld [vmem:[#allocation30_spill] sm:$0xff]  ;;  %v7036_v11 = vld [vmem:[#allocation31_spill] sm:$0xff] }
 0x164   :  { %828 = vmatmul.mubr.f32.vlgmr.msra.gmra.mrb[16].mxu0 %v762_v1  ;;  %899 = vmatmul.mubr.f32.vlgmr.msra.gmra.mrb[16].mxu1 %v762_v1 }
 0x165   :  { %3707 = vmatpush1.bf16.msra.mxu0 %v5623_v23  ;;  %3739 = vmatpush1.bf16.msra.mxu1 %v5630_v27 }
 0x166   :  { %3709 = vmatprep.subr.bf16.mxu0 %v5634_v31  ;;  %3741 = vmatprep.subr.bf16.mxu1 %v5638_v35 }
 0x167   :  { %993 = vmatprep.mubr.f32.mxu0 %v7023_v25  ;;  %1064 = vmatprep.mubr.f32.mxu1 %v7023_v25 }
 0x169   :  { %3711 = vmatpush1.bf16.msra.mxu0 %v5640_v36  ;;  %3743 = vmatpush1.bf16.msra.mxu1 %v5644_v39 }
 0x16a   :  { %3713 = vmatprep.subr.bf16.mxu0 %v5653_v47  ;;  %3745 = vmatprep.subr.bf16.mxu1 %v5657_v48 }
 0x16d   :  { %3715 = vmatpush1.bf16.msra.mxu0 %v5659_v49  ;;  %3747 = vmatpush1.bf16.msra.mxu1 %v5663_v53 }
 0x16e   :  { %3717 = vmatprep.subr.bf16.mxu0 %v5672_v60  ;;  %3749 = vmatprep.subr.bf16.mxu1 %v5676_v61 }
 0x171   :  { %3719 = vmatpush1.bf16.msra.mxu0 %v5678_v62  ;;  %3751 = vmatpush1.bf16.msra.mxu1 %v5682_v7 }
 0x172   :  { %3721 = vmatprep.subr.bf16.mxu0 %v5691_v14  ;;  %3753 = vmatprep.subr.bf16.mxu1 %v5695_v15 }
 0x175   :  { %3723 = vmatpush1.bf16.msra.mxu0 %v5697_v16  ;;  %3755 = vmatpush1.bf16.msra.mxu1 %v5701_v20 }
 0x176   :  { %3725 = vmatprep.subr.bf16.mxu0 %v5710_v32  ;;  %3757 = vmatprep.subr.bf16.mxu1 %v5714_v33 }
 0x179   :  { %3727 = vmatpush1.bf16.msra.mxu0 %v5716_v34  ;;  %3759 = vmatpush1.bf16.msra.mxu1 %v5720_v41 }
 0x17a   :  { %3729 = vmatprep.subr.bf16.mxu0 %v5729_v51  ;;  %3761 = vmatprep.subr.bf16.mxu1 %v5733_v52 }
 0x17d   :  { %3731 = vmatpush1.bf16.msra.mxu0 %v5735_v54  ;;  %3763 = vmatpush1.bf16.msra.mxu1 %v5739_v58 }
 0x17e   :  { %3733 = vmatprep.subr.bf16.mxu0 %v5748_v10  ;;  %3765 = vmatprep.subr.bf16.mxu1 %v5752_v13 }
 0x181   :  { %3735 = vmatpush1.bf16.msra.mxu0 %v5754_v17  ;;  %3767 = vmatpush1.bf16.msra.mxu1 %v5758_v24 }
 0x182   :  { %3769 = vmatprep.subr.bf16.mxu0 %v5762_v29  ;;  %3833 = vmatprep.subr.bf16.mxu1 %v5766_v40 }
 0x184   :  { %994 = vmatmul.mubr.f32.vlgmr.msra.gmra.mrb[2].mxu0 %v762_v1  ;;  %1065 = vmatmul.mubr.f32.vlgmr.msra.gmra.mrb[2].mxu1 %v762_v1  ;;  %v7037_v1 = vld [vmem:[#allocation32_spill] sm:$0xff] }
 0x185   :  { %3771 = vmatpush1.bf16.msra.mxu0 %v5770_v44  ;;  %3835 = vmatpush1.bf16.msra.mxu1 %v5774_v45 }
 0x186   :  { %3773 = vmatprep.subr.bf16.mxu0 %v5776_v46  ;;  %3837 = vmatprep.subr.bf16.mxu1 %v5780_v57 }
 0x189   :  { %3775 = vmatpush1.bf16.msra.mxu0 %v5786_v9  ;;  %3839 = vmatpush1.bf16.msra.mxu1 %v7024_v22 }
 0x18a   :  { %3777 = vmatprep.subr.bf16.mxu0 %v5792_v12  ;;  %3841 = vmatprep.subr.bf16.mxu1 %v7025_v28 }
 0x18d   :  { %3779 = vmatpush1.bf16.msra.mxu0 %v5800_v43  ;;  %3843 = vmatpush1.bf16.msra.mxu1 %v5804_v50 }
 0x18e   :  { %3781 = vmatprep.subr.bf16.mxu0 %v5806_v55  ;;  %3845 = vmatprep.subr.bf16.mxu1 %v7026_v19 }
 0x191   :  { %3783 = vmatpush1.bf16.msra.mxu0 %v7027_v56  ;;  %3847 = vmatpush1.bf16.msra.mxu1 %v7028_v26  ;;  %v7038_v56 = vld [vmem:[#allocation33_spill] sm:$0xff]  ;;  %v7039_v26 = vld [vmem:[#allocation34_spill] sm:$0xff] }
 0x192   :  { %3785 = vmatprep.subr.bf16.mxu0 %v7029_v42  ;;  %3849 = vmatprep.subr.bf16.mxu1 %v7030_v0  ;;  %v7040_v42 = vld [vmem:[#allocation35_spill] sm:$0xff]  ;;  %v7041_v0 = vld [vmem:[#allocation36_spill] sm:$0xff] }
 0x195   :  { %3787 = vmatpush1.bf16.msra.mxu0 %v7031_v59  ;;  %3851 = vmatpush1.bf16.msra.mxu1 %v7032_v21  ;;  %v7042_v59 = vld [vmem:[#allocation37_spill] sm:$0xff]  ;;  %v7043_v21 = vld [vmem:[#allocation38_spill] sm:$0xff] }
 0x196   :  { %3789 = vmatprep.subr.bf16.mxu0 %v7033_v30  ;;  %3853 = vmatprep.subr.bf16.mxu1 %v7034_v18  ;;  %v7044_v30 = vld [vmem:[#allocation39_spill] sm:$0xff]  ;;  %v7045_v18 = vld [vmem:[#allocation40_spill] sm:$0xff] }
 0x199   :  { %3791 = vmatpush1.bf16.msra.mxu0 %v7035_v5  ;;  %3855 = vmatpush1.bf16.msra.mxu1 %v7036_v11  ;;  %v7046_v5 = vld [vmem:[#allocation41_spill] sm:$0xff]  ;;  %v7047_v11 = vld [vmem:[#allocation42_spill] sm:$0xff] }
 0x19a   :  { %3793 = vmatprep.subr.bf16.mxu0 %v7037_v1  ;;  %3857 = vmatprep.subr.bf16.mxu1 %v7038_v56  ;;  %v7048_v1 = vld [vmem:[#allocation43_spill] sm:$0xff]  ;;  %v7049_v56 = vld [vmem:[#allocation44_spill] sm:$0xff] }
 0x19d   :  { %3795 = vmatpush1.bf16.msra.mxu0 %v7039_v26  ;;  %3859 = vmatpush1.bf16.msra.mxu1 %v7040_v42  ;;  %v7050_v26 = vld [vmem:[#allocation45_spill] sm:$0xff]  ;;  %v7051_v42 = vld [vmem:[#allocation46_spill] sm:$0xff] }
 0x19e   :  { %3797 = vmatprep.subr.bf16.mxu0 %v7041_v0  ;;  %3861 = vmatprep.subr.bf16.mxu1 %v7042_v59  ;;  %v7052_v0 = vld [vmem:[#allocation47_spill] sm:$0xff]  ;;  %v7053_v59 = vld [vmem:[#allocation48_spill] sm:$0xff] }
 0x1a1   :  { %3799 = vmatpush1.bf16.msra.mxu0 %v7043_v21  ;;  %3863 = vmatpush1.bf16.msra.mxu1 %v7044_v30  ;;  %v7054_v21 = vld [vmem:[#allocation49_spill] sm:$0xff]  ;;  %v7055_v30 = vld [vmem:[#allocation50_spill] sm:$0xff] }
 0x1a2   :  { %3801 = vmatprep.subr.bf16.mxu0 %v7045_v18  ;;  %3865 = vmatprep.subr.bf16.mxu1 %v7046_v5  ;;  %v7056_v18 = vld [vmem:[#allocation51_spill] sm:$0xff]  ;;  %v7057_v5 = vld [vmem:[#allocation52_spill] sm:$0xff] }
 0x1a5   :  { %3803 = vmatpush1.bf16.msra.mxu0 %v7047_v11  ;;  %3867 = vmatpush1.bf16.msra.mxu1 %v7048_v1  ;;  %v7058_v11 = vld [vmem:[#allocation53_spill] sm:$0xff]  ;;  %v7059_v1 = vld [vmem:[#allocation54_spill] sm:$0xff] }
 0x1a6   :  { %3805 = vmatprep.subr.bf16.mxu0 %v7049_v56  ;;  %3869 = vmatprep.subr.bf16.mxu1 %v7050_v26  ;;  %v7060_v56 = vld [vmem:[#allocation55_spill] sm:$0xff]  ;;  %v7061_v26 = vld [vmem:[#allocation56_spill] sm:$0xff] }
 0x1a9   :  { %3807 = vmatpush1.bf16.msra.mxu0 %v7051_v42  ;;  %3871 = vmatpush1.bf16.msra.mxu1 %v7052_v0  ;;  %v7062_v42 = vld [vmem:[#allocation57_spill] sm:$0xff]  ;;  %v7063_v0 = vld [vmem:[#allocation58_spill] sm:$0xff] }
 0x1aa   :  { %3809 = vmatprep.subr.bf16.mxu0 %v7053_v59  ;;  %3873 = vmatprep.subr.bf16.mxu1 %v7054_v21  ;;  %v7064_v59 = vld [vmem:[#allocation59_spill] sm:$0xff]  ;;  %v7065_v21 = vld [vmem:[#allocation60_spill] sm:$0xff] }
 0x1ad   :  { %3811 = vmatpush1.bf16.msra.mxu0 %v7055_v30  ;;  %3875 = vmatpush1.bf16.msra.mxu1 %v7056_v18  ;;  %v7066_v30 = vld [vmem:[#allocation61_spill] sm:$0xff]  ;;  %v7067_v18 = vld [vmem:[#allocation62_spill] sm:$0xff] }
 0x1ae   :  { %3813 = vmatprep.subr.bf16.mxu0 %v7057_v5  ;;  %3877 = vmatprep.subr.bf16.mxu1 %v7058_v11  ;;  %v7068_v5 = vld [vmem:[#allocation63_spill] sm:$0xff] }
 0x1b1   :  { %3815 = vmatpush1.bf16.msra.mxu0 %v7059_v1  ;;  %3879 = vmatpush1.bf16.msra.mxu1 %v7060_v56 }
 0x1b2   :  { %3817 = vmatprep.subr.bf16.mxu0 %v7061_v26  ;;  %3881 = vmatprep.subr.bf16.mxu1 %v7062_v42  ;;  %v7069_v42 = vld [vmem:[#allocation68_spill] sm:$0xff] }
 0x1b5   :  { %3819 = vmatpush1.bf16.msra.mxu0 %v7063_v0  ;;  %3883 = vmatpush1.bf16.msra.mxu1 %v7064_v59  ;;  %v7070_v0 = vld [vmem:[#allocation69_spill] sm:$0xff]  ;;  %v7071_v59 = vld [vmem:[#allocation70_spill] sm:$0xff] }
 0x1b6   :  { %3821 = vmatprep.subr.bf16.mxu0 %v7065_v21  ;;  %3885 = vmatprep.subr.bf16.mxu1 %v7066_v30  ;;  %v7072_v21 = vld [vmem:[#allocation71_spill] sm:$0xff]  ;;  %v7073_v30 = vld [vmem:[#allocation14_spill] sm:$0xff] }
 0x1b9   :  { %3823 = vmatpush1.bf16.msra.mxu0 %v7067_v18  ;;  %3887 = vmatpush1.bf16.msra.mxu1 %v7068_v5  ;;  %v7074_v18 = vld [vmem:[#allocation15_spill] sm:$0xff] }
 0x1ba   :  { %3825 = vmatprep.subr.bf16.mxu0 %v5940_v63  ;;  %3889 = vmatprep.subr.bf16.mxu1 %v5942_v2  ;;  %v571_v2 = vld [vmem:[%s6822_s5] sm:$0xf]  ;;  %v7075_v63 = vld [vmem:[#allocation13_spill] sm:$0xff] }
 0x1bd   :  { %3827 = vmatpush1.bf16.msra.mxu0 %v5945_v37  ;;  %3891 = vmatpush1.bf16.msra.mxu1 %v5949_v38  ;;  %v6091_v37 = vrot.slane %v571_v2, %v7075_v63  ;;  %v7077_v38 = vld [vmem:[#allocation12_spill] sm:$0xff] }
 0x1be   :  { %3829 = vmatprep.subr.bf16.mxu0 %v7069_v42  ;;  %3893 = vmatprep.subr.bf16.mxu1 %v7070_v0  ;;  %v6094_v5 = vrot.slane %v571_v2, %v7077_v38  ;;  %v6103_v38 = vrot.slane %v571_v2, %v5604_v6 }
 0x1bf   :  { %7076 = vst [vmem:[#allocation16_spill] sm:$0xff] %v6091_v37 }
 0x1c0   :  { %7078 = vst [vmem:[#allocation17_spill] sm:$0xff] %v6094_v5  ;;  %7080 = vst [vmem:[#allocation12_spill] sm:$0xff] %v6103_v38 }
 0x1c1   :  { %3831 = vmatpush1.bf16.msra.mxu0 %v7071_v59  ;;  %3895 = vmatpush1.bf16.msra.mxu1 %v7072_v21 }
 0x1c2   :  { %3897 = vmatprep.subr.bf16.mxu0 %v7073_v30  ;;  %3929 = vmatprep.subr.bf16.mxu1 %v7074_v18  ;;  %v6099_v18 = vrot.slane %v571_v2, %v5600_v4 }
 0x1c4   :  { %7079 = vst [vmem:[#allocation13_spill] sm:$0xff] %v6099_v18 }
 0x237   :  { %v829_v42 = vpop.f32.mrb[16].mxu0  ;;  %v900_v0 = vpop.f32.mrb[16].mxu1 }
 0x238   :  { %v830_v59 = vadd.f32 %v829_v42, %v6091_v37  ;;  %v831_v26 = vpop.f32.mrb[17].mxu0  ;;  %v902_v21 = vpop.f32.mrb[17].mxu1  ;;  %v901_v19 = vadd.f32 %v900_v0, %v6103_v38  ;;  %v7081_v0 = vld [vmem:[#allocation72_spill] sm:$0xff] }
 0x239   :  { %v832_v30 = vadd.f32 %v831_v26, %v6094_v5  ;;  %v903_v63 = vadd.f32 %v902_v21, %v6099_v18 }
 0x23a   :  { %v3414_v56 = vmul.f32 -1.442695, %v830_v59 }
 0x23b   :  { %v3415_v1 = vmul.f32 -1.442695, %v832_v30  ;;  %v3416_v11 = vmul.f32 -1.442695, %v903_v63 }
 0x23c   :  { %5163 = vpow2.f32 %v3414_v56 }
 0x23d   :  { %5165 = vpow2.f32 %v3415_v1 }
 0x23e   :  { %5167 = vpow2.f32 %v3416_v11 }
 0x23f   :  { %5169 = vtanh.f32 %v901_v19 }
 0x246   :  { %v5164_v42 = vpop.eup %5163 }
 0x247   :  { %v5166_v37 = vpop.eup %5165  ;;  %v908_v55 = vadd.f32 1.0, %v5164_v42 }
 0x248   :  { %v914_v26 = vadd.f32 1.0, %v5166_v37  ;;  %v5168_v4 = vpop.eup %5167 }
 0x249   :  { %5171 = vrcp.f32 %v908_v55  ;;  %v5170_v59 = vpop.eup %5169  ;;  %v921_v21 = vadd.f32 1.0, %v5168_v4  ;;  %v7082_v55 = vld [vmem:[#allocation73_spill] sm:$0xff] }
 0x24a   :  { %5173 = vrcp.f32 %v914_v26 }
 0x24b   :  { %5175 = vrcp.f32 %v921_v21 }
 0x253   :  { %v5172_v56 = vpop.eup %5171 }
 0x254   :  { %v5174_v30 = vpop.eup %5173  ;;  %v925_v1 = vmul.f32 %v5172_v56, %v5170_v59  ;;  %v7083_v59 = vld [vmem:[#allocation74_spill] sm:$0xff] }
 0x255   :  { %v924_v18 = vmul.f32 0.0, %v5174_v30  ;;  %v5176_v56 = vpop.eup %5175 }
 0x257   :  { %v6106_v6 = vadd.f32 %v925_v1, %v924_v18  ;;  %v995_v2 = vpop.f32.mrb[2].mxu0  ;;  %v1066_v63 = vpop.f32.mrb[2].mxu1 }
 0x258   :  { %v5074_v38 = vadd.f32 %v995_v2, %v7081_v0  ;;  %v997_v42 = vpop.f32.mrb[3].mxu0  ;;  %v1068_v11 = vpop.f32.mrb[3].mxu1  ;;  %v5090_v1 = vadd.f32 %v1066_v63, %v5983_v3 }
 0x259   :  { %5177 = vtanh.f32 %v6106_v6  ;;  %v5075_v37 = vadd.f32 %v997_v42, %v7082_v55  ;;  %v5091_v4 = vadd.f32 %v1068_v11, %v7083_v59 }
 0x25a   :  { %v3417_v19 = vmul.f32 -1.442695, %v5074_v38 }
 0x25b   :  { %v3418_v26 = vmul.f32 -1.442695, %v5075_v37  ;;  %v3419_v30 = vmul.f32 -1.442695, %v5091_v4 }
 0x25c   :  { %5179 = vpow2.f32 %v3417_v19 }
 0x25d   :  { %5181 = vpow2.f32 %v3418_v26 }
 0x25e   :  { %5183 = vpow2.f32 %v3419_v30  ;;  %v7087_v30 = vld [vmem:[#allocation23_spill] sm:$0xff] }
 0x25f   :  { %5185 = vtanh.f32 %v5090_v1  ;;  %v7088_v1 = vld [vmem:[#allocation24_spill] sm:$0xff] }
 0x263   :  { %v5178_v18 = vpop.eup %5177 }
 0x264   :  { %v928_v21 = vmul.f32 %v5178_v18, %v5176_v56 }
 0x266   :  { %v5180_v5 = vpop.eup %5179  ;;  %1163 = vmatprep.mubr.f32.mxu0 %v928_v21  ;;  %1234 = vmatprep.mubr.f32.mxu1 %v928_v21  ;;  %v7089_v21 = vld [vmem:[#allocation25_spill] sm:$0xff] }
 0x267   :  { %v5182_v2 = vpop.eup %5181  ;;  %v1078_v0 = vadd.f32 1.0, %v5180_v5 }
 0x268   :  { %v1084_v42 = vadd.f32 1.0, %v5182_v2  ;;  %v5184_v38 = vpop.eup %5183  ;;  %v7090_v2 = vld [vmem:[#allocation26_spill] sm:$0xff] }
 0x269   :  { %5187 = vrcp.f32 %v1078_v0  ;;  %v5186_v37 = vpop.eup %5185  ;;  %v1091_v59 = vadd.f32 1.0, %v5184_v38  ;;  %v7085_v0 = vld [vmem:[#allocation21_spill] sm:$0xff]  ;;  %v7092_v38 = vld [vmem:[#allocation28_spill] sm:$0xff] }
 0x26a   :  { %5189 = vrcp.f32 %v1084_v42  ;;  %v7091_v42 = vld [vmem:[#allocation27_spill] sm:$0xff] }
 0x26b   :  { %5191 = vrcp.f32 %v1091_v59  ;;  %v7086_v59 = vld [vmem:[#allocation22_spill] sm:$0xff] }
 0x273   :  { %v5188_v19 = vpop.eup %5187 }
 0x274   :  { %v5190_v11 = vpop.eup %5189  ;;  %v1095_v26 = vmul.f32 %v5188_v19, %v5186_v37  ;;  %v7093_v37 = vld [vmem:[#allocation29_spill] sm:$0xff]  ;;  %v7094_v19 = vld [vmem:[#allocation30_spill] sm:$0xff] }
 0x275   :  { %v1094_v4 = vmul.f32 %v5190_v11, %v5986_v8  ;;  %v5192_v56 = vpop.eup %5191  ;;  %v7084_v8 = vld [vmem:[#allocation20_spill] sm:$0xff]  ;;  %v7095_v11 = vld [vmem:[#allocation31_spill] sm:$0xff] }
 0x277   :  { %v6114_v63 = vadd.f32 %v1095_v26, %v1094_v4  ;;  %v7096_v26 = vld [vmem:[#allocation32_spill] sm:$0xff]  ;;  %v7097_v4 = vld [vmem:[#allocation33_spill] sm:$0xff] }
 0x279   :  { %5193 = vtanh.f32 %v6114_v63 }
 0x283   :  { %v5194_v5 = vpop.eup %5193 }
 0x284   :  { %v1098_v18 = vmul.f32 %v5194_v5, %v5192_v56  ;;  %v7098_v56 = vld [vmem:[#allocation34_spill] sm:$0xff]  ;;  %v7099_v5 = vld [vmem:[#allocation35_spill] sm:$0xff] }
 0x286   :  { %1164 = vmatmul.mubr.f32.vlgmr.msra.gmra.mrb[18].mxu0 %v1098_v18  ;;  %1235 = vmatmul.mubr.f32.vlgmr.msra.gmra.mrb[18].mxu1 %v1098_v18 }
 0x287   :  { %3899 = vmatpush1.bf16.msra.mxu0 %v5623_v23  ;;  %3931 = vmatpush1.bf16.msra.mxu1 %v5630_v27 }
 0x288   :  { %3901 = vmatprep.subr.bf16.mxu0 %v5634_v31  ;;  %3933 = vmatprep.subr.bf16.mxu1 %v5638_v35 }
 0x289   :  { %1329 = vmatprep.mubr.f32.mxu0 %v7023_v25  ;;  %1400 = vmatprep.mubr.f32.mxu1 %v7023_v25 }
 0x28b   :  { %3903 = vmatpush1.bf16.msra.mxu0 %v5640_v36  ;;  %3935 = vmatpush1.bf16.msra.mxu1 %v5644_v39 }
 0x28c   :  { %3905 = vmatprep.subr.bf16.mxu0 %v5653_v47  ;;  %3937 = vmatprep.subr.bf16.mxu1 %v5657_v48 }
 0x28f   :  { %3907 = vmatpush1.bf16.msra.mxu0 %v5659_v49  ;;  %3939 = vmatpush1.bf16.msra.mxu1 %v5663_v53 }
 0x290   :  { %3909 = vmatprep.subr.bf16.mxu0 %v5672_v60  ;;  %3941 = vmatprep.subr.bf16.mxu1 %v5676_v61 }
 0x293   :  { %3911 = vmatpush1.bf16.msra.mxu0 %v5678_v62  ;;  %3943 = vmatpush1.bf16.msra.mxu1 %v5682_v7 }
 0x294   :  { %3913 = vmatprep.subr.bf16.mxu0 %v5691_v14  ;;  %3945 = vmatprep.subr.bf16.mxu1 %v5695_v15 }
 0x297   :  { %3915 = vmatpush1.bf16.msra.mxu0 %v5697_v16  ;;  %3947 = vmatpush1.bf16.msra.mxu1 %v5701_v20 }
 0x298   :  { %3917 = vmatprep.subr.bf16.mxu0 %v5710_v32  ;;  %3949 = vmatprep.subr.bf16.mxu1 %v5714_v33 }
 0x29b   :  { %3919 = vmatpush1.bf16.msra.mxu0 %v5716_v34  ;;  %3951 = vmatpush1.bf16.msra.mxu1 %v5720_v41 }
 0x29c   :  { %3921 = vmatprep.subr.bf16.mxu0 %v5729_v51  ;;  %3953 = vmatprep.subr.bf16.mxu1 %v5733_v52 }
 0x29f   :  { %3923 = vmatpush1.bf16.msra.mxu0 %v5735_v54  ;;  %3955 = vmatpush1.bf16.msra.mxu1 %v5739_v58 }
 0x2a0   :  { %3925 = vmatprep.subr.bf16.mxu0 %v5748_v10  ;;  %3957 = vmatprep.subr.bf16.mxu1 %v5752_v13 }
 0x2a3   :  { %3927 = vmatpush1.bf16.msra.mxu0 %v5754_v17  ;;  %3959 = vmatpush1.bf16.msra.mxu1 %v5758_v24 }
 0x2a4   :  { %3961 = vmatprep.subr.bf16.mxu0 %v5762_v29  ;;  %4025 = vmatprep.subr.bf16.mxu1 %v5766_v40 }
 0x2a6   :  { %1330 = vmatmul.mubr.f32.vlgmr.msra.gmra.mrb[4].mxu0 %v1098_v18  ;;  %1401 = vmatmul.mubr.f32.vlgmr.msra.gmra.mrb[4].mxu1 %v1098_v18  ;;  %v7100_v18 = vld [vmem:[#allocation36_spill] sm:$0xff] }
 0x2a7   :  { %3963 = vmatpush1.bf16.msra.mxu0 %v5770_v44  ;;  %4027 = vmatpush1.bf16.msra.mxu1 %v5774_v45 }
 0x2a8   :  { %3965 = vmatprep.subr.bf16.mxu0 %v5776_v46  ;;  %4029 = vmatprep.subr.bf16.mxu1 %v5780_v57 }
 0x2ab   :  { %3967 = vmatpush1.bf16.msra.mxu0 %v5786_v9  ;;  %4031 = vmatpush1.bf16.msra.mxu1 %v7024_v22 }
 0x2ac   :  { %3969 = vmatprep.subr.bf16.mxu0 %v5792_v12  ;;  %4033 = vmatprep.subr.bf16.mxu1 %v7025_v28 }
 0x2af   :  { %3971 = vmatpush1.bf16.msra.mxu0 %v5800_v43  ;;  %4035 = vmatpush1.bf16.msra.mxu1 %v5804_v50 }
 0x2b0   :  { %3973 = vmatprep.subr.bf16.mxu0 %v7084_v8  ;;  %4037 = vmatprep.subr.bf16.mxu1 %v7085_v0 }
 0x2b3   :  { %3975 = vmatpush1.bf16.msra.mxu0 %v7086_v59  ;;  %4039 = vmatpush1.bf16.msra.mxu1 %v7087_v30  ;;  %v7139_v30 = vld [vmem:[#allocation17_spill] sm:$0xff] }
 0x2b4   :  { %3977 = vmatprep.subr.bf16.mxu0 %v7088_v1  ;;  %4041 = vmatprep.subr.bf16.mxu1 %v7089_v21  ;;  %v7138_v21 = vld [vmem:[#allocation16_spill] sm:$0xff] }
 0x2b7   :  { %3979 = vmatpush1.bf16.msra.mxu0 %v7090_v2  ;;  %4043 = vmatpush1.bf16.msra.mxu1 %v7091_v42  ;;  %v7101_v2 = vld [vmem:[#allocation37_spill] sm:$0xff]  ;;  %v7102_v42 = vld [vmem:[#allocation38_spill] sm:$0xff] }
 0x2b8   :  { %3981 = vmatprep.subr.bf16.mxu0 %v7092_v38  ;;  %4045 = vmatprep.subr.bf16.mxu1 %v7093_v37  ;;  %v7103_v38 = vld [vmem:[#allocation39_spill] sm:$0xff]  ;;  %v7104_v37 = vld [vmem:[#allocation40_spill] sm:$0xff] }
 0x2bb   :  { %3983 = vmatpush1.bf16.msra.mxu0 %v7094_v19  ;;  %4047 = vmatpush1.bf16.msra.mxu1 %v7095_v11  ;;  %v7105_v19 = vld [vmem:[#allocation41_spill] sm:$0xff]  ;;  %v7106_v11 = vld [vmem:[#allocation42_spill] sm:$0xff] }
 0x2bc   :  { %3985 = vmatprep.subr.bf16.mxu0 %v7096_v26  ;;  %4049 = vmatprep.subr.bf16.mxu1 %v7097_v4  ;;  %v7107_v26 = vld [vmem:[#allocation43_spill] sm:$0xff]  ;;  %v7108_v4 = vld [vmem:[#allocation44_spill] sm:$0xff] }
 0x2bf   :  { %3987 = vmatpush1.bf16.msra.mxu0 %v7098_v56  ;;  %4051 = vmatpush1.bf16.msra.mxu1 %v7099_v5  ;;  %v7109_v56 = vld [vmem:[#allocation45_spill] sm:$0xff]  ;;  %v7110_v5 = vld [vmem:[#allocation46_spill] sm:$0xff] }
 0x2c0   :  { %3989 = vmatprep.subr.bf16.mxu0 %v7100_v18  ;;  %4053 = vmatprep.subr.bf16.mxu1 %v7101_v2  ;;  %v7111_v18 = vld [vmem:[#allocation47_spill] sm:$0xff]  ;;  %v7112_v2 = vld [vmem:[#allocation48_spill] sm:$0xff] }
 0x2c3   :  { %3991 = vmatpush1.bf16.msra.mxu0 %v7102_v42  ;;  %4055 = vmatpush1.bf16.msra.mxu1 %v7103_v38  ;;  %v7113_v42 = vld [vmem:[#allocation49_spill] sm:$0xff]  ;;  %v7114_v38 = vld [vmem:[#allocation50_spill] sm:$0xff] }
 0x2c4   :  { %3993 = vmatprep.subr.bf16.mxu0 %v7104_v37  ;;  %4057 = vmatprep.subr.bf16.mxu1 %v7105_v19  ;;  %v7115_v37 = vld [vmem:[#allocation51_spill] sm:$0xff]  ;;  %v7116_v19 = vld [vmem:[#allocation52_spill] sm:$0xff] }
 0x2c7   :  { %3995 = vmatpush1.bf16.msra.mxu0 %v7106_v11  ;;  %4059 = vmatpush1.bf16.msra.mxu1 %v7107_v26  ;;  %v7117_v11 = vld [vmem:[#allocation53_spill] sm:$0xff]  ;;  %v7118_v26 = vld [vmem:[#allocation54_spill] sm:$0xff] }
 0x2c8   :  { %3997 = vmatprep.subr.bf16.mxu0 %v7108_v4  ;;  %4061 = vmatprep.subr.bf16.mxu1 %v7109_v56  ;;  %v7119_v4 = vld [vmem:[#allocation55_spill] sm:$0xff]  ;;  %v7120_v56 = vld [vmem:[#allocation56_spill] sm:$0xff] }
 0x2cb   :  { %3999 = vmatpush1.bf16.msra.mxu0 %v7110_v5  ;;  %4063 = vmatpush1.bf16.msra.mxu1 %v7111_v18  ;;  %v7121_v5 = vld [vmem:[#allocation57_spill] sm:$0xff]  ;;  %v7122_v18 = vld [vmem:[#allocation58_spill] sm:$0xff] }
 0x2cc   :  { %4001 = vmatprep.subr.bf16.mxu0 %v7112_v2  ;;  %4065 = vmatprep.subr.bf16.mxu1 %v7113_v42  ;;  %v7123_v2 = vld [vmem:[#allocation59_spill] sm:$0xff]  ;;  %v7124_v42 = vld [vmem:[#allocation60_spill] sm:$0xff] }
 0x2cf   :  { %4003 = vmatpush1.bf16.msra.mxu0 %v7114_v38  ;;  %4067 = vmatpush1.bf16.msra.mxu1 %v7115_v37  ;;  %v7125_v38 = vld [vmem:[#allocation61_spill] sm:$0xff]  ;;  %v7126_v37 = vld [vmem:[#allocation62_spill] sm:$0xff] }
 0x2d0   :  { %4005 = vmatprep.subr.bf16.mxu0 %v7116_v19  ;;  %4069 = vmatprep.subr.bf16.mxu1 %v7117_v11  ;;  %v7127_v19 = vld [vmem:[#allocation63_spill] sm:$0xff]  ;;  %v7128_v11 = vld [vmem:[#allocation64_spill] sm:$0xff] }
 0x2d3   :  { %4007 = vmatpush1.bf16.msra.mxu0 %v7118_v26  ;;  %4071 = vmatpush1.bf16.msra.mxu1 %v7119_v4  ;;  %v7129_v26 = vld [vmem:[#allocation65_spill] sm:$0xff]  ;;  %v7130_v4 = vld [vmem:[#allocation66_spill] sm:$0xff] }
 0x2d4   :  { %4009 = vmatprep.subr.bf16.mxu0 %v7120_v56  ;;  %4073 = vmatprep.subr.bf16.mxu1 %v7121_v5  ;;  %v7131_v56 = vld [vmem:[#allocation67_spill] sm:$0xff]  ;;  %v7132_v5 = vld [vmem:[#allocation68_spill] sm:$0xff] }
 0x2d7   :  { %4011 = vmatpush1.bf16.msra.mxu0 %v7122_v18  ;;  %4075 = vmatpush1.bf16.msra.mxu1 %v7123_v2  ;;  %v7133_v18 = vld [vmem:[#allocation69_spill] sm:$0xff]  ;;  %v7134_v2 = vld [vmem:[#allocation70_spill] sm:$0xff] }
 0x2d8   :  { %4013 = vmatprep.subr.bf16.mxu0 %v7124_v42  ;;  %4077 = vmatprep.subr.bf16.mxu1 %v7125_v38  ;;  %v7135_v42 = vld [vmem:[#allocation71_spill] sm:$0xff]  ;;  %v7136_v38 = vld [vmem:[#allocation14_spill] sm:$0xff] }
 0x2db   :  { %4015 = vmatpush1.bf16.msra.mxu0 %v7126_v37  ;;  %4079 = vmatpush1.bf16.msra.mxu1 %v7127_v19  ;;  %v7137_v37 = vld [vmem:[#allocation15_spill] sm:$0xff] }
 0x2dc   :  { %4017 = vmatprep.subr.bf16.mxu0 %v7128_v11  ;;  %4081 = vmatprep.subr.bf16.mxu1 %v7129_v26 }
 0x2df   :  { %4019 = vmatpush1.bf16.msra.mxu0 %v7130_v4  ;;  %4083 = vmatpush1.bf16.msra.mxu1 %v7131_v56 }
 0x2e0   :  { %4021 = vmatprep.subr.bf16.mxu0 %v7132_v5  ;;  %4085 = vmatprep.subr.bf16.mxu1 %v7133_v18  ;;  %v7140_v18 = vld [vmem:[#allocation13_spill] sm:$0xff] }
 0x2e3   :  { %4023 = vmatpush1.bf16.msra.mxu0 %v7134_v2  ;;  %4087 = vmatpush1.bf16.msra.mxu1 %v7135_v42  ;;  %v7141_v42 = vld [vmem:[#allocation12_spill] sm:$0xff] }
 0x2e4   :  { %4089 = vmatprep.subr.bf16.mxu0 %v7136_v38  ;;  %4121 = vmatprep.subr.bf16.mxu1 %v7137_v37 }
 0x359   :  { %v1165_v19 = vpop.f32.mrb[18].mxu0  ;;  %v1236_v11 = vpop.f32.mrb[18].mxu1 }
 0x35a   :  { %v1166_v26 = vadd.f32 %v1165_v19, %v7138_v21  ;;  %v1167_v1 = vpop.f32.mrb[19].mxu0  ;;  %v1238_v4 = vpop.f32.mrb[19].mxu1  ;;  %v1237_v8 = vadd.f32 %v1236_v11, %v7141_v42  ;;  %v7142_v11 = vld [vmem:[#allocation72_spill] sm:$0xff] }
 0x35b   :  { %v1168_v56 = vadd.f32 %v1167_v1, %v7139_v30  ;;  %v1239_v2 = vadd.f32 %v1238_v4, %v7140_v18 }
 0x35c   :  { %v3420_v59 = vmul.f32 -1.442695, %v1166_v26 }
 0x35d   :  { %v3421_v5 = vmul.f32 -1.442695, %v1168_v56  ;;  %v3422_v0 = vmul.f32 -1.442695, %v1239_v2 }
 0x35e   :  { %5195 = vpow2.f32 %v3420_v59 }
 0x35f   :  { %5197 = vpow2.f32 %v3421_v5 }
 0x360   :  { %5199 = vpow2.f32 %v3422_v0 }
 0x361   :  { %5201 = vtanh.f32 %v1237_v8 }
 0x368   :  { %v5196_v38 = vpop.eup %5195 }
 0x369   :  { %v5198_v50 = vpop.eup %5197  ;;  %v1244_v37 = vadd.f32 1.0, %v5196_v38 }
 0x36a   :  { %v1250_v43 = vadd.f32 1.0, %v5198_v50  ;;  %v5200_v19 = vpop.eup %5199 }
 0x36b   :  { %5203 = vrcp.f32 %v1244_v37  ;;  %v5202_v21 = vpop.eup %5201  ;;  %v1257_v59 = vadd.f32 1.0, %v5200_v19 }
 0x36c   :  { %5205 = vrcp.f32 %v1250_v43 }
 0x36d   :  { %5207 = vrcp.f32 %v1257_v59 }
 0x375   :  { %v5204_v1 = vpop.eup %5203 }
 0x376   :  { %v5206_v26 = vpop.eup %5205  ;;  %v1261_v56 = vmul.f32 %v5204_v1, %v5202_v21  ;;  %v7143_v21 = vld [vmem:[#allocation74_spill] sm:$0xff] }
 0x377   :  { %v1260_v5 = vmul.f32 %v5206_v26, %v6106_v6  ;;  %v5208_v6 = vpop.eup %5207 }
 0x379   :  { %v1331_v4 = vpop.f32.mrb[4].mxu0  ;;  %v1402_v2 = vpop.f32.mrb[4].mxu1  ;;  %v6220_v18 = vadd.f32 %v1261_v56, %v1260_v5 }
 0x37a   :  { %v5076_v38 = vadd.f32 %v1331_v4, %v7142_v11  ;;  %v1333_v0 = vpop.f32.mrb[5].mxu0  ;;  %v1404_v8 = vpop.f32.mrb[5].mxu1  ;;  %v5092_v56 = vadd.f32 %v1402_v2, %v5983_v3 }
 0x37b   :  { %v5077_v50 = vadd.f32 %v1333_v0, %v7082_v55  ;;  %5209 = vtanh.f32 %v6220_v18  ;;  %v5093_v19 = vadd.f32 %v1404_v8, %v7143_v21 }
 0x37c   :  { %v3423_v43 = vmul.f32 -1.442695, %v5076_v38 }
 0x37d   :  { %v3424_v37 = vmul.f32 -1.442695, %v5077_v50  ;;  %v3425_v26 = vmul.f32 -1.442695, %v5093_v19 }
 0x37e   :  { %5211 = vpow2.f32 %v3423_v43 }
 0x37f   :  { %5213 = vpow2.f32 %v3424_v37 }
 0x380   :  { %5215 = vpow2.f32 %v3425_v26 }
 0x381   :  { %5217 = vtanh.f32 %v5092_v56  ;;  %v7147_v56 = vld [vmem:[#allocation21_spill] sm:$0xff] }
 0x385   :  { %v5210_v1 = vpop.eup %5209 }
 0x386   :  { %v1264_v59 = vmul.f32 %v5210_v1, %v5208_v6 }
 0x388   :  { %v5212_v5 = vpop.eup %5211  ;;  %1499 = vmatprep.mubr.f32.mxu0 %v1264_v59  ;;  %1570 = vmatprep.mubr.f32.mxu1 %v1264_v59  ;;  %v7148_v59 = vld [vmem:[#allocation22_spill] sm:$0xff] }
 0x389   :  { %v5214_v4 = vpop.eup %5213  ;;  %v1414_v11 = vadd.f32 1.0, %v5212_v5  ;;  %v7149_v5 = vld [vmem:[#allocation23_spill] sm:$0xff] }
 0x38a   :  { %v1420_v0 = vadd.f32 1.0, %v5214_v4  ;;  %v5216_v38 = vpop.eup %5215  ;;  %v7150_v4 = vld [vmem:[#allocation24_spill] sm:$0xff] }
 0x38b   :  { %5219 = vrcp.f32 %v1414_v11  ;;  %v5218_v50 = vpop.eup %5217  ;;  %v1427_v21 = vadd.f32 1.0, %v5216_v38  ;;  %v7145_v11 = vld [vmem:[#allocation19_spill] sm:$0xff]  ;;  %v7152_v38 = vld [vmem:[#allocation26_spill] sm:$0xff] }
 0x38c   :  { %5221 = vrcp.f32 %v1420_v0  ;;  %v7151_v0 = vld [vmem:[#allocation25_spill] sm:$0xff] }
 0x38d   :  { %5223 = vrcp.f32 %v1427_v21  ;;  %v7146_v21 = vld [vmem:[#allocation20_spill] sm:$0xff] }
 0x395   :  { %v5220_v43 = vpop.eup %5219 }
 0x396   :  { %v5222_v8 = vpop.eup %5221  ;;  %v1431_v37 = vmul.f32 %v5220_v43, %v5218_v50  ;;  %v7153_v50 = vld [vmem:[#allocation27_spill] sm:$0xff]  ;;  %v7154_v43 = vld [vmem:[#allocation28_spill] sm:$0xff] }
 0x397   :  { %v1430_v19 = vmul.f32 %v5222_v8, %v6114_v63  ;;  %v5224_v6 = vpop.eup %5223  ;;  %v7144_v63 = vld [vmem:[#allocation18_spill] sm:$0xff]  ;;  %v7155_v8 = vld [vmem:[#allocation29_spill] sm:$0xff] }
 0x399   :  { %v6228_v2 = vadd.f32 %v1431_v37, %v1430_v19  ;;  %v7156_v37 = vld [vmem:[#allocation30_spill] sm:$0xff]  ;;  %v7157_v19 = vld [vmem:[#allocation31_spill] sm:$0xff] }
 0x39b   :  { %5225 = vtanh.f32 %v6228_v2 }
 0x3a5   :  { %v5226_v1 = vpop.eup %5225 }
 0x3a6   :  { %v1434_v26 = vmul.f32 %v5226_v1, %v5224_v6  ;;  %v7158_v6 = vld [vmem:[#allocation32_spill] sm:$0xff]  ;;  %v7159_v1 = vld [vmem:[#allocation33_spill] sm:$0xff] }
 0x3a8   :  { %1500 = vmatmul.mubr.f32.vlgmr.msra.gmra.mrb[20].mxu0 %v1434_v26  ;;  %1571 = vmatmul.mubr.f32.vlgmr.msra.gmra.mrb[20].mxu1 %v1434_v26 }
 0x3a9   :  { %4091 = vmatpush1.bf16.msra.mxu0 %v5623_v23  ;;  %4123 = vmatpush1.bf16.msra.mxu1 %v5630_v27 }
 0x3aa   :  { %4093 = vmatprep.subr.bf16.mxu0 %v5634_v31  ;;  %4125 = vmatprep.subr.bf16.mxu1 %v5638_v35 }
 0x3ab   :  { %1665 = vmatprep.mubr.f32.mxu0 %v7023_v25  ;;  %1736 = vmatprep.mubr.f32.mxu1 %v7023_v25 }
 0x3ad   :  { %4095 = vmatpush1.bf16.msra.mxu0 %v5640_v36  ;;  %4127 = vmatpush1.bf16.msra.mxu1 %v5644_v39 }
 0x3ae   :  { %4097 = vmatprep.subr.bf16.mxu0 %v5653_v47  ;;  %4129 = vmatprep.subr.bf16.mxu1 %v5657_v48 }
 0x3b1   :  { %4099 = vmatpush1.bf16.msra.mxu0 %v5659_v49  ;;  %4131 = vmatpush1.bf16.msra.mxu1 %v5663_v53 }
 0x3b2   :  { %4101 = vmatprep.subr.bf16.mxu0 %v5672_v60  ;;  %4133 = vmatprep.subr.bf16.mxu1 %v5676_v61 }
 0x3b5   :  { %4103 = vmatpush1.bf16.msra.mxu0 %v5678_v62  ;;  %4135 = vmatpush1.bf16.msra.mxu1 %v5682_v7 }
 0x3b6   :  { %4105 = vmatprep.subr.bf16.mxu0 %v5691_v14  ;;  %4137 = vmatprep.subr.bf16.mxu1 %v5695_v15 }
 0x3b9   :  { %4107 = vmatpush1.bf16.msra.mxu0 %v5697_v16  ;;  %4139 = vmatpush1.bf16.msra.mxu1 %v5701_v20 }
 0x3ba   :  { %4109 = vmatprep.subr.bf16.mxu0 %v5710_v32  ;;  %4141 = vmatprep.subr.bf16.mxu1 %v5714_v33 }
 0x3bd   :  { %4111 = vmatpush1.bf16.msra.mxu0 %v5716_v34  ;;  %4143 = vmatpush1.bf16.msra.mxu1 %v5720_v41 }
 0x3be   :  { %4113 = vmatprep.subr.bf16.mxu0 %v5729_v51  ;;  %4145 = vmatprep.subr.bf16.mxu1 %v5733_v52 }
 0x3c1   :  { %4115 = vmatpush1.bf16.msra.mxu0 %v5735_v54  ;;  %4147 = vmatpush1.bf16.msra.mxu1 %v5739_v58 }
 0x3c2   :  { %4117 = vmatprep.subr.bf16.mxu0 %v5748_v10  ;;  %4149 = vmatprep.subr.bf16.mxu1 %v5752_v13 }
 0x3c5   :  { %4119 = vmatpush1.bf16.msra.mxu0 %v5754_v17  ;;  %4151 = vmatpush1.bf16.msra.mxu1 %v5758_v24 }
 0x3c6   :  { %4153 = vmatprep.subr.bf16.mxu0 %v5762_v29  ;;  %4217 = vmatprep.subr.bf16.mxu1 %v5766_v40 }
 0x3c8   :  { %1666 = vmatmul.mubr.f32.vlgmr.msra.gmra.mrb[6].mxu0 %v1434_v26  ;;  %1737 = vmatmul.mubr.f32.vlgmr.msra.gmra.mrb[6].mxu1 %v1434_v26  ;;  %v7160_v26 = vld [vmem:[#allocation34_spill] sm:$0xff] }
 0x3c9   :  { %4155 = vmatpush1.bf16.msra.mxu0 %v5770_v44  ;;  %4219 = vmatpush1.bf16.msra.mxu1 %v5774_v45 }
 0x3ca   :  { %4157 = vmatprep.subr.bf16.mxu0 %v5776_v46  ;;  %4221 = vmatprep.subr.bf16.mxu1 %v5780_v57 }
 0x3cd   :  { %4159 = vmatpush1.bf16.msra.mxu0 %v5786_v9  ;;  %4223 = vmatpush1.bf16.msra.mxu1 %v7024_v22 }
 0x3ce   :  { %4161 = vmatprep.subr.bf16.mxu0 %v5792_v12  ;;  %4225 = vmatprep.subr.bf16.mxu1 %v7025_v28 }
 0x3d1   :  { %4163 = vmatpush1.bf16.msra.mxu0 %v7144_v63  ;;  %4227 = vmatpush1.bf16.msra.mxu1 %v7145_v11 }
 0x3d2   :  { %4165 = vmatprep.subr.bf16.mxu0 %v7146_v21  ;;  %4229 = vmatprep.subr.bf16.mxu1 %v7147_v56 }
 0x3d5   :  { %4167 = vmatpush1.bf16.msra.mxu0 %v7148_v59  ;;  %4231 = vmatpush1.bf16.msra.mxu1 %v7149_v5  ;;  %v7200_v5 = vld [vmem:[#allocation16_spill] sm:$0xff] }
 0x3d6   :  { %4169 = vmatprep.subr.bf16.mxu0 %v7150_v4  ;;  %4233 = vmatprep.subr.bf16.mxu1 %v7151_v0  ;;  %v7161_v4 = vld [vmem:[#allocation35_spill] sm:$0xff]  ;;  %v7162_v0 = vld [vmem:[#allocation36_spill] sm:$0xff] }
 0x3d9   :  { %4171 = vmatpush1.bf16.msra.mxu0 %v7152_v38  ;;  %4235 = vmatpush1.bf16.msra.mxu1 %v7153_v50  ;;  %v7163_v38 = vld [vmem:[#allocation37_spill] sm:$0xff]  ;;  %v7164_v50 = vld [vmem:[#allocation38_spill] sm:$0xff] }
 0x3da   :  { %4173 = vmatprep.subr.bf16.mxu0 %v7154_v43  ;;  %4237 = vmatprep.subr.bf16.mxu1 %v7155_v8  ;;  %v7165_v43 = vld [vmem:[#allocation39_spill] sm:$0xff]  ;;  %v7166_v8 = vld [vmem:[#allocation40_spill] sm:$0xff] }
 0x3dd   :  { %4175 = vmatpush1.bf16.msra.mxu0 %v7156_v37  ;;  %4239 = vmatpush1.bf16.msra.mxu1 %v7157_v19  ;;  %v7167_v37 = vld [vmem:[#allocation41_spill] sm:$0xff]  ;;  %v7168_v19 = vld [vmem:[#allocation42_spill] sm:$0xff] }
 0x3de   :  { %4177 = vmatprep.subr.bf16.mxu0 %v7158_v6  ;;  %4241 = vmatprep.subr.bf16.mxu1 %v7159_v1  ;;  %v7169_v6 = vld [vmem:[#allocation43_spill] sm:$0xff]  ;;  %v7170_v1 = vld [vmem:[#allocation44_spill] sm:$0xff] }
 0x3e1   :  { %4179 = vmatpush1.bf16.msra.mxu0 %v7160_v26  ;;  %4243 = vmatpush1.bf16.msra.mxu1 %v7161_v4  ;;  %v7171_v26 = vld [vmem:[#allocation45_spill] sm:$0xff]  ;;  %v7172_v4 = vld [vmem:[#allocation46_spill] sm:$0xff] }
 0x3e2   :  { %4181 = vmatprep.subr.bf16.mxu0 %v7162_v0  ;;  %4245 = vmatprep.subr.bf16.mxu1 %v7163_v38  ;;  %v7173_v0 = vld [vmem:[#allocation47_spill] sm:$0xff]  ;;  %v7174_v38 = vld [vmem:[#allocation48_spill] sm:$0xff] }
 0x3e5   :  { %4183 = vmatpush1.bf16.msra.mxu0 %v7164_v50  ;;  %4247 = vmatpush1.bf16.msra.mxu1 %v7165_v43  ;;  %v7175_v50 = vld [vmem:[#allocation49_spill] sm:$0xff]  ;;  %v7176_v43 = vld [vmem:[#allocation50_spill] sm:$0xff] }
 0x3e6   :  { %4185 = vmatprep.subr.bf16.mxu0 %v7166_v8  ;;  %4249 = vmatprep.subr.bf16.mxu1 %v7167_v37  ;;  %v7177_v8 = vld [vmem:[#allocation51_spill] sm:$0xff]  ;;  %v7178_v37 = vld [vmem:[#allocation52_spill] sm:$0xff] }
 0x3e9   :  { %4187 = vmatpush1.bf16.msra.mxu0 %v7168_v19  ;;  %4251 = vmatpush1.bf16.msra.mxu1 %v7169_v6  ;;  %v7179_v19 = vld [vmem:[#allocation53_spill] sm:$0xff]  ;;  %v7180_v6 = vld [vmem:[#allocation54_spill] sm:$0xff] }
 0x3ea   :  { %4189 = vmatprep.subr.bf16.mxu0 %v7170_v1  ;;  %4253 = vmatprep.subr.bf16.mxu1 %v7171_v26  ;;  %v7181_v1 = vld [vmem:[#allocation55_spill] sm:$0xff]  ;;  %v7182_v26 = vld [vmem:[#allocation56_spill] sm:$0xff] }
 0x3ed   :  { %4191 = vmatpush1.bf16.msra.mxu0 %v7172_v4  ;;  %4255 = vmatpush1.bf16.msra.mxu1 %v7173_v0  ;;  %v7183_v4 = vld [vmem:[#allocation57_spill] sm:$0xff]  ;;  %v7184_v0 = vld [vmem:[#allocation58_spill] sm:$0xff] }
 0x3ee   :  { %4193 = vmatprep.subr.bf16.mxu0 %v7174_v38  ;;  %4257 = vmatprep.subr.bf16.mxu1 %v7175_v50  ;;  %v7185_v38 = vld [vmem:[#allocation59_spill] sm:$0xff]  ;;  %v7186_v50 = vld [vmem:[#allocation60_spill] sm:$0xff] }
 0x3f1   :  { %4195 = vmatpush1.bf16.msra.mxu0 %v7176_v43  ;;  %4259 = vmatpush1.bf16.msra.mxu1 %v7177_v8  ;;  %v7187_v43 = vld [vmem:[#allocation61_spill] sm:$0xff]  ;;  %v7188_v8 = vld [vmem:[#allocation62_spill] sm:$0xff] }
 0x3f2   :  { %4197 = vmatprep.subr.bf16.mxu0 %v7178_v37  ;;  %4261 = vmatprep.subr.bf16.mxu1 %v7179_v19  ;;  %v7189_v37 = vld [vmem:[#allocation63_spill] sm:$0xff]  ;;  %v7190_v19 = vld [vmem:[#allocation64_spill] sm:$0xff] }
 0x3f5   :  { %4199 = vmatpush1.bf16.msra.mxu0 %v7180_v6  ;;  %4263 = vmatpush1.bf16.msra.mxu1 %v7181_v1  ;;  %v7191_v6 = vld [vmem:[#allocation65_spill] sm:$0xff]  ;;  %v7192_v1 = vld [vmem:[#allocation66_spill] sm:$0xff] }
 0x3f6   :  { %4201 = vmatprep.subr.bf16.mxu0 %v7182_v26  ;;  %4265 = vmatprep.subr.bf16.mxu1 %v7183_v4  ;;  %v7193_v26 = vld [vmem:[#allocation67_spill] sm:$0xff]  ;;  %v7194_v4 = vld [vmem:[#allocation68_spill] sm:$0xff] }
 0x3f9   :  { %4203 = vmatpush1.bf16.msra.mxu0 %v7184_v0  ;;  %4267 = vmatpush1.bf16.msra.mxu1 %v7185_v38  ;;  %v7195_v0 = vld [vmem:[#allocation69_spill] sm:$0xff]  ;;  %v7196_v38 = vld [vmem:[#allocation70_spill] sm:$0xff] }
 0x3fa   :  { %4205 = vmatprep.subr.bf16.mxu0 %v7186_v50  ;;  %4269 = vmatprep.subr.bf16.mxu1 %v7187_v43  ;;  %v7197_v50 = vld [vmem:[#allocation71_spill] sm:$0xff]  ;;  %v7198_v43 = vld [vmem:[#allocation14_spill] sm:$0xff] }
 0x3fd   :  { %4207 = vmatpush1.bf16.msra.mxu0 %v7188_v8  ;;  %4271 = vmatpush1.bf16.msra.mxu1 %v7189_v37  ;;  %v7199_v8 = vld [vmem:[#allocation15_spill] sm:$0xff] }
 0x3fe   :  { %4209 = vmatprep.subr.bf16.mxu0 %v7190_v19  ;;  %4273 = vmatprep.subr.bf16.mxu1 %v7191_v6 }
 0x401   :  { %4211 = vmatpush1.bf16.msra.mxu0 %v7192_v1  ;;  %4275 = vmatpush1.bf16.msra.mxu1 %v7193_v26 }
 0x402   :  { %4213 = vmatprep.subr.bf16.mxu0 %v7194_v4  ;;  %4277 = vmatprep.subr.bf16.mxu1 %v7195_v0  ;;  %v7201_v0 = vld [vmem:[#allocation13_spill] sm:$0xff] }
 0x405   :  { %4215 = vmatpush1.bf16.msra.mxu0 %v7196_v38  ;;  %4279 = vmatpush1.bf16.msra.mxu1 %v7197_v50 }
 0x406   :  { %4281 = vmatprep.subr.bf16.mxu0 %v7198_v43  ;;  %4313 = vmatprep.subr.bf16.mxu1 %v7199_v8 }
 0x47b   :  { %v1501_v37 = vpop.f32.mrb[20].mxu0  ;;  %v1572_v19 = vpop.f32.mrb[20].mxu1 }
 0x47c   :  { %v1502_v6 = vadd.f32 %v1501_v37, %v7200_v5  ;;  %v1503_v59 = vpop.f32.mrb[21].mxu0  ;;  %v1574_v1 = vpop.f32.mrb[21].mxu1  ;;  %v1573_v50 = vadd.f32 %v1572_v19, %v7141_v42  ;;  %v7202_v19 = vld [vmem:[#allocation72_spill] sm:$0xff] }
 0x47d   :  { %v1504_v26 = vadd.f32 %v1503_v59, %v7139_v30  ;;  %v1575_v38 = vadd.f32 %v1574_v1, %v7201_v0 }
 0x47e   :  { %v3426_v56 = vmul.f32 -1.442695, %v1502_v6 }
 0x47f   :  { %v3427_v4 = vmul.f32 -1.442695, %v1504_v26  ;;  %v3428_v21 = vmul.f32 -1.442695, %v1575_v38 }
 0x480   :  { %5227 = vpow2.f32 %v3426_v56 }
 0x481   :  { %5229 = vpow2.f32 %v3427_v4 }
 0x482   :  { %5231 = vpow2.f32 %v3428_v21 }
 0x483   :  { %5233 = vtanh.f32 %v1573_v50 }
 0x48a   :  { %v5228_v43 = vpop.eup %5227 }
 0x48b   :  { %v5230_v11 = vpop.eup %5229  ;;  %v1580_v8 = vadd.f32 1.0, %v5228_v43 }
 0x48c   :  { %v1586_v63 = vadd.f32 1.0, %v5230_v11  ;;  %v5232_v37 = vpop.eup %5231 }
 0x48d   :  { %5235 = vrcp.f32 %v1580_v8  ;;  %v5234_v5 = vpop.eup %5233  ;;  %v1593_v56 = vadd.f32 1.0, %v5232_v37 }
 0x48e   :  { %5237 = vrcp.f32 %v1586_v63 }
 0x48f   :  { %5239 = vrcp.f32 %v1593_v56 }
 0x497   :  { %v5236_v59 = vpop.eup %5235 }
 0x498   :  { %v5238_v6 = vpop.eup %5237  ;;  %v1597_v26 = vmul.f32 %v5236_v59, %v5234_v5  ;;  %v7203_v5 = vld [vmem:[#allocation74_spill] sm:$0xff] }
 0x499   :  { %v1596_v4 = vmul.f32 %v5238_v6, %v6220_v18  ;;  %v5240_v18 = vpop.eup %5239 }
 0x49b   :  { %v1667_v1 = vpop.f32.mrb[6].mxu0  ;;  %v1738_v38 = vpop.f32.mrb[6].mxu1  ;;  %v6334_v0 = vadd.f32 %v1597_v26, %v1596_v4 }
 0x49c   :  { %v5078_v43 = vadd.f32 %v1667_v1, %v7202_v19  ;;  %v1669_v21 = vpop.f32.mrb[7].mxu0  ;;  %v1740_v50 = vpop.f32.mrb[7].mxu1  ;;  %v5094_v26 = vadd.f32 %v1738_v38, %v5983_v3 }
 0x49d   :  { %v5079_v11 = vadd.f32 %v1669_v21, %v7082_v55  ;;  %5241 = vtanh.f32 %v6334_v0  ;;  %v5095_v37 = vadd.f32 %v1740_v50, %v7203_v5 }
 0x49e   :  { %v3429_v63 = vmul.f32 -1.442695, %v5078_v43 }
 0x49f   :  { %v3430_v8 = vmul.f32 -1.442695, %v5079_v11  ;;  %v3431_v6 = vmul.f32 -1.442695, %v5095_v37 }
 0x4a0   :  { %5243 = vpow2.f32 %v3429_v63 }
 0x4a1   :  { %5245 = vpow2.f32 %v3430_v8 }
 0x4a2   :  { %5247 = vpow2.f32 %v3431_v6 }
 0x4a3   :  { %5249 = vtanh.f32 %v5094_v26  ;;  %v7207_v26 = vld [vmem:[#allocation21_spill] sm:$0xff] }
 0x4a7   :  { %v5242_v59 = vpop.eup %5241 }
 0x4a8   :  { %v1600_v56 = vmul.f32 %v5242_v59, %v5240_v18 }
 0x4aa   :  { %v5244_v4 = vpop.eup %5243  ;;  %1835 = vmatprep.mubr.f32.mxu0 %v1600_v56  ;;  %1906 = vmatprep.mubr.f32.mxu1 %v1600_v56  ;;  %v7208_v56 = vld [vmem:[#allocation22_spill] sm:$0xff] }
 0x4ab   :  { %v5246_v1 = vpop.eup %5245  ;;  %v1750_v19 = vadd.f32 1.0, %v5244_v4  ;;  %v7209_v4 = vld [vmem:[#allocation23_spill] sm:$0xff] }
 0x4ac   :  { %v1756_v21 = vadd.f32 1.0, %v5246_v1  ;;  %v5248_v43 = vpop.eup %5247  ;;  %v7210_v1 = vld [vmem:[#allocation24_spill] sm:$0xff] }
 0x4ad   :  { %5251 = vrcp.f32 %v1750_v19  ;;  %v5250_v11 = vpop.eup %5249  ;;  %v1763_v5 = vadd.f32 1.0, %v5248_v43  ;;  %v7205_v19 = vld [vmem:[#allocation19_spill] sm:$0xff]  ;;  %v7212_v43 = vld [vmem:[#allocation26_spill] sm:$0xff] }
 0x4ae   :  { %5253 = vrcp.f32 %v1756_v21  ;;  %v7211_v21 = vld [vmem:[#allocation25_spill] sm:$0xff] }
 0x4af   :  { %5255 = vrcp.f32 %v1763_v5  ;;  %v7206_v5 = vld [vmem:[#allocation20_spill] sm:$0xff] }
 0x4b7   :  { %v5252_v63 = vpop.eup %5251 }
 0x4b8   :  { %v5254_v50 = vpop.eup %5253  ;;  %v1767_v8 = vmul.f32 %v5252_v63, %v5250_v11  ;;  %v7213_v11 = vld [vmem:[#allocation27_spill] sm:$0xff]  ;;  %v7214_v63 = vld [vmem:[#allocation28_spill] sm:$0xff] }
 0x4b9   :  { %v1766_v37 = vmul.f32 %v5254_v50, %v6228_v2  ;;  %v5256_v18 = vpop.eup %5255  ;;  %v7204_v2 = vld [vmem:[#allocation18_spill] sm:$0xff]  ;;  %v7215_v50 = vld [vmem:[#allocation29_spill] sm:$0xff] }
 0x4bb   :  { %v6342_v38 = vadd.f32 %v1767_v8, %v1766_v37  ;;  %v7216_v8 = vld [vmem:[#allocation30_spill] sm:$0xff]  ;;  %v7217_v37 = vld [vmem:[#allocation31_spill] sm:$0xff] }
 0x4bd   :  { %5257 = vtanh.f32 %v6342_v38 }
 0x4c7   :  { %v5258_v59 = vpop.eup %5257 }
 0x4c8   :  { %v1770_v6 = vmul.f32 %v5258_v59, %v5256_v18  ;;  %v7218_v18 = vld [vmem:[#allocation32_spill] sm:$0xff]  ;;  %v7219_v59 = vld [vmem:[#allocation33_spill] sm:$0xff] }
 0x4ca   :  { %1836 = vmatmul.mubr.f32.vlgmr.msra.gmra.mrb[22].mxu0 %v1770_v6  ;;  %1907 = vmatmul.mubr.f32.vlgmr.msra.gmra.mrb[22].mxu1 %v1770_v6 }
 0x4cb   :  { %4283 = vmatpush1.bf16.msra.mxu0 %v5623_v23  ;;  %4315 = vmatpush1.bf16.msra.mxu1 %v5630_v27 }
 0x4cc   :  { %4285 = vmatprep.subr.bf16.mxu0 %v5634_v31  ;;  %4317 = vmatprep.subr.bf16.mxu1 %v5638_v35 }
 0x4cd   :  { %2001 = vmatprep.mubr.f32.mxu0 %v7023_v25  ;;  %2072 = vmatprep.mubr.f32.mxu1 %v7023_v25 }
 0x4cf   :  { %4287 = vmatpush1.bf16.msra.mxu0 %v5640_v36  ;;  %4319 = vmatpush1.bf16.msra.mxu1 %v5644_v39 }
 0x4d0   :  { %4289 = vmatprep.subr.bf16.mxu0 %v5653_v47  ;;  %4321 = vmatprep.subr.bf16.mxu1 %v5657_v48 }
 0x4d3   :  { %4291 = vmatpush1.bf16.msra.mxu0 %v5659_v49  ;;  %4323 = vmatpush1.bf16.msra.mxu1 %v5663_v53 }
 0x4d4   :  { %4293 = vmatprep.subr.bf16.mxu0 %v5672_v60  ;;  %4325 = vmatprep.subr.bf16.mxu1 %v5676_v61 }
 0x4d7   :  { %4295 = vmatpush1.bf16.msra.mxu0 %v5678_v62  ;;  %4327 = vmatpush1.bf16.msra.mxu1 %v5682_v7 }
 0x4d8   :  { %4297 = vmatprep.subr.bf16.mxu0 %v5691_v14  ;;  %4329 = vmatprep.subr.bf16.mxu1 %v5695_v15 }
 0x4db   :  { %4299 = vmatpush1.bf16.msra.mxu0 %v5697_v16  ;;  %4331 = vmatpush1.bf16.msra.mxu1 %v5701_v20 }
 0x4dc   :  { %4301 = vmatprep.subr.bf16.mxu0 %v5710_v32  ;;  %4333 = vmatprep.subr.bf16.mxu1 %v5714_v33 }
 0x4df   :  { %4303 = vmatpush1.bf16.msra.mxu0 %v5716_v34  ;;  %4335 = vmatpush1.bf16.msra.mxu1 %v5720_v41 }
 0x4e0   :  { %4305 = vmatprep.subr.bf16.mxu0 %v5729_v51  ;;  %4337 = vmatprep.subr.bf16.mxu1 %v5733_v52 }
 0x4e3   :  { %4307 = vmatpush1.bf16.msra.mxu0 %v5735_v54  ;;  %4339 = vmatpush1.bf16.msra.mxu1 %v5739_v58 }
 0x4e4   :  { %4309 = vmatprep.subr.bf16.mxu0 %v5748_v10  ;;  %4341 = vmatprep.subr.bf16.mxu1 %v5752_v13 }
 0x4e7   :  { %4311 = vmatpush1.bf16.msra.mxu0 %v5754_v17  ;;  %4343 = vmatpush1.bf16.msra.mxu1 %v5758_v24 }
 0x4e8   :  { %4345 = vmatprep.subr.bf16.mxu0 %v5762_v29  ;;  %4409 = vmatprep.subr.bf16.mxu1 %v5766_v40 }
 0x4ea   :  { %2002 = vmatmul.mubr.f32.vlgmr.msra.gmra.mrb[8].mxu0 %v1770_v6  ;;  %2073 = vmatmul.mubr.f32.vlgmr.msra.gmra.mrb[8].mxu1 %v1770_v6  ;;  %v7220_v6 = vld [vmem:[#allocation34_spill] sm:$0xff] }
 0x4eb   :  { %4347 = vmatpush1.bf16.msra.mxu0 %v5770_v44  ;;  %4411 = vmatpush1.bf16.msra.mxu1 %v5774_v45 }
 0x4ec   :  { %4349 = vmatprep.subr.bf16.mxu0 %v5776_v46  ;;  %4413 = vmatprep.subr.bf16.mxu1 %v5780_v57 }
 0x4ef   :  { %4351 = vmatpush1.bf16.msra.mxu0 %v5786_v9  ;;  %4415 = vmatpush1.bf16.msra.mxu1 %v7024_v22 }
 0x4f0   :  { %4353 = vmatprep.subr.bf16.mxu0 %v5792_v12  ;;  %4417 = vmatprep.subr.bf16.mxu1 %v7025_v28 }
 0x4f3   :  { %4355 = vmatpush1.bf16.msra.mxu0 %v7204_v2  ;;  %4419 = vmatpush1.bf16.msra.mxu1 %v7205_v19 }
 0x4f4   :  { %4357 = vmatprep.subr.bf16.mxu0 %v7206_v5  ;;  %4421 = vmatprep.subr.bf16.mxu1 %v7207_v26 }
 0x4f7   :  { %4359 = vmatpush1.bf16.msra.mxu0 %v7208_v56  ;;  %4423 = vmatpush1.bf16.msra.mxu1 %v7209_v4  ;;  %v7260_v4 = vld [vmem:[#allocation16_spill] sm:$0xff] }
 0x4f8   :  { %4361 = vmatprep.subr.bf16.mxu0 %v7210_v1  ;;  %4425 = vmatprep.subr.bf16.mxu1 %v7211_v21  ;;  %v7221_v1 = vld [vmem:[#allocation35_spill] sm:$0xff]  ;;  %v7222_v21 = vld [vmem:[#allocation36_spill] sm:$0xff] }
 0x4fb   :  { %4363 = vmatpush1.bf16.msra.mxu0 %v7212_v43  ;;  %4427 = vmatpush1.bf16.msra.mxu1 %v7213_v11  ;;  %v7223_v43 = vld [vmem:[#allocation37_spill] sm:$0xff]  ;;  %v7224_v11 = vld [vmem:[#allocation38_spill] sm:$0xff] }
 0x4fc   :  { %4365 = vmatprep.subr.bf16.mxu0 %v7214_v63  ;;  %4429 = vmatprep.subr.bf16.mxu1 %v7215_v50  ;;  %v7225_v63 = vld [vmem:[#allocation39_spill] sm:$0xff]  ;;  %v7226_v50 = vld [vmem:[#allocation40_spill] sm:$0xff] }
 0x4ff   :  { %4367 = vmatpush1.bf16.msra.mxu0 %v7216_v8  ;;  %4431 = vmatpush1.bf16.msra.mxu1 %v7217_v37  ;;  %v7227_v8 = vld [vmem:[#allocation41_spill] sm:$0xff]  ;;  %v7228_v37 = vld [vmem:[#allocation42_spill] sm:$0xff] }
 0x500   :  { %4369 = vmatprep.subr.bf16.mxu0 %v7218_v18  ;;  %4433 = vmatprep.subr.bf16.mxu1 %v7219_v59  ;;  %v7229_v18 = vld [vmem:[#allocation43_spill] sm:$0xff]  ;;  %v7230_v59 = vld [vmem:[#allocation44_spill] sm:$0xff] }
 0x503   :  { %4371 = vmatpush1.bf16.msra.mxu0 %v7220_v6  ;;  %4435 = vmatpush1.bf16.msra.mxu1 %v7221_v1  ;;  %v7231_v6 = vld [vmem:[#allocation45_spill] sm:$0xff]  ;;  %v7232_v1 = vld [vmem:[#allocation46_spill] sm:$0xff] }
 0x504   :  { %4373 = vmatprep.subr.bf16.mxu0 %v7222_v21  ;;  %4437 = vmatprep.subr.bf16.mxu1 %v7223_v43  ;;  %v7233_v21 = vld [vmem:[#allocation47_spill] sm:$0xff]  ;;  %v7234_v43 = vld [vmem:[#allocation48_spill] sm:$0xff] }
 0x507   :  { %4375 = vmatpush1.bf16.msra.mxu0 %v7224_v11  ;;  %4439 = vmatpush1.bf16.msra.mxu1 %v7225_v63  ;;  %v7235_v11 = vld [vmem:[#allocation49_spill] sm:$0xff]  ;;  %v7236_v63 = vld [vmem:[#allocation50_spill] sm:$0xff] }
 0x508   :  { %4377 = vmatprep.subr.bf16.mxu0 %v7226_v50  ;;  %4441 = vmatprep.subr.bf16.mxu1 %v7227_v8  ;;  %v7237_v50 = vld [vmem:[#allocation51_spill] sm:$0xff]  ;;  %v7238_v8 = vld [vmem:[#allocation52_spill] sm:$0xff] }
 0x50b   :  { %4379 = vmatpush1.bf16.msra.mxu0 %v7228_v37  ;;  %4443 = vmatpush1.bf16.msra.mxu1 %v7229_v18  ;;  %v7239_v37 = vld [vmem:[#allocation53_spill] sm:$0xff]  ;;  %v7240_v18 = vld [vmem:[#allocation54_spill] sm:$0xff] }
 0x50c   :  { %4381 = vmatprep.subr.bf16.mxu0 %v7230_v59  ;;  %4445 = vmatprep.subr.bf16.mxu1 %v7231_v6  ;;  %v7241_v59 = vld [vmem:[#allocation55_spill] sm:$0xff]  ;;  %v7242_v6 = vld [vmem:[#allocation56_spill] sm:$0xff] }
 0x50f   :  { %4383 = vmatpush1.bf16.msra.mxu0 %v7232_v1  ;;  %4447 = vmatpush1.bf16.msra.mxu1 %v7233_v21  ;;  %v7243_v1 = vld [vmem:[#allocation57_spill] sm:$0xff]  ;;  %v7244_v21 = vld [vmem:[#allocation58_spill] sm:$0xff] }
 0x510   :  { %4385 = vmatprep.subr.bf16.mxu0 %v7234_v43  ;;  %4449 = vmatprep.subr.bf16.mxu1 %v7235_v11  ;;  %v7245_v43 = vld [vmem:[#allocation59_spill] sm:$0xff]  ;;  %v7246_v11 = vld [vmem:[#allocation60_spill] sm:$0xff] }
 0x513   :  { %4387 = vmatpush1.bf16.msra.mxu0 %v7236_v63  ;;  %4451 = vmatpush1.bf16.msra.mxu1 %v7237_v50  ;;  %v7247_v63 = vld [vmem:[#allocation61_spill] sm:$0xff]  ;;  %v7248_v50 = vld [vmem:[#allocation62_spill] sm:$0xff] }
 0x514   :  { %4389 = vmatprep.subr.bf16.mxu0 %v7238_v8  ;;  %4453 = vmatprep.subr.bf16.mxu1 %v7239_v37  ;;  %v7249_v8 = vld [vmem:[#allocation63_spill] sm:$0xff]  ;;  %v7250_v37 = vld [vmem:[#allocation64_spill] sm:$0xff] }
 0x517   :  { %4391 = vmatpush1.bf16.msra.mxu0 %v7240_v18  ;;  %4455 = vmatpush1.bf16.msra.mxu1 %v7241_v59  ;;  %v7251_v18 = vld [vmem:[#allocation65_spill] sm:$0xff]  ;;  %v7252_v59 = vld [vmem:[#allocation66_spill] sm:$0xff] }
 0x518   :  { %4393 = vmatprep.subr.bf16.mxu0 %v7242_v6  ;;  %4457 = vmatprep.subr.bf16.mxu1 %v7243_v1  ;;  %v7253_v6 = vld [vmem:[#allocation67_spill] sm:$0xff]  ;;  %v7254_v1 = vld [vmem:[#allocation68_spill] sm:$0xff] }
 0x51b   :  { %4395 = vmatpush1.bf16.msra.mxu0 %v7244_v21  ;;  %4459 = vmatpush1.bf16.msra.mxu1 %v7245_v43  ;;  %v7255_v21 = vld [vmem:[#allocation69_spill] sm:$0xff]  ;;  %v7256_v43 = vld [vmem:[#allocation70_spill] sm:$0xff] }
 0x51c   :  { %4397 = vmatprep.subr.bf16.mxu0 %v7246_v11  ;;  %4461 = vmatprep.subr.bf16.mxu1 %v7247_v63  ;;  %v7257_v11 = vld [vmem:[#allocation71_spill] sm:$0xff]  ;;  %v7258_v63 = vld [vmem:[#allocation14_spill] sm:$0xff] }
 0x51f   :  { %4399 = vmatpush1.bf16.msra.mxu0 %v7248_v50  ;;  %4463 = vmatpush1.bf16.msra.mxu1 %v7249_v8  ;;  %v7259_v50 = vld [vmem:[#allocation15_spill] sm:$0xff] }
 0x520   :  { %4401 = vmatprep.subr.bf16.mxu0 %v7250_v37  ;;  %4465 = vmatprep.subr.bf16.mxu1 %v7251_v18 }
 0x523   :  { %4403 = vmatpush1.bf16.msra.mxu0 %v7252_v59  ;;  %4467 = vmatpush1.bf16.msra.mxu1 %v7253_v6 }
 0x524   :  { %4405 = vmatprep.subr.bf16.mxu0 %v7254_v1  ;;  %4469 = vmatprep.subr.bf16.mxu1 %v7255_v21  ;;  %v7261_v21 = vld [vmem:[#allocation13_spill] sm:$0xff] }
 0x527   :  { %4407 = vmatpush1.bf16.msra.mxu0 %v7256_v43  ;;  %4471 = vmatpush1.bf16.msra.mxu1 %v7257_v11 }
 0x528   :  { %4473 = vmatprep.subr.bf16.mxu0 %v7258_v63  ;;  %4505 = vmatprep.subr.bf16.mxu1 %v7259_v50 }
 0x59d   :  { %v1837_v8 = vpop.f32.mrb[22].mxu0  ;;  %v1908_v37 = vpop.f32.mrb[22].mxu1 }
 0x59e   :  { %v1838_v18 = vadd.f32 %v1837_v8, %v7260_v4  ;;  %v1839_v56 = vpop.f32.mrb[23].mxu0  ;;  %v1910_v59 = vpop.f32.mrb[23].mxu1  ;;  %v1909_v11 = vadd.f32 %v1908_v37, %v7141_v42  ;;  %v7262_v37 = vld [vmem:[#allocation72_spill] sm:$0xff] }
 0x59f   :  { %v1840_v6 = vadd.f32 %v1839_v56, %v7139_v30  ;;  %v1911_v43 = vadd.f32 %v1910_v59, %v7261_v21 }
 0x5a0   :  { %v3432_v26 = vmul.f32 -1.442695, %v1838_v18 }
 0x5a1   :  { %v3433_v1 = vmul.f32 -1.442695, %v1840_v6  ;;  %v3434_v5 = vmul.f32 -1.442695, %v1911_v43 }
 0x5a2   :  { %5259 = vpow2.f32 %v3432_v26 }
 0x5a3   :  { %5261 = vpow2.f32 %v3433_v1 }
 0x5a4   :  { %5263 = vpow2.f32 %v3434_v5 }
 0x5a5   :  { %5265 = vtanh.f32 %v1909_v11 }
 0x5ac   :  { %v5260_v63 = vpop.eup %5259 }
 0x5ad   :  { %v5262_v19 = vpop.eup %5261  ;;  %v1916_v50 = vadd.f32 1.0, %v5260_v63 }
 0x5ae   :  { %v1922_v2 = vadd.f32 1.0, %v5262_v19  ;;  %v5264_v8 = vpop.eup %5263 }
 0x5af   :  { %5267 = vrcp.f32 %v1916_v50  ;;  %v5266_v4 = vpop.eup %5265  ;;  %v1929_v26 = vadd.f32 1.0, %v5264_v8 }
 0x5b0   :  { %5269 = vrcp.f32 %v1922_v2 }
 0x5b1   :  { %5271 = vrcp.f32 %v1929_v26 }
 0x5b9   :  { %v5268_v56 = vpop.eup %5267 }
 0x5ba   :  { %v5270_v18 = vpop.eup %5269  ;;  %v1933_v6 = vmul.f32 %v5268_v56, %v5266_v4  ;;  %v7263_v4 = vld [vmem:[#allocation74_spill] sm:$0xff] }
 0x5bb   :  { %v1932_v1 = vmul.f32 %v5270_v18, %v6334_v0  ;;  %v5272_v0 = vpop.eup %5271 }
 0x5bd   :  { %v2003_v59 = vpop.f32.mrb[8].mxu0  ;;  %v2074_v43 = vpop.f32.mrb[8].mxu1  ;;  %v6448_v21 = vadd.f32 %v1933_v6, %v1932_v1 }
 0x5be   :  { %v5080_v63 = vadd.f32 %v2003_v59, %v7262_v37  ;;  %v2005_v5 = vpop.f32.mrb[9].mxu0  ;;  %v2076_v11 = vpop.f32.mrb[9].mxu1  ;;  %v5096_v6 = vadd.f32 %v2074_v43, %v5983_v3 }
 0x5bf   :  { %v5081_v19 = vadd.f32 %v2005_v5, %v7082_v55  ;;  %5273 = vtanh.f32 %v6448_v21  ;;  %v5097_v8 = vadd.f32 %v2076_v11, %v7263_v4 }
 0x5c0   :  { %v3435_v2 = vmul.f32 -1.442695, %v5080_v63 }
 0x5c1   :  { %v3436_v50 = vmul.f32 -1.442695, %v5081_v19  ;;  %v3437_v18 = vmul.f32 -1.442695, %v5097_v8 }
 0x5c2   :  { %5275 = vpow2.f32 %v3435_v2 }
 0x5c3   :  { %5277 = vpow2.f32 %v3436_v50 }
 0x5c4   :  { %5279 = vpow2.f32 %v3437_v18 }
 0x5c5   :  { %5281 = vtanh.f32 %v5096_v6  ;;  %v7267_v6 = vld [vmem:[#allocation21_spill] sm:$0xff] }
 0x5c9   :  { %v5274_v56 = vpop.eup %5273 }
 0x5ca   :  { %v1936_v26 = vmul.f32 %v5274_v56, %v5272_v0 }
 0x5cc   :  { %v5276_v1 = vpop.eup %5275  ;;  %2171 = vmatprep.mubr.f32.mxu0 %v1936_v26  ;;  %2242 = vmatprep.mubr.f32.mxu1 %v1936_v26  ;;  %v7268_v26 = vld [vmem:[#allocation22_spill] sm:$0xff] }
 0x5cd   :  { %v5278_v59 = vpop.eup %5277  ;;  %v2086_v37 = vadd.f32 1.0, %v5276_v1  ;;  %v7269_v1 = vld [vmem:[#allocation23_spill] sm:$0xff] }
 0x5ce   :  { %v2092_v5 = vadd.f32 1.0, %v5278_v59  ;;  %v5280_v63 = vpop.eup %5279  ;;  %v7270_v59 = vld [vmem:[#allocation24_spill] sm:$0xff] }
 0x5cf   :  { %5283 = vrcp.f32 %v2086_v37  ;;  %v5282_v19 = vpop.eup %5281  ;;  %v2099_v4 = vadd.f32 1.0, %v5280_v63  ;;  %v7265_v37 = vld [vmem:[#allocation19_spill] sm:$0xff]  ;;  %v7272_v63 = vld [vmem:[#allocation26_spill] sm:$0xff] }
 0x5d0   :  { %5285 = vrcp.f32 %v2092_v5  ;;  %v7271_v5 = vld [vmem:[#allocation25_spill] sm:$0xff] }
 0x5d1   :  { %5287 = vrcp.f32 %v2099_v4  ;;  %v7266_v4 = vld [vmem:[#allocation20_spill] sm:$0xff] }
 0x5d9   :  { %v5284_v2 = vpop.eup %5283 }
 0x5da   :  { %v5286_v11 = vpop.eup %5285  ;;  %v2103_v50 = vmul.f32 %v5284_v2, %v5282_v19  ;;  %v7273_v19 = vld [vmem:[#allocation27_spill] sm:$0xff]  ;;  %v7274_v2 = vld [vmem:[#allocation28_spill] sm:$0xff] }
 0x5db   :  { %v2102_v8 = vmul.f32 %v5286_v11, %v6342_v38  ;;  %v5288_v0 = vpop.eup %5287  ;;  %v7264_v38 = vld [vmem:[#allocation18_spill] sm:$0xff]  ;;  %v7275_v11 = vld [vmem:[#allocation29_spill] sm:$0xff] }
 0x5dd   :  { %v6456_v43 = vadd.f32 %v2103_v50, %v2102_v8  ;;  %v7276_v50 = vld [vmem:[#allocation30_spill] sm:$0xff]  ;;  %v7277_v8 = vld [vmem:[#allocation31_spill] sm:$0xff] }
 0x5df   :  { %5289 = vtanh.f32 %v6456_v43 }
 0x5e9   :  { %v5290_v56 = vpop.eup %5289 }
 0x5ea   :  { %v2106_v18 = vmul.f32 %v5290_v56, %v5288_v0  ;;  %v7278_v0 = vld [vmem:[#allocation32_spill] sm:$0xff]  ;;  %v7279_v56 = vld [vmem:[#allocation33_spill] sm:$0xff] }
 0x5ec   :  { %2172 = vmatmul.mubr.f32.vlgmr.msra.gmra.mrb[24].mxu0 %v2106_v18  ;;  %2243 = vmatmul.mubr.f32.vlgmr.msra.gmra.mrb[24].mxu1 %v2106_v18 }
 0x5ed   :  { %4475 = vmatpush1.bf16.msra.mxu0 %v5623_v23  ;;  %4507 = vmatpush1.bf16.msra.mxu1 %v5630_v27 }
 0x5ee   :  { %4477 = vmatprep.subr.bf16.mxu0 %v5634_v31  ;;  %4509 = vmatprep.subr.bf16.mxu1 %v5638_v35 }
 0x5ef   :  { %2337 = vmatprep.mubr.f32.mxu0 %v7023_v25  ;;  %2408 = vmatprep.mubr.f32.mxu1 %v7023_v25 }
 0x5f1   :  { %4479 = vmatpush1.bf16.msra.mxu0 %v5640_v36  ;;  %4511 = vmatpush1.bf16.msra.mxu1 %v5644_v39 }
 0x5f2   :  { %4481 = vmatprep.subr.bf16.mxu0 %v5653_v47  ;;  %4513 = vmatprep.subr.bf16.mxu1 %v5657_v48 }
 0x5f5   :  { %4483 = vmatpush1.bf16.msra.mxu0 %v5659_v49  ;;  %4515 = vmatpush1.bf16.msra.mxu1 %v5663_v53 }
 0x5f6   :  { %4485 = vmatprep.subr.bf16.mxu0 %v5672_v60  ;;  %4517 = vmatprep.subr.bf16.mxu1 %v5676_v61 }
 0x5f9   :  { %4487 = vmatpush1.bf16.msra.mxu0 %v5678_v62  ;;  %4519 = vmatpush1.bf16.msra.mxu1 %v5682_v7 }
 0x5fa   :  { %4489 = vmatprep.subr.bf16.mxu0 %v5691_v14  ;;  %4521 = vmatprep.subr.bf16.mxu1 %v5695_v15 }
 0x5fd   :  { %4491 = vmatpush1.bf16.msra.mxu0 %v5697_v16  ;;  %4523 = vmatpush1.bf16.msra.mxu1 %v5701_v20 }
 0x5fe   :  { %4493 = vmatprep.subr.bf16.mxu0 %v5710_v32  ;;  %4525 = vmatprep.subr.bf16.mxu1 %v5714_v33 }
 0x601   :  { %4495 = vmatpush1.bf16.msra.mxu0 %v5716_v34  ;;  %4527 = vmatpush1.bf16.msra.mxu1 %v5720_v41 }
 0x602   :  { %4497 = vmatprep.subr.bf16.mxu0 %v5729_v51  ;;  %4529 = vmatprep.subr.bf16.mxu1 %v5733_v52 }
 0x605   :  { %4499 = vmatpush1.bf16.msra.mxu0 %v5735_v54  ;;  %4531 = vmatpush1.bf16.msra.mxu1 %v5739_v58 }
 0x606   :  { %4501 = vmatprep.subr.bf16.mxu0 %v5748_v10  ;;  %4533 = vmatprep.subr.bf16.mxu1 %v5752_v13 }
 0x609   :  { %4503 = vmatpush1.bf16.msra.mxu0 %v5754_v17  ;;  %4535 = vmatpush1.bf16.msra.mxu1 %v5758_v24 }
 0x60a   :  { %4537 = vmatprep.subr.bf16.mxu0 %v5762_v29  ;;  %4601 = vmatprep.subr.bf16.mxu1 %v5766_v40 }
 0x60c   :  { %2338 = vmatmul.mubr.f32.vlgmr.msra.gmra.mrb[10].mxu0 %v2106_v18  ;;  %2409 = vmatmul.mubr.f32.vlgmr.msra.gmra.mrb[10].mxu1 %v2106_v18  ;;  %v7280_v18 = vld [vmem:[#allocation34_spill] sm:$0xff] }
 0x60d   :  { %4539 = vmatpush1.bf16.msra.mxu0 %v5770_v44  ;;  %4603 = vmatpush1.bf16.msra.mxu1 %v5774_v45 }
 0x60e   :  { %4541 = vmatprep.subr.bf16.mxu0 %v5776_v46  ;;  %4605 = vmatprep.subr.bf16.mxu1 %v5780_v57 }
 0x611   :  { %4543 = vmatpush1.bf16.msra.mxu0 %v5786_v9  ;;  %4607 = vmatpush1.bf16.msra.mxu1 %v7024_v22 }
 0x612   :  { %4545 = vmatprep.subr.bf16.mxu0 %v5792_v12  ;;  %4609 = vmatprep.subr.bf16.mxu1 %v7025_v28 }
 0x615   :  { %4547 = vmatpush1.bf16.msra.mxu0 %v7264_v38  ;;  %4611 = vmatpush1.bf16.msra.mxu1 %v7265_v37 }
 0x616   :  { %4549 = vmatprep.subr.bf16.mxu0 %v7266_v4  ;;  %4613 = vmatprep.subr.bf16.mxu1 %v7267_v6 }
 0x619   :  { %4551 = vmatpush1.bf16.msra.mxu0 %v7268_v26  ;;  %4615 = vmatpush1.bf16.msra.mxu1 %v7269_v1  ;;  %v7320_v1 = vld [vmem:[#allocation16_spill] sm:$0xff] }
 0x61a   :  { %4553 = vmatprep.subr.bf16.mxu0 %v7270_v59  ;;  %4617 = vmatprep.subr.bf16.mxu1 %v7271_v5  ;;  %v7281_v59 = vld [vmem:[#allocation35_spill] sm:$0xff]  ;;  %v7282_v5 = vld [vmem:[#allocation36_spill] sm:$0xff] }
 0x61d   :  { %4555 = vmatpush1.bf16.msra.mxu0 %v7272_v63  ;;  %4619 = vmatpush1.bf16.msra.mxu1 %v7273_v19  ;;  %v7283_v63 = vld [vmem:[#allocation37_spill] sm:$0xff]  ;;  %v7284_v19 = vld [vmem:[#allocation38_spill] sm:$0xff] }
 0x61e   :  { %4557 = vmatprep.subr.bf16.mxu0 %v7274_v2  ;;  %4621 = vmatprep.subr.bf16.mxu1 %v7275_v11  ;;  %v7285_v2 = vld [vmem:[#allocation39_spill] sm:$0xff]  ;;  %v7286_v11 = vld [vmem:[#allocation40_spill] sm:$0xff] }
 0x621   :  { %4559 = vmatpush1.bf16.msra.mxu0 %v7276_v50  ;;  %4623 = vmatpush1.bf16.msra.mxu1 %v7277_v8  ;;  %v7287_v50 = vld [vmem:[#allocation41_spill] sm:$0xff]  ;;  %v7288_v8 = vld [vmem:[#allocation42_spill] sm:$0xff] }
 0x622   :  { %4561 = vmatprep.subr.bf16.mxu0 %v7278_v0  ;;  %4625 = vmatprep.subr.bf16.mxu1 %v7279_v56  ;;  %v7289_v0 = vld [vmem:[#allocation43_spill] sm:$0xff]  ;;  %v7290_v56 = vld [vmem:[#allocation44_spill] sm:$0xff] }
 0x625   :  { %4563 = vmatpush1.bf16.msra.mxu0 %v7280_v18  ;;  %4627 = vmatpush1.bf16.msra.mxu1 %v7281_v59  ;;  %v7291_v18 = vld [vmem:[#allocation45_spill] sm:$0xff]  ;;  %v7292_v59 = vld [vmem:[#allocation46_spill] sm:$0xff] }
 0x626   :  { %4565 = vmatprep.subr.bf16.mxu0 %v7282_v5  ;;  %4629 = vmatprep.subr.bf16.mxu1 %v7283_v63  ;;  %v7293_v5 = vld [vmem:[#allocation47_spill] sm:$0xff]  ;;  %v7294_v63 = vld [vmem:[#allocation48_spill] sm:$0xff] }
 0x629   :  { %4567 = vmatpush1.bf16.msra.mxu0 %v7284_v19  ;;  %4631 = vmatpush1.bf16.msra.mxu1 %v7285_v2  ;;  %v7295_v19 = vld [vmem:[#allocation49_spill] sm:$0xff]  ;;  %v7296_v2 = vld [vmem:[#allocation50_spill] sm:$0xff] }
 0x62a   :  { %4569 = vmatprep.subr.bf16.mxu0 %v7286_v11  ;;  %4633 = vmatprep.subr.bf16.mxu1 %v7287_v50  ;;  %v7297_v11 = vld [vmem:[#allocation51_spill] sm:$0xff]  ;;  %v7298_v50 = vld [vmem:[#allocation52_spill] sm:$0xff] }
 0x62d   :  { %4571 = vmatpush1.bf16.msra.mxu0 %v7288_v8  ;;  %4635 = vmatpush1.bf16.msra.mxu1 %v7289_v0  ;;  %v7299_v8 = vld [vmem:[#allocation53_spill] sm:$0xff]  ;;  %v7300_v0 = vld [vmem:[#allocation54_spill] sm:$0xff] }
 0x62e   :  { %4573 = vmatprep.subr.bf16.mxu0 %v7290_v56  ;;  %4637 = vmatprep.subr.bf16.mxu1 %v7291_v18  ;;  %v7301_v56 = vld [vmem:[#allocation55_spill] sm:$0xff]  ;;  %v7302_v18 = vld [vmem:[#allocation56_spill] sm:$0xff] }
 0x631   :  { %4575 = vmatpush1.bf16.msra.mxu0 %v7292_v59  ;;  %4639 = vmatpush1.bf16.msra.mxu1 %v7293_v5  ;;  %v7303_v59 = vld [vmem:[#allocation57_spill] sm:$0xff]  ;;  %v7304_v5 = vld [vmem:[#allocation58_spill] sm:$0xff] }
 0x632   :  { %4577 = vmatprep.subr.bf16.mxu0 %v7294_v63  ;;  %4641 = vmatprep.subr.bf16.mxu1 %v7295_v19  ;;  %v7305_v63 = vld [vmem:[#allocation59_spill] sm:$0xff]  ;;  %v7306_v19 = vld [vmem:[#allocation60_spill] sm:$0xff] }
 0x635   :  { %4579 = vmatpush1.bf16.msra.mxu0 %v7296_v2  ;;  %4643 = vmatpush1.bf16.msra.mxu1 %v7297_v11  ;;  %v7307_v2 = vld [vmem:[#allocation61_spill] sm:$0xff]  ;;  %v7308_v11 = vld [vmem:[#allocation62_spill] sm:$0xff] }
 0x636   :  { %4581 = vmatprep.subr.bf16.mxu0 %v7298_v50  ;;  %4645 = vmatprep.subr.bf16.mxu1 %v7299_v8  ;;  %v7309_v50 = vld [vmem:[#allocation63_spill] sm:$0xff]  ;;  %v7310_v8 = vld [vmem:[#allocation64_spill] sm:$0xff] }
 0x639   :  { %4583 = vmatpush1.bf16.msra.mxu0 %v7300_v0  ;;  %4647 = vmatpush1.bf16.msra.mxu1 %v7301_v56  ;;  %v7311_v0 = vld [vmem:[#allocation65_spill] sm:$0xff]  ;;  %v7312_v56 = vld [vmem:[#allocation66_spill] sm:$0xff] }
 0x63a   :  { %4585 = vmatprep.subr.bf16.mxu0 %v7302_v18  ;;  %4649 = vmatprep.subr.bf16.mxu1 %v7303_v59  ;;  %v7313_v18 = vld [vmem:[#allocation67_spill] sm:$0xff]  ;;  %v7314_v59 = vld [vmem:[#allocation68_spill] sm:$0xff] }
 0x63d   :  { %4587 = vmatpush1.bf16.msra.mxu0 %v7304_v5  ;;  %4651 = vmatpush1.bf16.msra.mxu1 %v7305_v63  ;;  %v7315_v5 = vld [vmem:[#allocation69_spill] sm:$0xff]  ;;  %v7316_v63 = vld [vmem:[#allocation70_spill] sm:$0xff] }
 0x63e   :  { %4589 = vmatprep.subr.bf16.mxu0 %v7306_v19  ;;  %4653 = vmatprep.subr.bf16.mxu1 %v7307_v2  ;;  %v7317_v19 = vld [vmem:[#allocation71_spill] sm:$0xff]  ;;  %v7318_v2 = vld [vmem:[#allocation14_spill] sm:$0xff] }
 0x641   :  { %4591 = vmatpush1.bf16.msra.mxu0 %v7308_v11  ;;  %4655 = vmatpush1.bf16.msra.mxu1 %v7309_v50  ;;  %v7319_v11 = vld [vmem:[#allocation15_spill] sm:$0xff] }
 0x642   :  { %4593 = vmatprep.subr.bf16.mxu0 %v7310_v8  ;;  %4657 = vmatprep.subr.bf16.mxu1 %v7311_v0 }
 0x645   :  { %4595 = vmatpush1.bf16.msra.mxu0 %v7312_v56  ;;  %4659 = vmatpush1.bf16.msra.mxu1 %v7313_v18 }
 0x646   :  { %4597 = vmatprep.subr.bf16.mxu0 %v7314_v59  ;;  %4661 = vmatprep.subr.bf16.mxu1 %v7315_v5  ;;  %v7321_v5 = vld [vmem:[#allocation13_spill] sm:$0xff] }
 0x649   :  { %4599 = vmatpush1.bf16.msra.mxu0 %v7316_v63  ;;  %4663 = vmatpush1.bf16.msra.mxu1 %v7317_v19 }
 0x64a   :  { %4665 = vmatprep.subr.bf16.mxu0 %v7318_v2  ;;  %4697 = vmatprep.subr.bf16.mxu1 %v7319_v11 }
 0x6bf   :  { %v2173_v50 = vpop.f32.mrb[24].mxu0  ;;  %v2244_v8 = vpop.f32.mrb[24].mxu1 }
 0x6c0   :  { %v2174_v0 = vadd.f32 %v2173_v50, %v7320_v1  ;;  %v2175_v26 = vpop.f32.mrb[25].mxu0  ;;  %v2246_v56 = vpop.f32.mrb[25].mxu1  ;;  %v2245_v19 = vadd.f32 %v2244_v8, %v7141_v42  ;;  %v7322_v8 = vld [vmem:[#allocation72_spill] sm:$0xff] }
 0x6c1   :  { %v2176_v18 = vadd.f32 %v2175_v26, %v7139_v30  ;;  %v2247_v63 = vadd.f32 %v2246_v56, %v7321_v5 }
 0x6c2   :  { %v3438_v6 = vmul.f32 -1.442695, %v2174_v0 }
 0x6c3   :  { %v3439_v59 = vmul.f32 -1.442695, %v2176_v18  ;;  %v3440_v4 = vmul.f32 -1.442695, %v2247_v63 }
 0x6c4   :  { %5291 = vpow2.f32 %v3438_v6 }
 0x6c5   :  { %5293 = vpow2.f32 %v3439_v59 }
 0x6c6   :  { %5295 = vpow2.f32 %v3440_v4 }
 0x6c7   :  { %5297 = vtanh.f32 %v2245_v19 }
 0x6ce   :  { %v5292_v2 = vpop.eup %5291 }
 0x6cf   :  { %v5294_v37 = vpop.eup %5293  ;;  %v2252_v11 = vadd.f32 1.0, %v5292_v2 }
 0x6d0   :  { %v2258_v38 = vadd.f32 1.0, %v5294_v37  ;;  %v5296_v50 = vpop.eup %5295 }
 0x6d1   :  { %5299 = vrcp.f32 %v2252_v11  ;;  %v5298_v1 = vpop.eup %5297  ;;  %v2265_v6 = vadd.f32 1.0, %v5296_v50 }
 0x6d2   :  { %5301 = vrcp.f32 %v2258_v38 }
 0x6d3   :  { %5303 = vrcp.f32 %v2265_v6 }
 0x6db   :  { %v5300_v26 = vpop.eup %5299 }
 0x6dc   :  { %v5302_v0 = vpop.eup %5301  ;;  %v2269_v18 = vmul.f32 %v5300_v26, %v5298_v1  ;;  %v7323_v1 = vld [vmem:[#allocation74_spill] sm:$0xff] }
 0x6dd   :  { %v2268_v59 = vmul.f32 %v5302_v0, %v6448_v21  ;;  %v5304_v21 = vpop.eup %5303 }
 0x6df   :  { %v2339_v56 = vpop.f32.mrb[10].mxu0  ;;  %v2410_v63 = vpop.f32.mrb[10].mxu1  ;;  %v6562_v5 = vadd.f32 %v2269_v18, %v2268_v59 }
 0x6e0   :  { %v5082_v2 = vadd.f32 %v2339_v56, %v7322_v8  ;;  %v2341_v4 = vpop.f32.mrb[11].mxu0  ;;  %v2412_v19 = vpop.f32.mrb[11].mxu1  ;;  %v5098_v18 = vadd.f32 %v2410_v63, %v5983_v3 }
 0x6e1   :  { %v5083_v37 = vadd.f32 %v2341_v4, %v7082_v55  ;;  %5305 = vtanh.f32 %v6562_v5  ;;  %v5099_v50 = vadd.f32 %v2412_v19, %v7323_v1 }
 0x6e2   :  { %v3441_v38 = vmul.f32 -1.442695, %v5082_v2 }
 0x6e3   :  { %v3442_v11 = vmul.f32 -1.442695, %v5083_v37  ;;  %v3443_v0 = vmul.f32 -1.442695, %v5099_v50 }
 0x6e4   :  { %5307 = vpow2.f32 %v3441_v38 }
 0x6e5   :  { %5309 = vpow2.f32 %v3442_v11 }
 0x6e6   :  { %5311 = vpow2.f32 %v3443_v0 }
 0x6e7   :  { %5313 = vtanh.f32 %v5098_v18  ;;  %v7327_v18 = vld [vmem:[#allocation21_spill] sm:$0xff] }
 0x6eb   :  { %v5306_v26 = vpop.eup %5305 }
 0x6ec   :  { %v2272_v6 = vmul.f32 %v5306_v26, %v5304_v21 }
 0x6ee   :  { %v5308_v59 = vpop.eup %5307  ;;  %2507 = vmatprep.mubr.f32.mxu0 %v2272_v6  ;;  %2578 = vmatprep.mubr.f32.mxu1 %v2272_v6  ;;  %v7328_v6 = vld [vmem:[#allocation22_spill] sm:$0xff] }
 0x6ef   :  { %v5310_v56 = vpop.eup %5309  ;;  %v2422_v8 = vadd.f32 1.0, %v5308_v59  ;;  %v7329_v59 = vld [vmem:[#allocation23_spill] sm:$0xff] }
 0x6f0   :  { %v2428_v4 = vadd.f32 1.0, %v5310_v56  ;;  %v5312_v2 = vpop.eup %5311  ;;  %v7330_v56 = vld [vmem:[#allocation24_spill] sm:$0xff] }
 0x6f1   :  { %5315 = vrcp.f32 %v2422_v8  ;;  %v5314_v37 = vpop.eup %5313  ;;  %v2435_v1 = vadd.f32 1.0, %v5312_v2  ;;  %v7325_v8 = vld [vmem:[#allocation19_spill] sm:$0xff]  ;;  %v7332_v2 = vld [vmem:[#allocation26_spill] sm:$0xff] }
 0x6f2   :  { %5317 = vrcp.f32 %v2428_v4  ;;  %v7331_v4 = vld [vmem:[#allocation25_spill] sm:$0xff] }
 0x6f3   :  { %5319 = vrcp.f32 %v2435_v1  ;;  %v7326_v1 = vld [vmem:[#allocation20_spill] sm:$0xff] }
 0x6fb   :  { %v5316_v38 = vpop.eup %5315 }
 0x6fc   :  { %v5318_v19 = vpop.eup %5317  ;;  %v2439_v11 = vmul.f32 %v5316_v38, %v5314_v37  ;;  %v7333_v37 = vld [vmem:[#allocation27_spill] sm:$0xff]  ;;  %v7334_v38 = vld [vmem:[#allocation28_spill] sm:$0xff] }
 0x6fd   :  { %v2438_v50 = vmul.f32 %v5318_v19, %v6456_v43  ;;  %v5320_v21 = vpop.eup %5319  ;;  %v7324_v43 = vld [vmem:[#allocation18_spill] sm:$0xff]  ;;  %v7335_v19 = vld [vmem:[#allocation29_spill] sm:$0xff] }
 0x6ff   :  { %v6570_v63 = vadd.f32 %v2439_v11, %v2438_v50  ;;  %v7336_v11 = vld [vmem:[#allocation30_spill] sm:$0xff]  ;;  %v7337_v50 = vld [vmem:[#allocation31_spill] sm:$0xff] }
 0x701   :  { %5321 = vtanh.f32 %v6570_v63 }
 0x70b   :  { %v5322_v26 = vpop.eup %5321 }
 0x70c   :  { %v2442_v0 = vmul.f32 %v5322_v26, %v5320_v21  ;;  %v7338_v21 = vld [vmem:[#allocation32_spill] sm:$0xff]  ;;  %v7339_v26 = vld [vmem:[#allocation33_spill] sm:$0xff] }
 0x70e   :  { %2508 = vmatmul.mubr.f32.vlgmr.msra.gmra.mrb[26].mxu0 %v2442_v0  ;;  %2579 = vmatmul.mubr.f32.vlgmr.msra.gmra.mrb[26].mxu1 %v2442_v0 }
 0x70f   :  { %4667 = vmatpush1.bf16.msra.mxu0 %v5623_v23  ;;  %4699 = vmatpush1.bf16.msra.mxu1 %v5630_v27 }
 0x710   :  { %4669 = vmatprep.subr.bf16.mxu0 %v5634_v31  ;;  %4701 = vmatprep.subr.bf16.mxu1 %v5638_v35 }
 0x711   :  { %2673 = vmatprep.mubr.f32.mxu0 %v7023_v25  ;;  %2744 = vmatprep.mubr.f32.mxu1 %v7023_v25 }
 0x713   :  { %4671 = vmatpush1.bf16.msra.mxu0 %v5640_v36  ;;  %4703 = vmatpush1.bf16.msra.mxu1 %v5644_v39 }
 0x714   :  { %4673 = vmatprep.subr.bf16.mxu0 %v5653_v47  ;;  %4705 = vmatprep.subr.bf16.mxu1 %v5657_v48 }
 0x717   :  { %4675 = vmatpush1.bf16.msra.mxu0 %v5659_v49  ;;  %4707 = vmatpush1.bf16.msra.mxu1 %v5663_v53 }
 0x718   :  { %4677 = vmatprep.subr.bf16.mxu0 %v5672_v60  ;;  %4709 = vmatprep.subr.bf16.mxu1 %v5676_v61 }
 0x71b   :  { %4679 = vmatpush1.bf16.msra.mxu0 %v5678_v62  ;;  %4711 = vmatpush1.bf16.msra.mxu1 %v5682_v7 }
 0x71c   :  { %4681 = vmatprep.subr.bf16.mxu0 %v5691_v14  ;;  %4713 = vmatprep.subr.bf16.mxu1 %v5695_v15 }
 0x71f   :  { %4683 = vmatpush1.bf16.msra.mxu0 %v5697_v16  ;;  %4715 = vmatpush1.bf16.msra.mxu1 %v5701_v20 }
 0x720   :  { %4685 = vmatprep.subr.bf16.mxu0 %v5710_v32  ;;  %4717 = vmatprep.subr.bf16.mxu1 %v5714_v33 }
 0x723   :  { %4687 = vmatpush1.bf16.msra.mxu0 %v5716_v34  ;;  %4719 = vmatpush1.bf16.msra.mxu1 %v5720_v41 }
 0x724   :  { %4689 = vmatprep.subr.bf16.mxu0 %v5729_v51  ;;  %4721 = vmatprep.subr.bf16.mxu1 %v5733_v52 }
 0x727   :  { %4691 = vmatpush1.bf16.msra.mxu0 %v5735_v54  ;;  %4723 = vmatpush1.bf16.msra.mxu1 %v5739_v58 }
 0x728   :  { %4693 = vmatprep.subr.bf16.mxu0 %v5748_v10  ;;  %4725 = vmatprep.subr.bf16.mxu1 %v5752_v13 }
 0x72b   :  { %4695 = vmatpush1.bf16.msra.mxu0 %v5754_v17  ;;  %4727 = vmatpush1.bf16.msra.mxu1 %v5758_v24 }
 0x72c   :  { %4729 = vmatprep.subr.bf16.mxu0 %v5762_v29  ;;  %4793 = vmatprep.subr.bf16.mxu1 %v5766_v40 }
 0x72e   :  { %2674 = vmatmul.mubr.f32.vlgmr.msra.gmra.mrb[12].mxu0 %v2442_v0  ;;  %2745 = vmatmul.mubr.f32.vlgmr.msra.gmra.mrb[12].mxu1 %v2442_v0  ;;  %v7340_v0 = vld [vmem:[#allocation34_spill] sm:$0xff] }
 0x72f   :  { %4731 = vmatpush1.bf16.msra.mxu0 %v5770_v44  ;;  %4795 = vmatpush1.bf16.msra.mxu1 %v5774_v45 }
 0x730   :  { %4733 = vmatprep.subr.bf16.mxu0 %v5776_v46  ;;  %4797 = vmatprep.subr.bf16.mxu1 %v5780_v57 }
 0x733   :  { %4735 = vmatpush1.bf16.msra.mxu0 %v5786_v9  ;;  %4799 = vmatpush1.bf16.msra.mxu1 %v7024_v22 }
 0x734   :  { %4737 = vmatprep.subr.bf16.mxu0 %v5792_v12  ;;  %4801 = vmatprep.subr.bf16.mxu1 %v7025_v28 }
 0x737   :  { %4739 = vmatpush1.bf16.msra.mxu0 %v7324_v43  ;;  %4803 = vmatpush1.bf16.msra.mxu1 %v7325_v8 }
 0x738   :  { %4741 = vmatprep.subr.bf16.mxu0 %v7326_v1  ;;  %4805 = vmatprep.subr.bf16.mxu1 %v7327_v18 }
 0x73b   :  { %4743 = vmatpush1.bf16.msra.mxu0 %v7328_v6  ;;  %4807 = vmatpush1.bf16.msra.mxu1 %v7329_v59  ;;  %v7380_v59 = vld [vmem:[#allocation16_spill] sm:$0xff] }
 0x73c   :  { %4745 = vmatprep.subr.bf16.mxu0 %v7330_v56  ;;  %4809 = vmatprep.subr.bf16.mxu1 %v7331_v4  ;;  %v7341_v56 = vld [vmem:[#allocation35_spill] sm:$0xff]  ;;  %v7342_v4 = vld [vmem:[#allocation36_spill] sm:$0xff] }
 0x73f   :  { %4747 = vmatpush1.bf16.msra.mxu0 %v7332_v2  ;;  %4811 = vmatpush1.bf16.msra.mxu1 %v7333_v37  ;;  %v7343_v2 = vld [vmem:[#allocation37_spill] sm:$0xff]  ;;  %v7344_v37 = vld [vmem:[#allocation38_spill] sm:$0xff] }
 0x740   :  { %4749 = vmatprep.subr.bf16.mxu0 %v7334_v38  ;;  %4813 = vmatprep.subr.bf16.mxu1 %v7335_v19  ;;  %v7345_v38 = vld [vmem:[#allocation39_spill] sm:$0xff]  ;;  %v7346_v19 = vld [vmem:[#allocation40_spill] sm:$0xff] }
 0x743   :  { %4751 = vmatpush1.bf16.msra.mxu0 %v7336_v11  ;;  %4815 = vmatpush1.bf16.msra.mxu1 %v7337_v50  ;;  %v7347_v11 = vld [vmem:[#allocation41_spill] sm:$0xff]  ;;  %v7348_v50 = vld [vmem:[#allocation42_spill] sm:$0xff] }
 0x744   :  { %4753 = vmatprep.subr.bf16.mxu0 %v7338_v21  ;;  %4817 = vmatprep.subr.bf16.mxu1 %v7339_v26  ;;  %v7349_v21 = vld [vmem:[#allocation43_spill] sm:$0xff]  ;;  %v7350_v26 = vld [vmem:[#allocation44_spill] sm:$0xff] }
 0x747   :  { %4755 = vmatpush1.bf16.msra.mxu0 %v7340_v0  ;;  %4819 = vmatpush1.bf16.msra.mxu1 %v7341_v56  ;;  %v7351_v0 = vld [vmem:[#allocation45_spill] sm:$0xff]  ;;  %v7352_v56 = vld [vmem:[#allocation46_spill] sm:$0xff] }
 0x748   :  { %4757 = vmatprep.subr.bf16.mxu0 %v7342_v4  ;;  %4821 = vmatprep.subr.bf16.mxu1 %v7343_v2  ;;  %v7353_v4 = vld [vmem:[#allocation47_spill] sm:$0xff]  ;;  %v7354_v2 = vld [vmem:[#allocation48_spill] sm:$0xff] }
 0x74b   :  { %4759 = vmatpush1.bf16.msra.mxu0 %v7344_v37  ;;  %4823 = vmatpush1.bf16.msra.mxu1 %v7345_v38  ;;  %v7355_v37 = vld [vmem:[#allocation49_spill] sm:$0xff]  ;;  %v7356_v38 = vld [vmem:[#allocation50_spill] sm:$0xff] }
 0x74c   :  { %4761 = vmatprep.subr.bf16.mxu0 %v7346_v19  ;;  %4825 = vmatprep.subr.bf16.mxu1 %v7347_v11  ;;  %v7357_v19 = vld [vmem:[#allocation51_spill] sm:$0xff]  ;;  %v7358_v11 = vld [vmem:[#allocation52_spill] sm:$0xff] }
 0x74f   :  { %4763 = vmatpush1.bf16.msra.mxu0 %v7348_v50  ;;  %4827 = vmatpush1.bf16.msra.mxu1 %v7349_v21  ;;  %v7359_v50 = vld [vmem:[#allocation53_spill] sm:$0xff]  ;;  %v7360_v21 = vld [vmem:[#allocation54_spill] sm:$0xff] }
 0x750   :  { %4765 = vmatprep.subr.bf16.mxu0 %v7350_v26  ;;  %4829 = vmatprep.subr.bf16.mxu1 %v7351_v0  ;;  %v7361_v26 = vld [vmem:[#allocation55_spill] sm:$0xff]  ;;  %v7362_v0 = vld [vmem:[#allocation56_spill] sm:$0xff] }
 0x753   :  { %4767 = vmatpush1.bf16.msra.mxu0 %v7352_v56  ;;  %4831 = vmatpush1.bf16.msra.mxu1 %v7353_v4  ;;  %v7363_v56 = vld [vmem:[#allocation57_spill] sm:$0xff]  ;;  %v7364_v4 = vld [vmem:[#allocation58_spill] sm:$0xff] }
 0x754   :  { %4769 = vmatprep.subr.bf16.mxu0 %v7354_v2  ;;  %4833 = vmatprep.subr.bf16.mxu1 %v7355_v37  ;;  %v7365_v2 = vld [vmem:[#allocation59_spill] sm:$0xff]  ;;  %v7366_v37 = vld [vmem:[#allocation60_spill] sm:$0xff] }
 0x757   :  { %4771 = vmatpush1.bf16.msra.mxu0 %v7356_v38  ;;  %4835 = vmatpush1.bf16.msra.mxu1 %v7357_v19  ;;  %v7367_v38 = vld [vmem:[#allocation61_spill] sm:$0xff]  ;;  %v7368_v19 = vld [vmem:[#allocation62_spill] sm:$0xff] }
 0x758   :  { %4773 = vmatprep.subr.bf16.mxu0 %v7358_v11  ;;  %4837 = vmatprep.subr.bf16.mxu1 %v7359_v50  ;;  %v7369_v11 = vld [vmem:[#allocation63_spill] sm:$0xff]  ;;  %v7370_v50 = vld [vmem:[#allocation64_spill] sm:$0xff] }
 0x75b   :  { %4775 = vmatpush1.bf16.msra.mxu0 %v7360_v21  ;;  %4839 = vmatpush1.bf16.msra.mxu1 %v7361_v26  ;;  %v7371_v21 = vld [vmem:[#allocation65_spill] sm:$0xff]  ;;  %v7372_v26 = vld [vmem:[#allocation66_spill] sm:$0xff] }
 0x75c   :  { %4777 = vmatprep.subr.bf16.mxu0 %v7362_v0  ;;  %4841 = vmatprep.subr.bf16.mxu1 %v7363_v56  ;;  %v7373_v0 = vld [vmem:[#allocation67_spill] sm:$0xff]  ;;  %v7374_v56 = vld [vmem:[#allocation68_spill] sm:$0xff] }
 0x75f   :  { %4779 = vmatpush1.bf16.msra.mxu0 %v7364_v4  ;;  %4843 = vmatpush1.bf16.msra.mxu1 %v7365_v2  ;;  %v7375_v4 = vld [vmem:[#allocation69_spill] sm:$0xff]  ;;  %v7376_v2 = vld [vmem:[#allocation70_spill] sm:$0xff] }
 0x760   :  { %4781 = vmatprep.subr.bf16.mxu0 %v7366_v37  ;;  %4845 = vmatprep.subr.bf16.mxu1 %v7367_v38  ;;  %v7377_v37 = vld [vmem:[#allocation71_spill] sm:$0xff]  ;;  %v7378_v38 = vld [vmem:[#allocation14_spill] sm:$0xff] }
 0x763   :  { %4783 = vmatpush1.bf16.msra.mxu0 %v7368_v19  ;;  %4847 = vmatpush1.bf16.msra.mxu1 %v7369_v11  ;;  %v7379_v19 = vld [vmem:[#allocation15_spill] sm:$0xff] }
 0x764   :  { %4785 = vmatprep.subr.bf16.mxu0 %v7370_v50  ;;  %4849 = vmatprep.subr.bf16.mxu1 %v7371_v21 }
 0x767   :  { %4787 = vmatpush1.bf16.msra.mxu0 %v7372_v26  ;;  %4851 = vmatpush1.bf16.msra.mxu1 %v7373_v0 }
 0x768   :  { %4789 = vmatprep.subr.bf16.mxu0 %v7374_v56  ;;  %4853 = vmatprep.subr.bf16.mxu1 %v7375_v4  ;;  %v7381_v4 = vld [vmem:[#allocation13_spill] sm:$0xff] }
 0x76b   :  { %4791 = vmatpush1.bf16.msra.mxu0 %v7376_v2  ;;  %4855 = vmatpush1.bf16.msra.mxu1 %v7377_v37 }
 0x76c   :  { %4857 = vmatprep.subr.bf16.mxu0 %v7378_v38  ;;  %4889 = vmatprep.subr.bf16.mxu1 %v7379_v19 }
 0x7e1   :  { %v2509_v11 = vpop.f32.mrb[26].mxu0  ;;  %v2580_v50 = vpop.f32.mrb[26].mxu1 }
 0x7e2   :  { %v2510_v21 = vadd.f32 %v2509_v11, %v7380_v59  ;;  %v2511_v6 = vpop.f32.mrb[27].mxu0  ;;  %v2582_v26 = vpop.f32.mrb[27].mxu1  ;;  %v2581_v37 = vadd.f32 %v2580_v50, %v7141_v42  ;;  %v7382_v50 = vld [vmem:[#allocation72_spill] sm:$0xff] }
 0x7e3   :  { %v2512_v0 = vadd.f32 %v2511_v6, %v7139_v30  ;;  %v2583_v2 = vadd.f32 %v2582_v26, %v7381_v4 }
 0x7e4   :  { %v3444_v18 = vmul.f32 -1.442695, %v2510_v21 }
 0x7e5   :  { %v3445_v56 = vmul.f32 -1.442695, %v2512_v0  ;;  %v3446_v1 = vmul.f32 -1.442695, %v2583_v2 }
 0x7e6   :  { %5323 = vpow2.f32 %v3444_v18 }
 0x7e7   :  { %5325 = vpow2.f32 %v3445_v56 }
 0x7e8   :  { %5327 = vpow2.f32 %v3446_v1 }
 0x7e9   :  { %5329 = vtanh.f32 %v2581_v37 }
 0x7f0   :  { %v5324_v38 = vpop.eup %5323 }
 0x7f1   :  { %v5326_v8 = vpop.eup %5325  ;;  %v2588_v19 = vadd.f32 1.0, %v5324_v38 }
 0x7f2   :  { %v2594_v43 = vadd.f32 1.0, %v5326_v8  ;;  %v5328_v11 = vpop.eup %5327 }
 0x7f3   :  { %5331 = vrcp.f32 %v2588_v19  ;;  %v5330_v59 = vpop.eup %5329  ;;  %v2601_v18 = vadd.f32 1.0, %v5328_v11 }
 0x7f4   :  { %5333 = vrcp.f32 %v2594_v43 }
 0x7f5   :  { %5335 = vrcp.f32 %v2601_v18 }
 0x7fd   :  { %v5332_v6 = vpop.eup %5331 }
 0x7fe   :  { %v5334_v21 = vpop.eup %5333  ;;  %v2605_v0 = vmul.f32 %v5332_v6, %v5330_v59  ;;  %v7383_v59 = vld [vmem:[#allocation74_spill] sm:$0xff] }
 0x7ff   :  { %v2604_v56 = vmul.f32 %v5334_v21, %v6562_v5  ;;  %v5336_v5 = vpop.eup %5335 }
 0x801   :  { %v2675_v26 = vpop.f32.mrb[12].mxu0  ;;  %v2746_v2 = vpop.f32.mrb[12].mxu1  ;;  %v6676_v4 = vadd.f32 %v2605_v0, %v2604_v56 }
 0x802   :  { %v5084_v38 = vadd.f32 %v2675_v26, %v7382_v50  ;;  %v2677_v1 = vpop.f32.mrb[13].mxu0  ;;  %v2748_v37 = vpop.f32.mrb[13].mxu1  ;;  %v5100_v0 = vadd.f32 %v2746_v2, %v5983_v3 }
 0x803   :  { %v5085_v8 = vadd.f32 %v2677_v1, %v7082_v55  ;;  %5337 = vtanh.f32 %v6676_v4  ;;  %v5101_v11 = vadd.f32 %v2748_v37, %v7383_v59 }
 0x804   :  { %v3447_v43 = vmul.f32 -1.442695, %v5084_v38 }
 0x805   :  { %v3448_v19 = vmul.f32 -1.442695, %v5085_v8  ;;  %v3449_v21 = vmul.f32 -1.442695, %v5101_v11 }
 0x806   :  { %5339 = vpow2.f32 %v3447_v43 }
 0x807   :  { %5341 = vpow2.f32 %v3448_v19 }
 0x808   :  { %5343 = vpow2.f32 %v3449_v21 }
 0x809   :  { %5345 = vtanh.f32 %v5100_v0  ;;  %v7427_v0 = vld [vmem:[#allocation61_spill] sm:$0xff] }
 0x80d   :  { %v5338_v6 = vpop.eup %5337 }
 0x80e   :  { %v2608_v18 = vmul.f32 %v5338_v6, %v5336_v5 }
 0x810   :  { %v5340_v56 = vpop.eup %5339  ;;  %2843 = vmatprep.mubr.f32.mxu0 %v2608_v18  ;;  %2914 = vmatprep.mubr.f32.mxu1 %v2608_v18  ;;  %v7428_v18 = vld [vmem:[#allocation62_spill] sm:$0xff] }
 0x811   :  { %v5342_v26 = vpop.eup %5341  ;;  %v2758_v50 = vadd.f32 1.0, %v5340_v56  ;;  %v7429_v56 = vld [vmem:[#allocation63_spill] sm:$0xff] }
 0x812   :  { %v2764_v1 = vadd.f32 1.0, %v5342_v26  ;;  %v5344_v38 = vpop.eup %5343  ;;  %v7430_v26 = vld [vmem:[#allocation64_spill] sm:$0xff] }
 0x813   :  { %5347 = vrcp.f32 %v2758_v50  ;;  %v5346_v8 = vpop.eup %5345  ;;  %v2771_v59 = vadd.f32 1.0, %v5344_v38  ;;  %v7425_v50 = vld [vmem:[#allocation59_spill] sm:$0xff]  ;;  %v7432_v38 = vld [vmem:[#allocation66_spill] sm:$0xff] }
 0x814   :  { %5349 = vrcp.f32 %v2764_v1  ;;  %v7431_v1 = vld [vmem:[#allocation65_spill] sm:$0xff] }
 0x815   :  { %5351 = vrcp.f32 %v2771_v59  ;;  %v7426_v59 = vld [vmem:[#allocation60_spill] sm:$0xff] }
 0x81d   :  { %v5348_v43 = vpop.eup %5347 }
 0x81e   :  { %v5350_v37 = vpop.eup %5349  ;;  %v2775_v19 = vmul.f32 %v5348_v43, %v5346_v8  ;;  %v7433_v8 = vld [vmem:[#allocation67_spill] sm:$0xff]  ;;  %v7434_v43 = vld [vmem:[#allocation68_spill] sm:$0xff] }
 0x81f   :  { %v2774_v11 = vmul.f32 %v5350_v37, %v6570_v63  ;;  %v5352_v5 = vpop.eup %5351  ;;  %v7424_v63 = vld [vmem:[#allocation58_spill] sm:$0xff]  ;;  %v7435_v37 = vld [vmem:[#allocation69_spill] sm:$0xff] }
 0x821   :  { %v6684_v2 = vadd.f32 %v2775_v19, %v2774_v11  ;;  %v7436_v19 = vld [vmem:[#allocation70_spill] sm:$0xff]  ;;  %v7437_v11 = vld [vmem:[#allocation71_spill] sm:$0xff] }
 0x823   :  { %5353 = vtanh.f32 %v6684_v2 }
 0x82d   :  { %v5354_v6 = vpop.eup %5353 }
 0x82e   :  { %v2778_v21 = vmul.f32 %v5354_v6, %v5352_v5 }
 0x830   :  { %2844 = vmatmul.mubr.f32.vlgmr.msra.gmra.mrb[28].mxu0 %v2778_v21  ;;  %2915 = vmatmul.mubr.f32.vlgmr.msra.gmra.mrb[28].mxu1 %v2778_v21 }
 0x831   :  { %4859 = vmatpush1.bf16.msra.mxu0 %v5623_v23  ;;  %4891 = vmatpush1.bf16.msra.mxu1 %v5630_v27  ;;  %v7384_v23 = vld [vmem:[#allocation18_spill] sm:$0xff]  ;;  %v7385_v27 = vld [vmem:[#allocation19_spill] sm:$0xff] }
 0x832   :  { %4861 = vmatprep.subr.bf16.mxu0 %v5634_v31  ;;  %4893 = vmatprep.subr.bf16.mxu1 %v5638_v35  ;;  %v7386_v31 = vld [vmem:[#allocation20_spill] sm:$0xff]  ;;  %v7387_v35 = vld [vmem:[#allocation21_spill] sm:$0xff] }
 0x833   :  { %3009 = vmatprep.mubr.f32.mxu0 %v7023_v25  ;;  %3080 = vmatprep.mubr.f32.mxu1 %v7023_v25 }
 0x835   :  { %4863 = vmatpush1.bf16.msra.mxu0 %v5640_v36  ;;  %4895 = vmatpush1.bf16.msra.mxu1 %v5644_v39  ;;  %v7388_v36 = vld [vmem:[#allocation22_spill] sm:$0xff]  ;;  %v7389_v39 = vld [vmem:[#allocation23_spill] sm:$0xff] }
 0x836   :  { %4865 = vmatprep.subr.bf16.mxu0 %v5653_v47  ;;  %4897 = vmatprep.subr.bf16.mxu1 %v5657_v48  ;;  %v7390_v47 = vld [vmem:[#allocation24_spill] sm:$0xff]  ;;  %v7391_v48 = vld [vmem:[#allocation25_spill] sm:$0xff] }
 0x839   :  { %4867 = vmatpush1.bf16.msra.mxu0 %v5659_v49  ;;  %4899 = vmatpush1.bf16.msra.mxu1 %v5663_v53  ;;  %v7392_v49 = vld [vmem:[#allocation26_spill] sm:$0xff]  ;;  %v7393_v53 = vld [vmem:[#allocation27_spill] sm:$0xff] }
 0x83a   :  { %4869 = vmatprep.subr.bf16.mxu0 %v5672_v60  ;;  %4901 = vmatprep.subr.bf16.mxu1 %v5676_v61  ;;  %v7394_v60 = vld [vmem:[#allocation28_spill] sm:$0xff]  ;;  %v7395_v61 = vld [vmem:[#allocation29_spill] sm:$0xff] }
 0x83d   :  { %4871 = vmatpush1.bf16.msra.mxu0 %v5678_v62  ;;  %4903 = vmatpush1.bf16.msra.mxu1 %v5682_v7  ;;  %v7396_v62 = vld [vmem:[#allocation30_spill] sm:$0xff]  ;;  %v7397_v7 = vld [vmem:[#allocation31_spill] sm:$0xff] }
 0x83e   :  { %4873 = vmatprep.subr.bf16.mxu0 %v5691_v14  ;;  %4905 = vmatprep.subr.bf16.mxu1 %v5695_v15  ;;  %v7398_v14 = vld [vmem:[#allocation32_spill] sm:$0xff]  ;;  %v7399_v15 = vld [vmem:[#allocation33_spill] sm:$0xff] }
 0x841   :  { %4875 = vmatpush1.bf16.msra.mxu0 %v5697_v16  ;;  %4907 = vmatpush1.bf16.msra.mxu1 %v5701_v20  ;;  %v7400_v16 = vld [vmem:[#allocation34_spill] sm:$0xff]  ;;  %v7401_v20 = vld [vmem:[#allocation35_spill] sm:$0xff] }
 0x842   :  { %4877 = vmatprep.subr.bf16.mxu0 %v5710_v32  ;;  %4909 = vmatprep.subr.bf16.mxu1 %v5714_v33  ;;  %v7402_v32 = vld [vmem:[#allocation36_spill] sm:$0xff]  ;;  %v7403_v33 = vld [vmem:[#allocation37_spill] sm:$0xff] }
 0x845   :  { %4879 = vmatpush1.bf16.msra.mxu0 %v5716_v34  ;;  %4911 = vmatpush1.bf16.msra.mxu1 %v5720_v41  ;;  %v7404_v34 = vld [vmem:[#allocation38_spill] sm:$0xff]  ;;  %v7405_v41 = vld [vmem:[#allocation39_spill] sm:$0xff] }
 0x846   :  { %4881 = vmatprep.subr.bf16.mxu0 %v5729_v51  ;;  %4913 = vmatprep.subr.bf16.mxu1 %v5733_v52  ;;  %v7406_v51 = vld [vmem:[#allocation40_spill] sm:$0xff]  ;;  %v7407_v52 = vld [vmem:[#allocation41_spill] sm:$0xff] }
 0x849   :  { %4883 = vmatpush1.bf16.msra.mxu0 %v5735_v54  ;;  %4915 = vmatpush1.bf16.msra.mxu1 %v5739_v58  ;;  %v7408_v54 = vld [vmem:[#allocation42_spill] sm:$0xff]  ;;  %v7409_v58 = vld [vmem:[#allocation43_spill] sm:$0xff] }
 0x84a   :  { %4885 = vmatprep.subr.bf16.mxu0 %v5748_v10  ;;  %4917 = vmatprep.subr.bf16.mxu1 %v5752_v13  ;;  %v7410_v10 = vld [vmem:[#allocation44_spill] sm:$0xff]  ;;  %v7411_v13 = vld [vmem:[#allocation45_spill] sm:$0xff] }
 0x84d   :  { %4887 = vmatpush1.bf16.msra.mxu0 %v5754_v17  ;;  %4919 = vmatpush1.bf16.msra.mxu1 %v5758_v24  ;;  %v7412_v17 = vld [vmem:[#allocation46_spill] sm:$0xff]  ;;  %v7413_v24 = vld [vmem:[#allocation47_spill] sm:$0xff] }
 0x84e   :  { %4921 = vmatprep.subr.bf16.mxu0 %v5762_v29  ;;  %4985 = vmatprep.subr.bf16.mxu1 %v5766_v40  ;;  %v7414_v29 = vld [vmem:[#allocation48_spill] sm:$0xff]  ;;  %v7415_v40 = vld [vmem:[#allocation49_spill] sm:$0xff] }
 0x850   :  { %3010 = vmatmul.mubr.f32.vlgmr.msra.gmra.mrb[14].mxu0 %v2778_v21  ;;  %3081 = vmatmul.mubr.f32.vlgmr.msra.gmra.mrb[14].mxu1 %v2778_v21  ;;  %v7438_v21 = vld [vmem:[#allocation16_spill] sm:$0xff] }
 0x851   :  { %4923 = vmatpush1.bf16.msra.mxu0 %v5770_v44  ;;  %4987 = vmatpush1.bf16.msra.mxu1 %v5774_v45  ;;  %v7416_v44 = vld [vmem:[#allocation50_spill] sm:$0xff]  ;;  %v7417_v45 = vld [vmem:[#allocation51_spill] sm:$0xff] }
 0x852   :  { %4925 = vmatprep.subr.bf16.mxu0 %v5776_v46  ;;  %4989 = vmatprep.subr.bf16.mxu1 %v5780_v57  ;;  %v7418_v46 = vld [vmem:[#allocation52_spill] sm:$0xff]  ;;  %v7419_v57 = vld [vmem:[#allocation53_spill] sm:$0xff] }
 0x855   :  { %4927 = vmatpush1.bf16.msra.mxu0 %v5786_v9  ;;  %4991 = vmatpush1.bf16.msra.mxu1 %v7024_v22  ;;  %v7420_v9 = vld [vmem:[#allocation54_spill] sm:$0xff]  ;;  %v7422_v22 = vld [vmem:[#allocation56_spill] sm:$0xff] }
 0x856   :  { %4929 = vmatprep.subr.bf16.mxu0 %v5792_v12  ;;  %4993 = vmatprep.subr.bf16.mxu1 %v7025_v28  ;;  %v7421_v12 = vld [vmem:[#allocation55_spill] sm:$0xff]  ;;  %v7423_v28 = vld [vmem:[#allocation57_spill] sm:$0xff] }
 0x859   :  { %4931 = vmatpush1.bf16.msra.mxu0 %v7384_v23  ;;  %4995 = vmatpush1.bf16.msra.mxu1 %v7385_v27 }
 0x85a   :  { %4933 = vmatprep.subr.bf16.mxu0 %v7386_v31  ;;  %4997 = vmatprep.subr.bf16.mxu1 %v7387_v35 }
 0x85d   :  { %4935 = vmatpush1.bf16.msra.mxu0 %v7388_v36  ;;  %4999 = vmatpush1.bf16.msra.mxu1 %v7389_v39 }
 0x85e   :  { %4937 = vmatprep.subr.bf16.mxu0 %v7390_v47  ;;  %5001 = vmatprep.subr.bf16.mxu1 %v7391_v48  ;;  %v7439_v47 = vld [vmem:[#allocation13_spill] sm:$0xff] }
 0x861   :  { %4939 = vmatpush1.bf16.msra.mxu0 %v7392_v49  ;;  %5003 = vmatpush1.bf16.msra.mxu1 %v7393_v53 }
 0x862   :  { %4941 = vmatprep.subr.bf16.mxu0 %v7394_v60  ;;  %5005 = vmatprep.subr.bf16.mxu1 %v7395_v61 }
 0x865   :  { %4943 = vmatpush1.bf16.msra.mxu0 %v7396_v62  ;;  %5007 = vmatpush1.bf16.msra.mxu1 %v7397_v7 }
 0x866   :  { %4945 = vmatprep.subr.bf16.mxu0 %v7398_v14  ;;  %5009 = vmatprep.subr.bf16.mxu1 %v7399_v15 }
 0x869   :  { %4947 = vmatpush1.bf16.msra.mxu0 %v7400_v16  ;;  %5011 = vmatpush1.bf16.msra.mxu1 %v7401_v20 }
 0x86a   :  { %4949 = vmatprep.subr.bf16.mxu0 %v7402_v32  ;;  %5013 = vmatprep.subr.bf16.mxu1 %v7403_v33 }
 0x86d   :  { %4951 = vmatpush1.bf16.msra.mxu0 %v7404_v34  ;;  %5015 = vmatpush1.bf16.msra.mxu1 %v7405_v41 }
 0x86e   :  { %4953 = vmatprep.subr.bf16.mxu0 %v7406_v51  ;;  %5017 = vmatprep.subr.bf16.mxu1 %v7407_v52 }
 0x871   :  { %4955 = vmatpush1.bf16.msra.mxu0 %v7408_v54  ;;  %5019 = vmatpush1.bf16.msra.mxu1 %v7409_v58  ;;  %v7440_v54 = vld [vmem:[#allocation72_spill] sm:$0xff] }
 0x872   :  { %4957 = vmatprep.subr.bf16.mxu0 %v7410_v10  ;;  %5021 = vmatprep.subr.bf16.mxu1 %v7411_v13 }
 0x875   :  { %4959 = vmatpush1.bf16.msra.mxu0 %v7412_v17  ;;  %5023 = vmatpush1.bf16.msra.mxu1 %v7413_v24 }
 0x876   :  { %4961 = vmatprep.subr.bf16.mxu0 %v7414_v29  ;;  %5025 = vmatprep.subr.bf16.mxu1 %v7415_v40  ;;  %v7441_v40 = vld [vmem:[#allocation74_spill] sm:$0xff] }
 0x879   :  { %4963 = vmatpush1.bf16.msra.mxu0 %v7416_v44  ;;  %5027 = vmatpush1.bf16.msra.mxu1 %v7417_v45 }
 0x87a   :  { %4965 = vmatprep.subr.bf16.mxu0 %v7418_v46  ;;  %5029 = vmatprep.subr.bf16.mxu1 %v7419_v57 }
 0x87d   :  { %4967 = vmatpush1.bf16.msra.mxu0 %v7420_v9  ;;  %5031 = vmatpush1.bf16.msra.mxu1 %v7421_v12 }
 0x87e   :  { %4969 = vmatprep.subr.bf16.mxu0 %v7422_v22  ;;  %5033 = vmatprep.subr.bf16.mxu1 %v7423_v28 }
 0x881   :  { %4971 = vmatpush1.bf16.msra.mxu0 %v7424_v63  ;;  %5035 = vmatpush1.bf16.msra.mxu1 %v7425_v50 }
 0x882   :  { %4973 = vmatprep.subr.bf16.mxu0 %v7426_v59  ;;  %5037 = vmatprep.subr.bf16.mxu1 %v7427_v0 }
 0x885   :  { %4975 = vmatpush1.bf16.msra.mxu0 %v7428_v18  ;;  %5039 = vmatpush1.bf16.msra.mxu1 %v7429_v56 }
 0x886   :  { %4977 = vmatprep.subr.bf16.mxu0 %v7430_v26  ;;  %5041 = vmatprep.subr.bf16.mxu1 %v7431_v1 }
 0x889   :  { %4979 = vmatpush1.bf16.msra.mxu0 %v7432_v38  ;;  %5043 = vmatpush1.bf16.msra.mxu1 %v7433_v8 }
 0x88a   :  { %4981 = vmatprep.subr.bf16.mxu0 %v7434_v43  ;;  %5045 = vmatprep.subr.bf16.mxu1 %v7435_v37  ;;  %v3281_v43 = vld [vmem:[#allocation7] sm:$0xff]  ;;  %v3282_v37 = vld [vmem:[#allocation7 + $0x8] sm:$0xff] }
 0x88d   :  { %4983 = vmatpush1.bf16.msra.mxu0 %v7436_v19  ;;  %5047 = vmatpush1.bf16.msra.mxu1 %v7437_v11  ;;  %v5049_v19 = vpack.c.bf16 %v3282_v37, %v3281_v43  ;;  %v5505_v11 = vmov 0.0|0.0  }
 0x88e   :  { %5048 = vmatprep.subr.bf16.mxu0 %v5505_v11 }
 0x903   :  { %v2845_v5 = vpop.f32.mrb[28].mxu0  ;;  %v2916_v6 = vpop.f32.mrb[28].mxu1 }
 0x904   :  { %v2846_v23 = vadd.f32 %v2845_v5, %v7438_v21  ;;  %v2847_v27 = vpop.f32.mrb[29].mxu0  ;;  %v2918_v31 = vpop.f32.mrb[29].mxu1  ;;  %v2917_v53 = vadd.f32 %v2916_v6, %v7141_v42  ;;  %v3283_v5 = vld [vmem:[#allocation7 + $0x10] sm:$0xff]  ;;  %v3284_v6 = vld [vmem:[#allocation7 + $0x18] sm:$0xff] }
 0x905   :  { %v2848_v35 = vadd.f32 %v2847_v27, %v7139_v30  ;;  %v2919_v48 = vadd.f32 %v2918_v31, %v7439_v47  ;;  %v3286_v27 = vld [vmem:[#allocation7 + $0x28] sm:$0xff] }
 0x906   :  { %v3450_v36 = vmul.f32 -1.442695, %v2846_v23  ;;  %v5052_v23 = vpack.c.bf16 %v3284_v6, %v3283_v5 }
 0x907   :  { %v3451_v39 = vmul.f32 -1.442695, %v2848_v35  ;;  %v3452_v49 = vmul.f32 -1.442695, %v2919_v48  ;;  %v3287_v35 = vld [vmem:[#allocation7 + $0x30] sm:$0xff]  ;;  %v3289_v48 = vld [vmem:[#allocation7 + $0x40] sm:$0xff] }
 0x908   :  { %5355 = vpow2.f32 %v3450_v36  ;;  %v3288_v36 = vld [vmem:[#allocation7 + $0x38] sm:$0xff] }
 0x909   :  { %5357 = vpow2.f32 %v3451_v39  ;;  %v5058_v39 = vpack.c.bf16 %v3288_v36, %v3287_v35 }
 0x90a   :  { %5359 = vpow2.f32 %v3452_v49  ;;  %v3290_v49 = vld [vmem:[#allocation7 + $0x48] sm:$0xff] }
 0x90b   :  { %5361 = vtanh.f32 %v2917_v53  ;;  %v5061_v53 = vpack.c.bf16 %v3290_v49, %v3289_v48 }
 0x912   :  { %v5356_v60 = vpop.eup %5355 }
 0x913   :  { %v5358_v61 = vpop.eup %5357  ;;  %v2924_v62 = vadd.f32 1.0, %v5356_v60  ;;  %v3291_v60 = vld [vmem:[#allocation7 + $0x50] sm:$0xff] }
 0x914   :  { %v2930_v7 = vadd.f32 1.0, %v5358_v61  ;;  %v5360_v14 = vpop.eup %5359  ;;  %v3292_v61 = vld [vmem:[#allocation7 + $0x58] sm:$0xff] }
 0x915   :  { %5363 = vrcp.f32 %v2924_v62  ;;  %v5362_v15 = vpop.eup %5361  ;;  %v2937_v33 = vadd.f32 1.0, %v5360_v14  ;;  %v3293_v62 = vld [vmem:[#allocation7 + $0x60] sm:$0xff]  ;;  %v3294_v14 = vld [vmem:[#allocation7 + $0x68] sm:$0xff] }
 0x916   :  { %5365 = vrcp.f32 %v2930_v7  ;;  %v5064_v7 = vpack.c.bf16 %v3292_v61, %v3291_v60 }
 0x917   :  { %5367 = vrcp.f32 %v2937_v33 }
 0x91f   :  { %v5364_v16 = vpop.eup %5363 }
 0x920   :  { %v5366_v20 = vpop.eup %5365  ;;  %v2941_v32 = vmul.f32 %v5364_v16, %v5362_v15  ;;  %v5067_v15 = vpack.c.bf16 %v3294_v14, %v3293_v62  ;;  %v3295_v16 = vld [vmem:[#allocation7 + $0x70] sm:$0xff] }
 0x921   :  { %v2940_v34 = vmul.f32 %v5366_v20, %v6676_v4  ;;  %v5368_v4 = vpop.eup %5367  ;;  %v3296_v20 = vld [vmem:[#allocation7 + $0x78] sm:$0xff] }
 0x923   :  { %v3011_v41 = vpop.f32.mrb[14].mxu0  ;;  %v3082_v51 = vpop.f32.mrb[14].mxu1  ;;  %v6788_v52 = vadd.f32 %v2941_v32, %v2940_v34  ;;  %v5070_v32 = vpack.c.bf16 %v3296_v20, %v3295_v16 }
 0x924   :  { %v5086_v58 = vadd.f32 %v3011_v41, %v7440_v54  ;;  %v3013_v10 = vpop.f32.mrb[15].mxu0  ;;  %v3084_v13 = vpop.f32.mrb[15].mxu1  ;;  %v5102_v57 = vadd.f32 %v3082_v51, %v5983_v3 }
 0x925   :  { %v5087_v17 = vadd.f32 %v3013_v10, %v7082_v55  ;;  %5369 = vtanh.f32 %v6788_v52  ;;  %v5103_v44 = vadd.f32 %v3084_v13, %v7441_v40 }
 0x926   :  { %v3453_v24 = vmul.f32 -1.442695, %v5086_v58 }
 0x927   :  { %v3454_v29 = vmul.f32 -1.442695, %v5087_v17  ;;  %v3455_v46 = vmul.f32 -1.442695, %v5103_v44 }
 0x928   :  { %5371 = vpow2.f32 %v3453_v24 }
 0x929   :  { %5373 = vpow2.f32 %v3454_v29 }
 0x92a   :  { %5375 = vpow2.f32 %v3455_v46 }
 0x92b   :  { %5377 = vtanh.f32 %v5102_v57 }
 0x92f   :  { %v5370_v45 = vpop.eup %5369 }
 0x930   :  { %v2944_v9 = vmul.f32 %v5370_v45, %v5368_v4 }
 0x932   :  { %v5372_v12 = vpop.eup %5371  ;;  %3179 = vmatprep.mubr.f32.mxu0 %v2944_v9  ;;  %3250 = vmatprep.mubr.f32.mxu1 %v2944_v9 }
 0x933   :  { %v5374_v22 = vpop.eup %5373  ;;  %v3094_v28 = vadd.f32 1.0, %v5372_v12 }
 0x934   :  { %v3100_v55 = vadd.f32 1.0, %v5374_v22  ;;  %v5376_v63 = vpop.eup %5375 }
 0x935   :  { %5379 = vrcp.f32 %v3094_v28  ;;  %v5378_v50 = vpop.eup %5377  ;;  %v3107_v56 = vadd.f32 1.0, %v5376_v63 }
 0x936   :  { %5381 = vrcp.f32 %v3100_v55  ;;  %v3459_v55 = vld [vmem:[%s6824_s7] ss:$0 sm:$0xff] }
 0x937   :  { %5383 = vrcp.f32 %v3107_v56 }
 0x93f   :  { %v5380_v59 = vpop.eup %5379 }
 0x940   :  { %v5382_v0 = vpop.eup %5381  ;;  %v3111_v18 = vmul.f32 %v5380_v59, %v5378_v50 }
 0x941   :  { %v3110_v26 = vmul.f32 %v5382_v0, %v6684_v2  ;;  %v5384_v1 = vpop.eup %5383  ;;  %v3285_v2 = vld [vmem:[#allocation7 + $0x20] sm:$0xff] }
 0x942   :  { %v5055_v31 = vpack.c.bf16 %v3286_v27, %v3285_v2 }
 0x943   :  { %v3112_v3 = vadd.f32 %v3111_v18, %v3110_v26 }
 0x945   :  { %5385 = vtanh.f32 %v3112_v3 }
 0x94f   :  { %v5386_v38 = vpop.eup %5385 }
 0x950   :  { %v3114_v8 = vmul.f32 %v5386_v38, %v5384_v1 }
 0x952   :  { %3180 = vmatmul.mubr.f32.vlgmr.msra.gmra.mrb[30].mxu0 %v3114_v8  ;;  %3251 = vmatmul.mubr.f32.vlgmr.msra.gmra.mrb[30].mxu1 %v3114_v8 }
 0x953   :  { %5050 = vmatpush3.bf16.msra.mxu0 %v5049_v19  ;;  %3509 = vmatprep.mubr.msk.f32.mxu0 %vm5506_vm2, %v7023_v25 }
 0x954   :  { %5051 = vmatprep.subr.bf16.mxu0 %v5505_v11 }
 0x957   :  { %5053 = vmatpush3.bf16.msra.mxu0 %v5052_v23 }
 0x958   :  { %5054 = vmatprep.subr.bf16.mxu0 %v5505_v11 }
 0x95b   :  { %5056 = vmatpush3.bf16.msra.mxu0 %v5055_v31 }
 0x95c   :  { %5057 = vmatprep.subr.bf16.mxu0 %v5505_v11 }
 0x95f   :  { %5059 = vmatpush3.bf16.msra.mxu0 %v5058_v39 }
 0x960   :  { %5060 = vmatprep.subr.bf16.mxu0 %v5505_v11 }
 0x963   :  { %5062 = vmatpush3.bf16.msra.mxu0 %v5061_v53 }
 0x964   :  { %5063 = vmatprep.subr.bf16.mxu0 %v5505_v11 }
 0x967   :  { %5065 = vmatpush3.bf16.msra.mxu0 %v5064_v7 }
 0x968   :  { %5066 = vmatprep.subr.bf16.mxu0 %v5505_v11 }
 0x96b   :  { %5068 = vmatpush3.bf16.msra.mxu0 %v5067_v15 }
 0x96c   :  { %5069 = vmatprep.subr.bf16.mxu0 %v5505_v11 }
 0x96f   :  { %5071 = vmatpush3.bf16.msra.mxu0 %v5070_v32 }
 0xa25   :  { %v3181_v33 = vpop.f32.mrb[30].mxu0  ;;  %v3252_v34 = vpop.f32.mrb[30].mxu1 }
 0xa26   :  { %v3182_v41 = vadd.f32 %v3181_v33, %v7438_v21  ;;  %v3183_v51 = vpop.f32.mrb[31].mxu0  ;;  %v3254_v54 = vpop.f32.mrb[31].mxu1  ;;  %v3253_v24 = vadd.f32 %v3252_v34, %v7141_v42 }
 0xa27   :  { %v3184_v58 = vadd.f32 %v3183_v51, %v7139_v30  ;;  %v3255_v25 = vadd.f32 %v3254_v54, %v7439_v47 }
 0xa28   :  { %v3456_v10 = vmul.f32 -1.442695, %v3182_v41 }
 0xa29   :  { %v3457_v13 = vmul.f32 -1.442695, %v3184_v58  ;;  %v3458_v17 = vmul.f32 -1.442695, %v3255_v25 }
 0xa2a   :  { %5387 = vpow2.f32 %v3456_v10 }
 0xa2b   :  { %5389 = vpow2.f32 %v3457_v13 }
 0xa2c   :  { %5391 = vpow2.f32 %v3458_v17 }
 0xa2d   :  { %5393 = vtanh.f32 %v3253_v24 }
 0xa34   :  { %v5388_v29 = vpop.eup %5387 }
 0xa35   :  { %v5390_v40 = vpop.eup %5389  ;;  %v3260_v44 = vadd.f32 1.0, %v5388_v29 }
 0xa36   :  { %v3266_v4 = vadd.f32 1.0, %v5390_v40  ;;  %v5392_v21 = vpop.eup %5391 }
 0xa37   :  { %5395 = vrcp.f32 %v3260_v44  ;;  %v5394_v45 = vpop.eup %5393  ;;  %v3273_v9 = vadd.f32 1.0, %v5392_v21 }
 0xa38   :  { %5397 = vrcp.f32 %v3266_v4 }
 0xa39   :  { %5399 = vrcp.f32 %v3273_v9 }
 0xa41   :  { %v5396_v30 = vpop.eup %5395 }
 0xa42   :  { %v5398_v46 = vpop.eup %5397  ;;  %v3277_v57 = vmul.f32 %v5396_v30, %v5394_v45 }
 0xa43   :  { %v3276_v12 = vmul.f32 %v5398_v46, %v6788_v52  ;;  %v5400_v42 = vpop.eup %5399 }
 0xa45   :  { %v3278_v47 = vadd.f32 %v3277_v57, %v3276_v12 }
 0xa47   :  { %5401 = vtanh.f32 %v3278_v47 }
 0xa51   :  { %v5402_v22 = vpop.eup %5401 }
 0xa52   :  { %v3280_v28 = vmul.f32 %v5402_v22, %v5400_v42 }
 0xa54   :  { %3510 = vmatmul.mubr.f32.vlgmr.msra.gmra.mrb[32].mxu0 %v3280_v28 }
 0xb27   :  { %v3370_v63 = vpop.f32.mrb[32].mxu0 }
 0xb28   :  { %v3371_v50 = vadd.f32 %v3459_v55, %v3370_v63  ;;  %v3511_v59 = vpop.f32.mrb[33].mxu0 }
 0xb2a   :  { %3374 = vst [vmem:[#allocation8] sm:$0xff] %v3371_v50 }
 0xb2b   :  { %5480 = shalt.err (!%p5477_p0)
}
 0xb2c   :  { %s5481_s6 = scalar_lea.hbm %s6825_s8, 128 }
 0xb2d   :  { %p5482_p1 = scmp.ne.s32.totalorder %s6825_s8, %s5481_s6  ;;  %p5485_p2 = scmp.lt.u32.totalorder %s5481_s6, %s6825_s8 }
 0xb2f   :  { %p5487_p3 = pnand %p5485_p2, %p5482_p1 }
 0xb31   :  { %5490 = shalt.err (!%p5487_p3)
}
 0xb32   :  { %3384 = dma.vmem_to_hbm [thread:$0]  %s3382_s2, 128, %s6825_s8, [#allocation4]  }
 0xb33   :  { %5495 = dma.done.wait [#allocation4], 128  }
 0xb34   :  { %5496 = vsyncadd [#allocation4], 4294967168 }
 0xb35   :  { %3388 = vsyncpa [#allocation3], 1 }
 0xb36   :  { %3389 = vsyncpa [#allocation6], 1 }
 0xb37   :  { %3390 = vsyncpa [#allocation4], 1 }

</bundles_post_ra>
